<compile_context>
chip_gen: v7x
topology: tpu7x:2x2x1
jax: 0.10.0
libtpu: 0.0.40
codegen_flags: <defaults>
</compile_context>

<pallas_src>
import functools
import math

import jax
import jax.numpy as jnp
import numpy as np
from jax.experimental import pallas as pl
from jax.experimental.pallas import tpu as pltpu

# ---------------- synthetic model config (small, deterministic) ----------------
B, S, H = 2, 8, 32          # batch, sequence length, hidden size
NUM_HEADS, HEAD_DIM = 4, 8  # H = NUM_HEADS * HEAD_DIM
INTER = 4 * H               # BERT feed-forward intermediate size
NUM_LAYERS = 2              # "BERT的前两层transformer_block"
MAX_POS = 16                # position-embedding table size (>= S)
LN_EPS = 1e-12              # BERT LayerNorm eps


# --------------------------------- kernel math ---------------------------------
def _layer_norm(x, gamma, beta):
    mean = jnp.mean(x, axis=-1, keepdims=True)
    var = jnp.mean((x - mean) ** 2, axis=-1, keepdims=True)
    return (x - mean) * jax.lax.rsqrt(var + LN_EPS) * gamma + beta


def _gelu(x):
    # original-BERT tanh-approximation GELU (EUP-friendly; reference uses the same).
    c = math.sqrt(2.0 / math.pi)
    return 0.5 * x * (1.0 + jnp.tanh(c * (x + 0.044715 * x * x * x)))


def detection_kernel(word_ref, pos_ref,
                     wqkv_ref, bqkv_ref, wout_ref, bout_ref, ln_ref,
                     wfi_ref, bfi_ref, wfo_ref, bfo_ref,
                     dw_ref, db_ref,
                     hidden_ref, prob_ref, *, bb):
    # bb = number of batch rows handled in this grid step (flattened along sublanes)
    x = word_ref[...] + pos_ref[...]                                  # (bb*S, H)

    for l in range(NUM_LAYERS):                                       # static unroll
        # ---- multi-head self attention (per-head weights: no lane slicing, no concat)
        attn = None
        for h in range(NUM_HEADS):                                    # static unroll
            q = jnp.dot(x, wqkv_ref[l, 0, h],
                        preferred_element_type=jnp.float32) + bqkv_ref[l, 0, h]
            k = jnp.dot(x, wqkv_ref[l, 1, h],
                        preferred_element_type=jnp.float32) + bqkv_ref[l, 1, h]
            v = jnp.dot(x, wqkv_ref[l, 2, h],
                        preferred_element_type=jnp.float32) + bqkv_ref[l, 2, h]

            ctx_chunks = []
            for b in range(bb):                      # per-sequence attention; 8-row
                lo = b * S                           # (sublane-aligned) static slices
                scores = jax.lax.dot_general(
                    q[lo:lo + S], k[lo:lo + S], (((1,), (1,)), ((), ())),
                    preferred_element_type=jnp.float32)   # (S,S); 1/sqrt(d) folded in
                scores = scores - jnp.max(scores, axis=-1, keepdims=True)
                p = jnp.exp(scores)
                p = p * pl.reciprocal(jnp.sum(p, axis=-1, keepdims=True), approx=True)
                ctx_chunks.append(
                    jnp.dot(p, v[lo:lo + S], preferred_element_type=jnp.float32))
            ctx = ctx_chunks[0] if bb == 1 else jnp.concatenate(ctx_chunks, axis=0)

            part = jnp.dot(ctx, wout_ref[l, h], preferred_element_type=jnp.float32)
            attn = part if attn is None else attn + part

        x = _layer_norm(attn + bout_ref[l] + x, ln_ref[l, 0], ln_ref[l, 1])

        # ---- feed forward ----
        inter = _gelu(jnp.dot(x, wfi_ref[l],
                              preferred_element_type=jnp.float32) + bfi_ref[l])
        ffn = jnp.dot(inter, wfo_ref[l],
                      preferred_element_type=jnp.float32) + bfo_ref[l]
        x = _layer_norm(ffn + x, ln_ref[l, 2], ln_ref[l, 3])

    hidden_ref[...] = x
    # detection head (H -> 1): VPU multiply + lane reduce instead of an N=1 MXU matmul;
    # scalar bias comes from SMEM.
    logits = jnp.sum(x * dw_ref[...], axis=-1, keepdims=True) + db_ref[0]
    prob_ref[...] = pl.reciprocal(1.0 + jnp.exp(-logits), approx=True)    # sigmoid


# --------------------------- parameter packing / wrapper ---------------------------
def pack_params(p):
    """Repack canonical (PyTorch-layout) params into the kernel's per-head layout."""
    inv_sqrt_d = 1.0 / math.sqrt(HEAD_DIM)

    def split_heads_w(w):        # (L, H, H) -> (L, NUM_HEADS, H, HEAD_DIM)
        return w.reshape(NUM_LAYERS, H, NUM_HEADS, HEAD_DIM).transpose(0, 2, 1, 3)

    def split_heads_b(b):        # (L, 1, H) -> (L, NUM_HEADS, 1, HEAD_DIM)
        return b.reshape(NUM_LAYERS, 1, NUM_HEADS, HEAD_DIM).transpose(0, 2, 1, 3)

    wqkv = jnp.stack([split_heads_w(p["wq"]) * inv_sqrt_d,     # scale folded into Q
                      split_heads_w(p["wk"]),
                      split_heads_w(p["wv"])], axis=1)         # (L, 3, NH, H, D)
    bqkv = jnp.stack([split_heads_b(p["bq"]) * inv_sqrt_d,
                      split_heads_b(p["bk"]),
                      split_heads_b(p["bv"])], axis=1)         # (L, 3, NH, 1, D)
    wout = p["wo"].reshape(NUM_LAYERS, NUM_HEADS, HEAD_DIM, H)  # (L, NH, D, H)
    ln = jnp.stack([p["g1"], p["be1"], p["g2"], p["be2"]], axis=1)  # (L, 4, 1, H)

    return {
        "wqkv": wqkv, "bqkv": bqkv, "wout": wout, "bout": p["bo"], "ln": ln,
        "wfi": p["wi"], "bfi": p["bi"], "wfo": p["wo2"], "bfo": p["bo2"],
        "dw": p["dense_w"].reshape(1, H),
        "db": p["dense_b"].reshape(1),
    }


VMEM_PARAM_ORDER = ("wqkv", "bqkv", "wout", "bout", "ln",
                    "wfi", "bfi", "wfo", "bfo", "dw")


def _batch_block_size():
    """Batch rows per grid step: whole batch on single-TC chips, 1 per core on v7x."""
    try:
        kind = jax.devices()[0].device_kind.lower()
    except Exception:
        kind = ""
    if ("v7" in kind or "tpu7" in kind) and B % 2 == 0:
        return 1        # grid=(B,) "parallel" -> one batch element per TensorCore
    return B            # v5e / v6e (single TC): one grid step, no per-step overhead


def _resident(arr):
    """Whole array resident in VMEM, same block every grid step (never re-fetched)."""
    nd = arr.ndim

    def idx(i):
        return (0,) * nd

    # NOTE(perf): pipeline_mode=pl.Buffered(1) could drop the redundant double-buffer
    # for these constant-index blocks; skipped — total weights are only ~100 KB.
    return pl.BlockSpec(arr.shape, idx)


def detection_forward(word_embeddings, params):
    kp = pack_params(params)
    bb = _batch_block_size()
    n_steps = B // bb

    pos = params["pos_table"][:S]                 # Embedding(range(S)) == table[:S]
    pos_tiled = jnp.tile(pos, (bb, 1))            # (bb*S, H) matches flattened rows
    word_flat = word_embeddings.reshape(B * S, H)

    vmem_params = [kp[name] for name in VMEM_PARAM_ORDER]

    in_specs = [pl.BlockSpec((bb * S, H), lambda i: (i, 0)),   # word embeddings
                _resident(pos_tiled)]                          # position embeddings
    in_specs += [_resident(a) for a in vmem_params]            # stacked weights
    in_specs += [pl.BlockSpec(memory_space=pltpu.MemorySpace.SMEM)]  # scalar head bias

    out_shape = (jax.ShapeDtypeStruct((B * S, H), jnp.float32),
                 jax.ShapeDtypeStruct((B * S, 1), jnp.float32))
    out_specs = (pl.BlockSpec((bb * S, H), lambda i: (i, 0)),
                 pl.BlockSpec((bb * S, 1), lambda i: (i, 0)))

    hidden_flat, prob_flat = pl.pallas_call(
        functools.partial(detection_kernel, bb=bb),
        out_shape=out_shape,
        grid_spec=pltpu.PrefetchScalarGridSpec(
            num_scalar_prefetch=0,
            grid=(n_steps,),
            in_specs=in_specs,
            out_specs=out_specs,
        ),
        compiler_params=pltpu.CompilerParams(
            dimension_semantics=("parallel",)),
    )(word_flat, pos_tiled, *vmem_params, kp["db"])

    return hidden_flat.reshape(B, S, H), prob_flat.reshape(B, S, 1)


# ----------------------------- parameter init -----------------------------
def init_params(key):
    keys = jax.random.split(key, 16)

    def w(k, shape, scale=0.02):
        return (scale * jax.random.normal(k, shape)).astype(jnp.float32)

    return {
        "pos_table": w(keys[0], (MAX_POS, H)),
        "wq": w(keys[1], (NUM_LAYERS, H, H)),
        "bq": w(keys[2], (NUM_LAYERS, 1, H)),
        "wk": w(keys[3], (NUM_LAYERS, H, H)),
        "bk": w(keys[4], (NUM_LAYERS, 1, H)),
        "wv": w(keys[5], (NUM_LAYERS, H, H)),
        "bv": w(keys[6], (NUM_LAYERS, 1, H)),
        "wo": w(keys[7], (NUM_LAYERS, H, H)),
        "bo": w(keys[8], (NUM_LAYERS, 1, H)),
        "g1": jnp.ones((NUM_LAYERS, 1, H), jnp.float32),
        "be1": jnp.zeros((NUM_LAYERS, 1, H), jnp.float32),
        "wi": w(keys[9], (NUM_LAYERS, H, INTER)),
        "bi": w(keys[10], (NUM_LAYERS, 1, INTER)),
        "wo2": w(keys[11], (NUM_LAYERS, INTER, H)),
        "bo2": w(keys[12], (NUM_LAYERS, 1, H)),
        "g2": jnp.ones((NUM_LAYERS, 1, H), jnp.float32),
        "be2": jnp.zeros((NUM_LAYERS, 1, H), jnp.float32),
        "dense_w": w(keys[13], (H, 1)),
        "dense_b": w(keys[14], (1, 1)),
    }


# ----------------------------- pure-JAX reference -----------------------------
def reference_forward(word, p):
    x = word + p["pos_table"][:S][None]                                  # (B, S, H)
    for l in range(NUM_LAYERS):
        q = x @ p["wq"][l] + p["bq"][l]
        k = x @ p["wk"][l] + p["bk"][l]
        v = x @ p["wv"][l] + p["bv"][l]
        qh = q.reshape(B, S, NUM_HEADS, HEAD_DIM)
        kh = k.reshape(B, S, NUM_HEADS, HEAD_DIM)
        vh = v.reshape(B, S, NUM_HEADS, HEAD_DIM)
        scores = jnp.einsum("bqnd,bknd->bnqk", qh, kh) / math.sqrt(HEAD_DIM)
        probs = jax.nn.softmax(scores, axis=-1)
        ctx = jnp.einsum("bnqk,bknd->bqnd", probs, vh).reshape(B, S, H)
        attn_out = ctx @ p["wo"][l] + p["bo"][l]
        x = _layer_norm(attn_out + x, p["g1"][l], p["be1"][l])
        inter = _gelu(x @ p["wi"][l] + p["bi"][l])
        ffn = inter @ p["wo2"][l] + p["bo2"][l]
        x = _layer_norm(ffn + x, p["g2"][l], p["be2"][l])
    logits = x @ p["dense_w"] + p["dense_b"]
    return x, jax.nn.sigmoid(logits)


# ----------------------------------- main -----------------------------------
if __name__ == "__main__":
    key = jax.random.PRNGKey(0)
    k_params, k_input = jax.random.split(key)
    params = init_params(k_params)
    word_embeddings = (0.02 * jax.random.normal(
        k_input, (B, S, H))).astype(jnp.float32)

    hidden, probs = detection_forward(word_embeddings, params)
    hidden, probs = jax.block_until_ready((hidden, probs))

    ref_hidden, ref_probs = reference_forward(word_embeddings, params)
    err_h = float(jnp.max(jnp.abs(hidden - ref_hidden)))
    err_p = float(jnp.max(jnp.abs(probs - ref_probs)))
    assert np.isfinite(err_h) and np.isfinite(err_p)
    assert err_h < 5e-2 and err_p < 5e-2, (err_h, err_p)

    print("KERNEL_OK")
</pallas_src>

<mosaic_0001>
module attributes {stable_mosaic.version = 11 : i64} {
  func.func @detection_kernel(%arg0: i32, %arg1: memref<16x32xf32, #tpu.memory_space<vmem>>, %arg2: memref<16x32xf32, #tpu.memory_space<vmem>>, %arg3: memref<2x3x4x32x8xf32, #tpu.memory_space<vmem>>, %arg4: memref<2x3x4x1x8xf32, #tpu.memory_space<vmem>>, %arg5: memref<2x4x8x32xf32, #tpu.memory_space<vmem>>, %arg6: memref<2x1x32xf32, #tpu.memory_space<vmem>>, %arg7: memref<2x4x1x32xf32, #tpu.memory_space<vmem>>, %arg8: memref<2x32x128xf32, #tpu.memory_space<vmem>>, %arg9: memref<2x1x128xf32, #tpu.memory_space<vmem>>, %arg10: memref<2x128x32xf32, #tpu.memory_space<vmem>>, %arg11: memref<2x1x32xf32, #tpu.memory_space<vmem>>, %arg12: memref<1x32xf32, #tpu.memory_space<vmem>>, %arg13: memref<1xf32, #tpu.memory_space<smem>>, %arg14: memref<16x32xf32, #tpu.memory_space<vmem>>, %arg15: memref<16x1xf32, #tpu.memory_space<vmem>>) attributes {dimension_semantics = [#tpu.dimension_semantics<parallel>], iteration_bounds = array<i64: 1>, scalar_prefetch = 0 : i64, scratch_operands = 0 : i64, tpu.core_type = #tpu.core_type<tc>, window_params = [{transform_indices = @transform_0, window_bounds = array<i64: 16, 32>}, {pipeline_mode = #tpu.pipeline_mode<synchronous>, transform_indices = @transform_1, window_bounds = array<i64: 16, 32>}, {pipeline_mode = #tpu.pipeline_mode<synchronous>, transform_indices = @transform_2, window_bounds = array<i64: 2, 3, 4, 32, 8>}, {pipeline_mode = #tpu.pipeline_mode<synchronous>, transform_indices = @transform_3, window_bounds = array<i64: 2, 3, 4, 1, 8>}, {pipeline_mode = #tpu.pipeline_mode<synchronous>, transform_indices = @transform_4, window_bounds = array<i64: 2, 4, 8, 32>}, {pipeline_mode = #tpu.pipeline_mode<synchronous>, transform_indices = @transform_5, window_bounds = array<i64: 2, 1, 32>}, {pipeline_mode = #tpu.pipeline_mode<synchronous>, transform_indices = @transform_6, window_bounds = array<i64: 2, 4, 1, 32>}, {pipeline_mode = #tpu.pipeline_mode<synchronous>, transform_indices = @transform_7, window_bounds = array<i64: 2, 32, 128>}, {pipeline_mode = #tpu.pipeline_mode<synchronous>, transform_indices = @transform_8, window_bounds = array<i64: 2, 1, 128>}, {pipeline_mode = #tpu.pipeline_mode<synchronous>, transform_indices = @transform_9, window_bounds = array<i64: 2, 128, 32>}, {pipeline_mode = #tpu.pipeline_mode<synchronous>, transform_indices = @transform_10, window_bounds = array<i64: 2, 1, 32>}, {pipeline_mode = #tpu.pipeline_mode<synchronous>, transform_indices = @transform_11, window_bounds = array<i64: 1, 32>}, {transform_indices = @transform_12, window_bounds = array<i64: 1>}, {transform_indices = @transform_13, window_bounds = array<i64: 16, 32>}, {transform_indices = @transform_14, window_bounds = array<i64: 16, 1>}]} {
    %c0 = arith.constant 0 : index
    %c0_0 = arith.constant 0 : index
    %0 = vector.load %arg1[%c0, %c0_0] : memref<16x32xf32, #tpu.memory_space<vmem>>, vector<16x32xf32>
    %c0_1 = arith.constant 0 : index
    %c0_2 = arith.constant 0 : index
    %1 = vector.load %arg2[%c0_1, %c0_2] : memref<16x32xf32, #tpu.memory_space<vmem>>, vector<16x32xf32>
    %2 = arith.addf %0, %1 : vector<16x32xf32>
    %c0_3 = arith.constant 0 : index
    %c0_4 = arith.constant 0 : index
    %c0_5 = arith.constant 0 : index
    %c0_6 = arith.constant 0 : index
    %c0_7 = arith.constant 0 : index
    %3 = vector.load %arg3[%c0_3, %c0_4, %c0_5, %c0_6, %c0_7] : memref<2x3x4x32x8xf32, #tpu.memory_space<vmem>>, vector<1x1x1x32x8xf32>
    %4 = vector.shape_cast %3 : vector<1x1x1x32x8xf32> to vector<32x8xf32>
    %cst = arith.constant dense<0.000000e+00> : vector<16x8xf32>
    %5 = tpu.matmul %2, %4, %cst {dimension_numbers = #tpu.dot_dimension_numbers<[1], [0], [0], [1], [0, 0, 1, 1], [], []>} : vector<16x32xf32>, vector<32x8xf32>, vector<16x8xf32> -> vector<16x8xf32>
    %c0_8 = arith.constant 0 : index
    %c0_9 = arith.constant 0 : index
    %c0_10 = arith.constant 0 : index
    %c0_11 = arith.constant 0 : index
    %c0_12 = arith.constant 0 : index
    %6 = vector.load %arg4[%c0_8, %c0_9, %c0_10, %c0_11, %c0_12] : memref<2x3x4x1x8xf32, #tpu.memory_space<vmem>>, vector<1x1x1x1x8xf32>
    %7 = vector.shape_cast %6 : vector<1x1x1x1x8xf32> to vector<1x8xf32>
    %8 = vector.broadcast %7 : vector<1x8xf32> to vector<16x8xf32>
    %9 = arith.addf %5, %8 : vector<16x8xf32>
    %c0_13 = arith.constant 0 : index
    %c1 = arith.constant 1 : index
    %c0_14 = arith.constant 0 : index
    %c0_15 = arith.constant 0 : index
    %c0_16 = arith.constant 0 : index
    %10 = vector.load %arg3[%c0_13, %c1, %c0_14, %c0_15, %c0_16] : memref<2x3x4x32x8xf32, #tpu.memory_space<vmem>>, vector<1x1x1x32x8xf32>
    %11 = vector.shape_cast %10 : vector<1x1x1x32x8xf32> to vector<32x8xf32>
    %cst_17 = arith.constant dense<0.000000e+00> : vector<16x8xf32>
    %12 = tpu.matmul %2, %11, %cst_17 {dimension_numbers = #tpu.dot_dimension_numbers<[1], [0], [0], [1], [0, 0, 1, 1], [], []>} : vector<16x32xf32>, vector<32x8xf32>, vector<16x8xf32> -> vector<16x8xf32>
    %c0_18 = arith.constant 0 : index
    %c1_19 = arith.constant 1 : index
    %c0_20 = arith.constant 0 : index
    %c0_21 = arith.constant 0 : index
    %c0_22 = arith.constant 0 : index
    %13 = vector.load %arg4[%c0_18, %c1_19, %c0_20, %c0_21, %c0_22] : memref<2x3x4x1x8xf32, #tpu.memory_space<vmem>>, vector<1x1x1x1x8xf32>
    %14 = vector.shape_cast %13 : vector<1x1x1x1x8xf32> to vector<1x8xf32>
    %15 = vector.broadcast %14 : vector<1x8xf32> to vector<16x8xf32>
    %16 = arith.addf %12, %15 : vector<16x8xf32>
    %c0_23 = arith.constant 0 : index
    %c2 = arith.constant 2 : index
    %c0_24 = arith.constant 0 : index
    %c0_25 = arith.constant 0 : index
    %c0_26 = arith.constant 0 : index
    %17 = vector.load %arg3[%c0_23, %c2, %c0_24, %c0_25, %c0_26] : memref<2x3x4x32x8xf32, #tpu.memory_space<vmem>>, vector<1x1x1x32x8xf32>
    %18 = vector.shape_cast %17 : vector<1x1x1x32x8xf32> to vector<32x8xf32>
    %cst_27 = arith.constant dense<0.000000e+00> : vector<16x8xf32>
    %19 = tpu.matmul %2, %18, %cst_27 {dimension_numbers = #tpu.dot_dimension_numbers<[1], [0], [0], [1], [0, 0, 1, 1], [], []>} : vector<16x32xf32>, vector<32x8xf32>, vector<16x8xf32> -> vector<16x8xf32>
    %c0_28 = arith.constant 0 : index
    %c2_29 = arith.constant 2 : index
    %c0_30 = arith.constant 0 : index
    %c0_31 = arith.constant 0 : index
    %c0_32 = arith.constant 0 : index
    %20 = vector.load %arg4[%c0_28, %c2_29, %c0_30, %c0_31, %c0_32] : memref<2x3x4x1x8xf32, #tpu.memory_space<vmem>>, vector<1x1x1x1x8xf32>
    %21 = vector.shape_cast %20 : vector<1x1x1x1x8xf32> to vector<1x8xf32>
    %22 = vector.broadcast %21 : vector<1x8xf32> to vector<16x8xf32>
    %23 = arith.addf %19, %22 : vector<16x8xf32>
    %24 = vector.extract_strided_slice %9 {offsets = [0, 0], sizes = [8, 8], strides = [1, 1]} : vector<16x8xf32> to vector<8x8xf32>
    %25 = vector.extract_strided_slice %16 {offsets = [0, 0], sizes = [8, 8], strides = [1, 1]} : vector<16x8xf32> to vector<8x8xf32>
    %cst_33 = arith.constant dense<0.000000e+00> : vector<8x8xf32>
    %26 = tpu.matmul %24, %25, %cst_33 {dimension_numbers = #tpu.dot_dimension_numbers<[1], [1], [0], [0], [0, 0, 1, 0], [], []>} : vector<8x8xf32>, vector<8x8xf32>, vector<8x8xf32> -> vector<8x8xf32>
    %cst_34 = arith.constant dense<0xFF800000> : vector<8xf32>
    %27 = vector.multi_reduction <maximumf>, %26, %cst_34 [1] : vector<8x8xf32> to vector<8xf32>
    %28 = vector.shape_cast %27 : vector<8xf32> to vector<8x1xf32>
    %29 = vector.broadcast %28 : vector<8x1xf32> to vector<8x8xf32>
    %30 = arith.subf %26, %29 : vector<8x8xf32>
    %31 = math.exp %30 : vector<8x8xf32>
    %cst_35 = arith.constant dense<0.000000e+00> : vector<8xf32>
    %32 = vector.multi_reduction <add>, %31, %cst_35 [1] : vector<8x8xf32> to vector<8xf32>
    %33 = vector.shape_cast %32 : vector<8xf32> to vector<8x1xf32>
    %34 = tpu.reciprocal %33 {approx = true} : vector<8x1xf32> -> vector<8x1xf32>
    %35 = vector.broadcast %34 : vector<8x1xf32> to vector<8x8xf32>
    %36 = arith.mulf %31, %35 : vector<8x8xf32>
    %37 = vector.extract_strided_slice %23 {offsets = [0, 0], sizes = [8, 8], strides = [1, 1]} : vector<16x8xf32> to vector<8x8xf32>
    %cst_36 = arith.constant dense<0.000000e+00> : vector<8x8xf32>
    %38 = tpu.matmul %36, %37, %cst_36 {dimension_numbers = #tpu.dot_dimension_numbers<[1], [0], [0], [1], [0, 0, 1, 1], [], []>} : vector<8x8xf32>, vector<8x8xf32>, vector<8x8xf32> -> vector<8x8xf32>
    %39 = vector.extract_strided_slice %9 {offsets = [8, 0], sizes = [8, 8], strides = [1, 1]} : vector<16x8xf32> to vector<8x8xf32>
    %40 = vector.extract_strided_slice %16 {offsets = [8, 0], sizes = [8, 8], strides = [1, 1]} : vector<16x8xf32> to vector<8x8xf32>
    %cst_37 = arith.constant dense<0.000000e+00> : vector<8x8xf32>
    %41 = tpu.matmul %39, %40, %cst_37 {dimension_numbers = #tpu.dot_dimension_numbers<[1], [1], [0], [0], [0, 0, 1, 0], [], []>} : vector<8x8xf32>, vector<8x8xf32>, vector<8x8xf32> -> vector<8x8xf32>
    %cst_38 = arith.constant dense<0xFF800000> : vector<8xf32>
    %42 = vector.multi_reduction <maximumf>, %41, %cst_38 [1] : vector<8x8xf32> to vector<8xf32>
    %43 = vector.shape_cast %42 : vector<8xf32> to vector<8x1xf32>
    %44 = vector.broadcast %43 : vector<8x1xf32> to vector<8x8xf32>
    %45 = arith.subf %41, %44 : vector<8x8xf32>
    %46 = math.exp %45 : vector<8x8xf32>
    %cst_39 = arith.constant dense<0.000000e+00> : vector<8xf32>
    %47 = vector.multi_reduction <add>, %46, %cst_39 [1] : vector<8x8xf32> to vector<8xf32>
    %48 = vector.shape_cast %47 : vector<8xf32> to vector<8x1xf32>
    %49 = tpu.reciprocal %48 {approx = true} : vector<8x1xf32> -> vector<8x1xf32>
    %50 = vector.broadcast %49 : vector<8x1xf32> to vector<8x8xf32>
    %51 = arith.mulf %46, %50 : vector<8x8xf32>
    %52 = vector.extract_strided_slice %23 {offsets = [8, 0], sizes = [8, 8], strides = [1, 1]} : vector<16x8xf32> to vector<8x8xf32>
    %cst_40 = arith.constant dense<0.000000e+00> : vector<8x8xf32>
    %53 = tpu.matmul %51, %52, %cst_40 {dimension_numbers = #tpu.dot_dimension_numbers<[1], [0], [0], [1], [0, 0, 1, 1], [], []>} : vector<8x8xf32>, vector<8x8xf32>, vector<8x8xf32> -> vector<8x8xf32>
    %54 = tpu.concatenate %38, %53 in 0 : vector<8x8xf32>, vector<8x8xf32> -> vector<16x8xf32>
    %c0_41 = arith.constant 0 : index
    %c0_42 = arith.constant 0 : index
    %c0_43 = arith.constant 0 : index
    %c0_44 = arith.constant 0 : index
    %55 = vector.load %arg5[%c0_41, %c0_42, %c0_43, %c0_44] : memref<2x4x8x32xf32, #tpu.memory_space<vmem>>, vector<1x1x8x32xf32>
    %56 = vector.shape_cast %55 : vector<1x1x8x32xf32> to vector<8x32xf32>
    %cst_45 = arith.constant dense<0.000000e+00> : vector<16x32xf32>
    %57 = tpu.matmul %54, %56, %cst_45 {dimension_numbers = #tpu.dot_dimension_numbers<[1], [0], [0], [1], [0, 0, 1, 1], [], []>} : vector<16x8xf32>, vector<8x32xf32>, vector<16x32xf32> -> vector<16x32xf32>
    %c0_46 = arith.constant 0 : index
    %c0_47 = arith.constant 0 : index
    %c1_48 = arith.constant 1 : index
    %c0_49 = arith.constant 0 : index
    %c0_50 = arith.constant 0 : index
    %58 = vector.load %arg3[%c0_46, %c0_47, %c1_48, %c0_49, %c0_50] : memref<2x3x4x32x8xf32, #tpu.memory_space<vmem>>, vector<1x1x1x32x8xf32>
    %59 = vector.shape_cast %58 : vector<1x1x1x32x8xf32> to vector<32x8xf32>
    %cst_51 = arith.constant dense<0.000000e+00> : vector<16x8xf32>
    %60 = tpu.matmul %2, %59, %cst_51 {dimension_numbers = #tpu.dot_dimension_numbers<[1], [0], [0], [1], [0, 0, 1, 1], [], []>} : vector<16x32xf32>, vector<32x8xf32>, vector<16x8xf32> -> vector<16x8xf32>
    %c0_52 = arith.constant 0 : index
    %c0_53 = arith.constant 0 : index
    %c1_54 = arith.constant 1 : index
    %c0_55 = arith.constant 0 : index
    %c0_56 = arith.constant 0 : index
    %61 = vector.load %arg4[%c0_52, %c0_53, %c1_54, %c0_55, %c0_56] : memref<2x3x4x1x8xf32, #tpu.memory_space<vmem>>, vector<1x1x1x1x8xf32>
    %62 = vector.shape_cast %61 : vector<1x1x1x1x8xf32> to vector<1x8xf32>
    %63 = vector.broadcast %62 : vector<1x8xf32> to vector<16x8xf32>
    %64 = arith.addf %60, %63 : vector<16x8xf32>
    %c0_57 = arith.constant 0 : index
    %c1_58 = arith.constant 1 : index
    %c1_59 = arith.constant 1 : index
    %c0_60 = arith.constant 0 : index
    %c0_61 = arith.constant 0 : index
    %65 = vector.load %arg3[%c0_57, %c1_58, %c1_59, %c0_60, %c0_61] : memref<2x3x4x32x8xf32, #tpu.memory_space<vmem>>, vector<1x1x1x32x8xf32>
    %66 = vector.shape_cast %65 : vector<1x1x1x32x8xf32> to vector<32x8xf32>
    %cst_62 = arith.constant dense<0.000000e+00> : vector<16x8xf32>
    %67 = tpu.matmul %2, %66, %cst_62 {dimension_numbers = #tpu.dot_dimension_numbers<[1], [0], [0], [1], [0, 0, 1, 1], [], []>} : vector<16x32xf32>, vector<32x8xf32>, vector<16x8xf32> -> vector<16x8xf32>
    %c0_63 = arith.constant 0 : index
    %c1_64 = arith.constant 1 : index
    %c1_65 = arith.constant 1 : index
    %c0_66 = arith.constant 0 : index
    %c0_67 = arith.constant 0 : index
    %68 = vector.load %arg4[%c0_63, %c1_64, %c1_65, %c0_66, %c0_67] : memref<2x3x4x1x8xf32, #tpu.memory_space<vmem>>, vector<1x1x1x1x8xf32>
    %69 = vector.shape_cast %68 : vector<1x1x1x1x8xf32> to vector<1x8xf32>
    %70 = vector.broadcast %69 : vector<1x8xf32> to vector<16x8xf32>
    %71 = arith.addf %67, %70 : vector<16x8xf32>
    %c0_68 = arith.constant 0 : index
    %c2_69 = arith.constant 2 : index
    %c1_70 = arith.constant 1 : index
    %c0_71 = arith.constant 0 : index
    %c0_72 = arith.constant 0 : index
    %72 = vector.load %arg3[%c0_68, %c2_69, %c1_70, %c0_71, %c0_72] : memref<2x3x4x32x8xf32, #tpu.memory_space<vmem>>, vector<1x1x1x32x8xf32>
    %73 = vector.shape_cast %72 : vector<1x1x1x32x8xf32> to vector<32x8xf32>
    %cst_73 = arith.constant dense<0.000000e+00> : vector<16x8xf32>
    %74 = tpu.matmul %2, %73, %cst_73 {dimension_numbers = #tpu.dot_dimension_numbers<[1], [0], [0], [1], [0, 0, 1, 1], [], []>} : vector<16x32xf32>, vector<32x8xf32>, vector<16x8xf32> -> vector<16x8xf32>
    %c0_74 = arith.constant 0 : index
    %c2_75 = arith.constant 2 : index
    %c1_76 = arith.constant 1 : index
    %c0_77 = arith.constant 0 : index
    %c0_78 = arith.constant 0 : index
    %75 = vector.load %arg4[%c0_74, %c2_75, %c1_76, %c0_77, %c0_78] : memref<2x3x4x1x8xf32, #tpu.memory_space<vmem>>, vector<1x1x1x1x8xf32>
    %76 = vector.shape_cast %75 : vector<1x1x1x1x8xf32> to vector<1x8xf32>
    %77 = vector.broadcast %76 : vector<1x8xf32> to vector<16x8xf32>
    %78 = arith.addf %74, %77 : vector<16x8xf32>
    %79 = vector.extract_strided_slice %64 {offsets = [0, 0], sizes = [8, 8], strides = [1, 1]} : vector<16x8xf32> to vector<8x8xf32>
    %80 = vector.extract_strided_slice %71 {offsets = [0, 0], sizes = [8, 8], strides = [1, 1]} : vector<16x8xf32> to vector<8x8xf32>
    %cst_79 = arith.constant dense<0.000000e+00> : vector<8x8xf32>
    %81 = tpu.matmul %79, %80, %cst_79 {dimension_numbers = #tpu.dot_dimension_numbers<[1], [1], [0], [0], [0, 0, 1, 0], [], []>} : vector<8x8xf32>, vector<8x8xf32>, vector<8x8xf32> -> vector<8x8xf32>
    %cst_80 = arith.constant dense<0xFF800000> : vector<8xf32>
    %82 = vector.multi_reduction <maximumf>, %81, %cst_80 [1] : vector<8x8xf32> to vector<8xf32>
    %83 = vector.shape_cast %82 : vector<8xf32> to vector<8x1xf32>
    %84 = vector.broadcast %83 : vector<8x1xf32> to vector<8x8xf32>
    %85 = arith.subf %81, %84 : vector<8x8xf32>
    %86 = math.exp %85 : vector<8x8xf32>
    %cst_81 = arith.constant dense<0.000000e+00> : vector<8xf32>
    %87 = vector.multi_reduction <add>, %86, %cst_81 [1] : vector<8x8xf32> to vector<8xf32>
    %88 = vector.shape_cast %87 : vector<8xf32> to vector<8x1xf32>
    %89 = tpu.reciprocal %88 {approx = true} : vector<8x1xf32> -> vector<8x1xf32>
    %90 = vector.broadcast %89 : vector<8x1xf32> to vector<8x8xf32>
    %91 = arith.mulf %86, %90 : vector<8x8xf32>
    %92 = vector.extract_strided_slice %78 {offsets = [0, 0], sizes = [8, 8], strides = [1, 1]} : vector<16x8xf32> to vector<8x8xf32>
    %cst_82 = arith.constant dense<0.000000e+00> : vector<8x8xf32>
    %93 = tpu.matmul %91, %92, %cst_82 {dimension_numbers = #tpu.dot_dimension_numbers<[1], [0], [0], [1], [0, 0, 1, 1], [], []>} : vector<8x8xf32>, vector<8x8xf32>, vector<8x8xf32> -> vector<8x8xf32>
    %94 = vector.extract_strided_slice %64 {offsets = [8, 0], sizes = [8, 8], strides = [1, 1]} : vector<16x8xf32> to vector<8x8xf32>
    %95 = vector.extract_strided_slice %71 {offsets = [8, 0], sizes = [8, 8], strides = [1, 1]} : vector<16x8xf32> to vector<8x8xf32>
    %cst_83 = arith.constant dense<0.000000e+00> : vector<8x8xf32>
    %96 = tpu.matmul %94, %95, %cst_83 {dimension_numbers = #tpu.dot_dimension_numbers<[1], [1], [0], [0], [0, 0, 1, 0], [], []>} : vector<8x8xf32>, vector<8x8xf32>, vector<8x8xf32> -> vector<8x8xf32>
    %cst_84 = arith.constant dense<0xFF800000> : vector<8xf32>
    %97 = vector.multi_reduction <maximumf>, %96, %cst_84 [1] : vector<8x8xf32> to vector<8xf32>
    %98 = vector.shape_cast %97 : vector<8xf32> to vector<8x1xf32>
    %99 = vector.broadcast %98 : vector<8x1xf32> to vector<8x8xf32>
    %100 = arith.subf %96, %99 : vector<8x8xf32>
    %101 = math.exp %100 : vector<8x8xf32>
    %cst_85 = arith.constant dense<0.000000e+00> : vector<8xf32>
    %102 = vector.multi_reduction <add>, %101, %cst_85 [1] : vector<8x8xf32> to vector<8xf32>
    %103 = vector.shape_cast %102 : vector<8xf32> to vector<8x1xf32>
    %104 = tpu.reciprocal %103 {approx = true} : vector<8x1xf32> -> vector<8x1xf32>
    %105 = vector.broadcast %104 : vector<8x1xf32> to vector<8x8xf32>
    %106 = arith.mulf %101, %105 : vector<8x8xf32>
    %107 = vector.extract_strided_slice %78 {offsets = [8, 0], sizes = [8, 8], strides = [1, 1]} : vector<16x8xf32> to vector<8x8xf32>
    %cst_86 = arith.constant dense<0.000000e+00> : vector<8x8xf32>
    %108 = tpu.matmul %106, %107, %cst_86 {dimension_numbers = #tpu.dot_dimension_numbers<[1], [0], [0], [1], [0, 0, 1, 1], [], []>} : vector<8x8xf32>, vector<8x8xf32>, vector<8x8xf32> -> vector<8x8xf32>
    %109 = tpu.concatenate %93, %108 in 0 : vector<8x8xf32>, vector<8x8xf32> -> vector<16x8xf32>
    %c0_87 = arith.constant 0 : index
    %c1_88 = arith.constant 1 : index
    %c0_89 = arith.constant 0 : index
    %c0_90 = arith.constant 0 : index
    %110 = vector.load %arg5[%c0_87, %c1_88, %c0_89, %c0_90] : memref<2x4x8x32xf32, #tpu.memory_space<vmem>>, vector<1x1x8x32xf32>
    %111 = vector.shape_cast %110 : vector<1x1x8x32xf32> to vector<8x32xf32>
    %cst_91 = arith.constant dense<0.000000e+00> : vector<16x32xf32>
    %112 = tpu.matmul %109, %111, %cst_91 {dimension_numbers = #tpu.dot_dimension_numbers<[1], [0], [0], [1], [0, 0, 1, 1], [], []>} : vector<16x8xf32>, vector<8x32xf32>, vector<16x32xf32> -> vector<16x32xf32>
    %113 = arith.addf %57, %112 : vector<16x32xf32>
    %c0_92 = arith.constant 0 : index
    %c0_93 = arith.constant 0 : index
    %c2_94 = arith.constant 2 : index
    %c0_95 = arith.constant 0 : index
    %c0_96 = arith.constant 0 : index
    %114 = vector.load %arg3[%c0_92, %c0_93, %c2_94, %c0_95, %c0_96] : memref<2x3x4x32x8xf32, #tpu.memory_space<vmem>>, vector<1x1x1x32x8xf32>
    %115 = vector.shape_cast %114 : vector<1x1x1x32x8xf32> to vector<32x8xf32>
    %cst_97 = arith.constant dense<0.000000e+00> : vector<16x8xf32>
    %116 = tpu.matmul %2, %115, %cst_97 {dimension_numbers = #tpu.dot_dimension_numbers<[1], [0], [0], [1], [0, 0, 1, 1], [], []>} : vector<16x32xf32>, vector<32x8xf32>, vector<16x8xf32> -> vector<16x8xf32>
    %c0_98 = arith.constant 0 : index
    %c0_99 = arith.constant 0 : index
    %c2_100 = arith.constant 2 : index
    %c0_101 = arith.constant 0 : index
    %c0_102 = arith.constant 0 : index
    %117 = vector.load %arg4[%c0_98, %c0_99, %c2_100, %c0_101, %c0_102] : memref<2x3x4x1x8xf32, #tpu.memory_space<vmem>>, vector<1x1x1x1x8xf32>
    %118 = vector.shape_cast %117 : vector<1x1x1x1x8xf32> to vector<1x8xf32>
    %119 = vector.broadcast %118 : vector<1x8xf32> to vector<16x8xf32>
    %120 = arith.addf %116, %119 : vector<16x8xf32>
    %c0_103 = arith.constant 0 : index
    %c1_104 = arith.constant 1 : index
    %c2_105 = arith.constant 2 : index
    %c0_106 = arith.constant 0 : index
    %c0_107 = arith.constant 0 : index
    %121 = vector.load %arg3[%c0_103, %c1_104, %c2_105, %c0_106, %c0_107] : memref<2x3x4x32x8xf32, #tpu.memory_space<vmem>>, vector<1x1x1x32x8xf32>
    %122 = vector.shape_cast %121 : vector<1x1x1x32x8xf32> to vector<32x8xf32>
    %cst_108 = arith.constant dense<0.000000e+00> : vector<16x8xf32>
    %123 = tpu.matmul %2, %122, %cst_108 {dimension_numbers = #tpu.dot_dimension_numbers<[1], [0], [0], [1], [0, 0, 1, 1], [], []>} : vector<16x32xf32>, vector<32x8xf32>, vector<16x8xf32> -> vector<16x8xf32>
    %c0_109 = arith.constant 0 : index
    %c1_110 = arith.constant 1 : index
    %c2_111 = arith.constant 2 : index
    %c0_112 = arith.constant 0 : index
    %c0_113 = arith.constant 0 : index
    %124 = vector.load %arg4[%c0_109, %c1_110, %c2_111, %c0_112, %c0_113] : memref<2x3x4x1x8xf32, #tpu.memory_space<vmem>>, vector<1x1x1x1x8xf32>
    %125 = vector.shape_cast %124 : vector<1x1x1x1x8xf32> to vector<1x8xf32>
    %126 = vector.broadcast %125 : vector<1x8xf32> to vector<16x8xf32>
    %127 = arith.addf %123, %126 : vector<16x8xf32>
    %c0_114 = arith.constant 0 : index
    %c2_115 = arith.constant 2 : index
    %c2_116 = arith.constant 2 : index
    %c0_117 = arith.constant 0 : index
    %c0_118 = arith.constant 0 : index
    %128 = vector.load %arg3[%c0_114, %c2_115, %c2_116, %c0_117, %c0_118] : memref<2x3x4x32x8xf32, #tpu.memory_space<vmem>>, vector<1x1x1x32x8xf32>
    %129 = vector.shape_cast %128 : vector<1x1x1x32x8xf32> to vector<32x8xf32>
    %cst_119 = arith.constant dense<0.000000e+00> : vector<16x8xf32>
    %130 = tpu.matmul %2, %129, %cst_119 {dimension_numbers = #tpu.dot_dimension_numbers<[1], [0], [0], [1], [0, 0, 1, 1], [], []>} : vector<16x32xf32>, vector<32x8xf32>, vector<16x8xf32> -> vector<16x8xf32>
    %c0_120 = arith.constant 0 : index
    %c2_121 = arith.constant 2 : index
    %c2_122 = arith.constant 2 : index
    %c0_123 = arith.constant 0 : index
    %c0_124 = arith.constant 0 : index
    %131 = vector.load %arg4[%c0_120, %c2_121, %c2_122, %c0_123, %c0_124] : memref<2x3x4x1x8xf32, #tpu.memory_space<vmem>>, vector<1x1x1x1x8xf32>
    %132 = vector.shape_cast %131 : vector<1x1x1x1x8xf32> to vector<1x8xf32>
    %133 = vector.broadcast %132 : vector<1x8xf32> to vector<16x8xf32>
    %134 = arith.addf %130, %133 : vector<16x8xf32>
    %135 = vector.extract_strided_slice %120 {offsets = [0, 0], sizes = [8, 8], strides = [1, 1]} : vector<16x8xf32> to vector<8x8xf32>
    %136 = vector.extract_strided_slice %127 {offsets = [0, 0], sizes = [8, 8], strides = [1, 1]} : vector<16x8xf32> to vector<8x8xf32>
    %cst_125 = arith.constant dense<0.000000e+00> : vector<8x8xf32>
    %137 = tpu.matmul %135, %136, %cst_125 {dimension_numbers = #tpu.dot_dimension_numbers<[1], [1], [0], [0], [0, 0, 1, 0], [], []>} : vector<8x8xf32>, vector<8x8xf32>, vector<8x8xf32> -> vector<8x8xf32>
    %cst_126 = arith.constant dense<0xFF800000> : vector<8xf32>
    %138 = vector.multi_reduction <maximumf>, %137, %cst_126 [1] : vector<8x8xf32> to vector<8xf32>
    %139 = vector.shape_cast %138 : vector<8xf32> to vector<8x1xf32>
    %140 = vector.broadcast %139 : vector<8x1xf32> to vector<8x8xf32>
    %141 = arith.subf %137, %140 : vector<8x8xf32>
    %142 = math.exp %141 : vector<8x8xf32>
    %cst_127 = arith.constant dense<0.000000e+00> : vector<8xf32>
    %143 = vector.multi_reduction <add>, %142, %cst_127 [1] : vector<8x8xf32> to vector<8xf32>
    %144 = vector.shape_cast %143 : vector<8xf32> to vector<8x1xf32>
    %145 = tpu.reciprocal %144 {approx = true} : vector<8x1xf32> -> vector<8x1xf32>
    %146 = vector.broadcast %145 : vector<8x1xf32> to vector<8x8xf32>
    %147 = arith.mulf %142, %146 : vector<8x8xf32>
    %148 = vector.extract_strided_slice %134 {offsets = [0, 0], sizes = [8, 8], strides = [1, 1]} : vector<16x8xf32> to vector<8x8xf32>
    %cst_128 = arith.constant dense<0.000000e+00> : vector<8x8xf32>
    %149 = tpu.matmul %147, %148, %cst_128 {dimension_numbers = #tpu.dot_dimension_numbers<[1], [0], [0], [1], [0, 0, 1, 1], [], []>} : vector<8x8xf32>, vector<8x8xf32>, vector<8x8xf32> -> vector<8x8xf32>
    %150 = vector.extract_strided_slice %120 {offsets = [8, 0], sizes = [8, 8], strides = [1, 1]} : vector<16x8xf32> to vector<8x8xf32>
    %151 = vector.extract_strided_slice %127 {offsets = [8, 0], sizes = [8, 8], strides = [1, 1]} : vector<16x8xf32> to vector<8x8xf32>
    %cst_129 = arith.constant dense<0.000000e+00> : vector<8x8xf32>
    %152 = tpu.matmul %150, %151, %cst_129 {dimension_numbers = #tpu.dot_dimension_numbers<[1], [1], [0], [0], [0, 0, 1, 0], [], []>} : vector<8x8xf32>, vector<8x8xf32>, vector<8x8xf32> -> vector<8x8xf32>
    %cst_130 = arith.constant dense<0xFF800000> : vector<8xf32>
    %153 = vector.multi_reduction <maximumf>, %152, %cst_130 [1] : vector<8x8xf32> to vector<8xf32>
    %154 = vector.shape_cast %153 : vector<8xf32> to vector<8x1xf32>
    %155 = vector.broadcast %154 : vector<8x1xf32> to vector<8x8xf32>
    %156 = arith.subf %152, %155 : vector<8x8xf32>
    %157 = math.exp %156 : vector<8x8xf32>
    %cst_131 = arith.constant dense<0.000000e+00> : vector<8xf32>
    %158 = vector.multi_reduction <add>, %157, %cst_131 [1] : vector<8x8xf32> to vector<8xf32>
    %159 = vector.shape_cast %158 : vector<8xf32> to vector<8x1xf32>
    %160 = tpu.reciprocal %159 {approx = true} : vector<8x1xf32> -> vector<8x1xf32>
    %161 = vector.broadcast %160 : vector<8x1xf32> to vector<8x8xf32>
    %162 = arith.mulf %157, %161 : vector<8x8xf32>
    %163 = vector.extract_strided_slice %134 {offsets = [8, 0], sizes = [8, 8], strides = [1, 1]} : vector<16x8xf32> to vector<8x8xf32>
    %cst_132 = arith.constant dense<0.000000e+00> : vector<8x8xf32>
    %164 = tpu.matmul %162, %163, %cst_132 {dimension_numbers = #tpu.dot_dimension_numbers<[1], [0], [0], [1], [0, 0, 1, 1], [], []>} : vector<8x8xf32>, vector<8x8xf32>, vector<8x8xf32> -> vector<8x8xf32>
    %165 = tpu.concatenate %149, %164 in 0 : vector<8x8xf32>, vector<8x8xf32> -> vector<16x8xf32>
    %c0_133 = arith.constant 0 : index
    %c2_134 = arith.constant 2 : index
    %c0_135 = arith.constant 0 : index
    %c0_136 = arith.constant 0 : index
    %166 = vector.load %arg5[%c0_133, %c2_134, %c0_135, %c0_136] : memref<2x4x8x32xf32, #tpu.memory_space<vmem>>, vector<1x1x8x32xf32>
    %167 = vector.shape_cast %166 : vector<1x1x8x32xf32> to vector<8x32xf32>
    %cst_137 = arith.constant dense<0.000000e+00> : vector<16x32xf32>
    %168 = tpu.matmul %165, %167, %cst_137 {dimension_numbers = #tpu.dot_dimension_numbers<[1], [0], [0], [1], [0, 0, 1, 1], [], []>} : vector<16x8xf32>, vector<8x32xf32>, vector<16x32xf32> -> vector<16x32xf32>
    %169 = arith.addf %113, %168 : vector<16x32xf32>
    %c0_138 = arith.constant 0 : index
    %c0_139 = arith.constant 0 : index
    %c3 = arith.constant 3 : index
    %c0_140 = arith.constant 0 : index
    %c0_141 = arith.constant 0 : index
    %170 = vector.load %arg3[%c0_138, %c0_139, %c3, %c0_140, %c0_141] : memref<2x3x4x32x8xf32, #tpu.memory_space<vmem>>, vector<1x1x1x32x8xf32>
    %171 = vector.shape_cast %170 : vector<1x1x1x32x8xf32> to vector<32x8xf32>
    %cst_142 = arith.constant dense<0.000000e+00> : vector<16x8xf32>
    %172 = tpu.matmul %2, %171, %cst_142 {dimension_numbers = #tpu.dot_dimension_numbers<[1], [0], [0], [1], [0, 0, 1, 1], [], []>} : vector<16x32xf32>, vector<32x8xf32>, vector<16x8xf32> -> vector<16x8xf32>
    %c0_143 = arith.constant 0 : index
    %c0_144 = arith.constant 0 : index
    %c3_145 = arith.constant 3 : index
    %c0_146 = arith.constant 0 : index
    %c0_147 = arith.constant 0 : index
    %173 = vector.load %arg4[%c0_143, %c0_144, %c3_145, %c0_146, %c0_147] : memref<2x3x4x1x8xf32, #tpu.memory_space<vmem>>, vector<1x1x1x1x8xf32>
    %174 = vector.shape_cast %173 : vector<1x1x1x1x8xf32> to vector<1x8xf32>
    %175 = vector.broadcast %174 : vector<1x8xf32> to vector<16x8xf32>
    %176 = arith.addf %172, %175 : vector<16x8xf32>
    %c0_148 = arith.constant 0 : index
    %c1_149 = arith.constant 1 : index
    %c3_150 = arith.constant 3 : index
    %c0_151 = arith.constant 0 : index
    %c0_152 = arith.constant 0 : index
    %177 = vector.load %arg3[%c0_148, %c1_149, %c3_150, %c0_151, %c0_152] : memref<2x3x4x32x8xf32, #tpu.memory_space<vmem>>, vector<1x1x1x32x8xf32>
    %178 = vector.shape_cast %177 : vector<1x1x1x32x8xf32> to vector<32x8xf32>
    %cst_153 = arith.constant dense<0.000000e+00> : vector<16x8xf32>
    %179 = tpu.matmul %2, %178, %cst_153 {dimension_numbers = #tpu.dot_dimension_numbers<[1], [0], [0], [1], [0, 0, 1, 1], [], []>} : vector<16x32xf32>, vector<32x8xf32>, vector<16x8xf32> -> vector<16x8xf32>
    %c0_154 = arith.constant 0 : index
    %c1_155 = arith.constant 1 : index
    %c3_156 = arith.constant 3 : index
    %c0_157 = arith.constant 0 : index
    %c0_158 = arith.constant 0 : index
    %180 = vector.load %arg4[%c0_154, %c1_155, %c3_156, %c0_157, %c0_158] : memref<2x3x4x1x8xf32, #tpu.memory_space<vmem>>, vector<1x1x1x1x8xf32>
    %181 = vector.shape_cast %180 : vector<1x1x1x1x8xf32> to vector<1x8xf32>
    %182 = vector.broadcast %181 : vector<1x8xf32> to vector<16x8xf32>
    %183 = arith.addf %179, %182 : vector<16x8xf32>
    %c0_159 = arith.constant 0 : index
    %c2_160 = arith.constant 2 : index
    %c3_161 = arith.constant 3 : index
    %c0_162 = arith.constant 0 : index
    %c0_163 = arith.constant 0 : index
    %184 = vector.load %arg3[%c0_159, %c2_160, %c3_161, %c0_162, %c0_163] : memref<2x3x4x32x8xf32, #tpu.memory_space<vmem>>, vector<1x1x1x32x8xf32>
    %185 = vector.shape_cast %184 : vector<1x1x1x32x8xf32> to vector<32x8xf32>
    %cst_164 = arith.constant dense<0.000000e+00> : vector<16x8xf32>
    %186 = tpu.matmul %2, %185, %cst_164 {dimension_numbers = #tpu.dot_dimension_numbers<[1], [0], [0], [1], [0, 0, 1, 1], [], []>} : vector<16x32xf32>, vector<32x8xf32>, vector<16x8xf32> -> vector<16x8xf32>
    %c0_165 = arith.constant 0 : index
    %c2_166 = arith.constant 2 : index
    %c3_167 = arith.constant 3 : index
    %c0_168 = arith.constant 0 : index
    %c0_169 = arith.constant 0 : index
    %187 = vector.load %arg4[%c0_165, %c2_166, %c3_167, %c0_168, %c0_169] : memref<2x3x4x1x8xf32, #tpu.memory_space<vmem>>, vector<1x1x1x1x8xf32>
    %188 = vector.shape_cast %187 : vector<1x1x1x1x8xf32> to vector<1x8xf32>
    %189 = vector.broadcast %188 : vector<1x8xf32> to vector<16x8xf32>
    %190 = arith.addf %186, %189 : vector<16x8xf32>
    %191 = vector.extract_strided_slice %176 {offsets = [0, 0], sizes = [8, 8], strides = [1, 1]} : vector<16x8xf32> to vector<8x8xf32>
    %192 = vector.extract_strided_slice %183 {offsets = [0, 0], sizes = [8, 8], strides = [1, 1]} : vector<16x8xf32> to vector<8x8xf32>
    %cst_170 = arith.constant dense<0.000000e+00> : vector<8x8xf32>
    %193 = tpu.matmul %191, %192, %cst_170 {dimension_numbers = #tpu.dot_dimension_numbers<[1], [1], [0], [0], [0, 0, 1, 0], [], []>} : vector<8x8xf32>, vector<8x8xf32>, vector<8x8xf32> -> vector<8x8xf32>
    %cst_171 = arith.constant dense<0xFF800000> : vector<8xf32>
    %194 = vector.multi_reduction <maximumf>, %193, %cst_171 [1] : vector<8x8xf32> to vector<8xf32>
    %195 = vector.shape_cast %194 : vector<8xf32> to vector<8x1xf32>
    %196 = vector.broadcast %195 : vector<8x1xf32> to vector<8x8xf32>
    %197 = arith.subf %193, %196 : vector<8x8xf32>
    %198 = math.exp %197 : vector<8x8xf32>
    %cst_172 = arith.constant dense<0.000000e+00> : vector<8xf32>
    %199 = vector.multi_reduction <add>, %198, %cst_172 [1] : vector<8x8xf32> to vector<8xf32>
    %200 = vector.shape_cast %199 : vector<8xf32> to vector<8x1xf32>
    %201 = tpu.reciprocal %200 {approx = true} : vector<8x1xf32> -> vector<8x1xf32>
    %202 = vector.broadcast %201 : vector<8x1xf32> to vector<8x8xf32>
    %203 = arith.mulf %198, %202 : vector<8x8xf32>
    %204 = vector.extract_strided_slice %190 {offsets = [0, 0], sizes = [8, 8], strides = [1, 1]} : vector<16x8xf32> to vector<8x8xf32>
    %cst_173 = arith.constant dense<0.000000e+00> : vector<8x8xf32>
    %205 = tpu.matmul %203, %204, %cst_173 {dimension_numbers = #tpu.dot_dimension_numbers<[1], [0], [0], [1], [0, 0, 1, 1], [], []>} : vector<8x8xf32>, vector<8x8xf32>, vector<8x8xf32> -> vector<8x8xf32>
    %206 = vector.extract_strided_slice %176 {offsets = [8, 0], sizes = [8, 8], strides = [1, 1]} : vector<16x8xf32> to vector<8x8xf32>
    %207 = vector.extract_strided_slice %183 {offsets = [8, 0], sizes = [8, 8], strides = [1, 1]} : vector<16x8xf32> to vector<8x8xf32>
    %cst_174 = arith.constant dense<0.000000e+00> : vector<8x8xf32>
    %208 = tpu.matmul %206, %207, %cst_174 {dimension_numbers = #tpu.dot_dimension_numbers<[1], [1], [0], [0], [0, 0, 1, 0], [], []>} : vector<8x8xf32>, vector<8x8xf32>, vector<8x8xf32> -> vector<8x8xf32>
    %cst_175 = arith.constant dense<0xFF800000> : vector<8xf32>
    %209 = vector.multi_reduction <maximumf>, %208, %cst_175 [1] : vector<8x8xf32> to vector<8xf32>
    %210 = vector.shape_cast %209 : vector<8xf32> to vector<8x1xf32>
    %211 = vector.broadcast %210 : vector<8x1xf32> to vector<8x8xf32>
    %212 = arith.subf %208, %211 : vector<8x8xf32>
    %213 = math.exp %212 : vector<8x8xf32>
    %cst_176 = arith.constant dense<0.000000e+00> : vector<8xf32>
    %214 = vector.multi_reduction <add>, %213, %cst_176 [1] : vector<8x8xf32> to vector<8xf32>
    %215 = vector.shape_cast %214 : vector<8xf32> to vector<8x1xf32>
    %216 = tpu.reciprocal %215 {approx = true} : vector<8x1xf32> -> vector<8x1xf32>
    %217 = vector.broadcast %216 : vector<8x1xf32> to vector<8x8xf32>
    %218 = arith.mulf %213, %217 : vector<8x8xf32>
    %219 = vector.extract_strided_slice %190 {offsets = [8, 0], sizes = [8, 8], strides = [1, 1]} : vector<16x8xf32> to vector<8x8xf32>
    %cst_177 = arith.constant dense<0.000000e+00> : vector<8x8xf32>
    %220 = tpu.matmul %218, %219, %cst_177 {dimension_numbers = #tpu.dot_dimension_numbers<[1], [0], [0], [1], [0, 0, 1, 1], [], []>} : vector<8x8xf32>, vector<8x8xf32>, vector<8x8xf32> -> vector<8x8xf32>
    %221 = tpu.concatenate %205, %220 in 0 : vector<8x8xf32>, vector<8x8xf32> -> vector<16x8xf32>
    %c0_178 = arith.constant 0 : index
    %c3_179 = arith.constant 3 : index
    %c0_180 = arith.constant 0 : index
    %c0_181 = arith.constant 0 : index
    %222 = vector.load %arg5[%c0_178, %c3_179, %c0_180, %c0_181] : memref<2x4x8x32xf32, #tpu.memory_space<vmem>>, vector<1x1x8x32xf32>
    %223 = vector.shape_cast %222 : vector<1x1x8x32xf32> to vector<8x32xf32>
    %cst_182 = arith.constant dense<0.000000e+00> : vector<16x32xf32>
    %224 = tpu.matmul %221, %223, %cst_182 {dimension_numbers = #tpu.dot_dimension_numbers<[1], [0], [0], [1], [0, 0, 1, 1], [], []>} : vector<16x8xf32>, vector<8x32xf32>, vector<16x32xf32> -> vector<16x32xf32>
    %225 = arith.addf %169, %224 : vector<16x32xf32>
    %c0_183 = arith.constant 0 : index
    %c0_184 = arith.constant 0 : index
    %c0_185 = arith.constant 0 : index
    %226 = vector.load %arg6[%c0_183, %c0_184, %c0_185] : memref<2x1x32xf32, #tpu.memory_space<vmem>>, vector<1x1x32xf32>
    %227 = vector.shape_cast %226 : vector<1x1x32xf32> to vector<1x32xf32>
    %228 = vector.broadcast %227 : vector<1x32xf32> to vector<16x32xf32>
    %229 = arith.addf %225, %228 : vector<16x32xf32>
    %230 = arith.addf %229, %2 : vector<16x32xf32>
    %c0_186 = arith.constant 0 : index
    %c0_187 = arith.constant 0 : index
    %c0_188 = arith.constant 0 : index
    %c0_189 = arith.constant 0 : index
    %231 = vector.load %arg7[%c0_186, %c0_187, %c0_188, %c0_189] : memref<2x4x1x32xf32, #tpu.memory_space<vmem>>, vector<1x1x1x32xf32>
    %232 = vector.shape_cast %231 : vector<1x1x1x32xf32> to vector<1x32xf32>
    %c0_190 = arith.constant 0 : index
    %c1_191 = arith.constant 1 : index
    %c0_192 = arith.constant 0 : index
    %c0_193 = arith.constant 0 : index
    %233 = vector.load %arg7[%c0_190, %c1_191, %c0_192, %c0_193] : memref<2x4x1x32xf32, #tpu.memory_space<vmem>>, vector<1x1x1x32xf32>
    %234 = vector.shape_cast %233 : vector<1x1x1x32xf32> to vector<1x32xf32>
    %cst_194 = arith.constant dense<0.000000e+00> : vector<16xf32>
    %235 = vector.multi_reduction <add>, %230, %cst_194 [1] : vector<16x32xf32> to vector<16xf32>
    %236 = vector.shape_cast %235 : vector<16xf32> to vector<16x1xf32>
    %cst_195 = arith.constant 3.200000e+01 : f32
    %237 = vector.broadcast %cst_195 : f32 to vector<16x1xf32>
    %238 = arith.divf %236, %237 : vector<16x1xf32>
    %239 = vector.broadcast %238 : vector<16x1xf32> to vector<16x32xf32>
    %240 = arith.subf %230, %239 : vector<16x32xf32>
    %241 = arith.mulf %240, %240 : vector<16x32xf32>
    %cst_196 = arith.constant dense<0.000000e+00> : vector<16xf32>
    %242 = vector.multi_reduction <add>, %241, %cst_196 [1] : vector<16x32xf32> to vector<16xf32>
    %243 = vector.shape_cast %242 : vector<16xf32> to vector<16x1xf32>
    %cst_197 = arith.constant 3.200000e+01 : f32
    %244 = vector.broadcast %cst_197 : f32 to vector<16x1xf32>
    %245 = arith.divf %243, %244 : vector<16x1xf32>
    %246 = vector.broadcast %238 : vector<16x1xf32> to vector<16x32xf32>
    %247 = arith.subf %230, %246 : vector<16x32xf32>
    %cst_198 = arith.constant 9.99999996E-13 : f32
    %248 = vector.broadcast %cst_198 : f32 to vector<16x1xf32>
    %249 = arith.addf %245, %248 : vector<16x1xf32>
    %250 = math.rsqrt %249 : vector<16x1xf32>
    %251 = vector.broadcast %250 : vector<16x1xf32> to vector<16x32xf32>
    %252 = arith.mulf %247, %251 : vector<16x32xf32>
    %253 = vector.broadcast %232 : vector<1x32xf32> to vector<16x32xf32>
    %254 = arith.mulf %252, %253 : vector<16x32xf32>
    %255 = vector.broadcast %234 : vector<1x32xf32> to vector<16x32xf32>
    %256 = arith.addf %254, %255 : vector<16x32xf32>
    %c0_199 = arith.constant 0 : index
    %c0_200 = arith.constant 0 : index
    %c0_201 = arith.constant 0 : index
    %257 = vector.load %arg8[%c0_199, %c0_200, %c0_201] : memref<2x32x128xf32, #tpu.memory_space<vmem>>, vector<1x32x128xf32>
    %258 = vector.shape_cast %257 : vector<1x32x128xf32> to vector<32x128xf32>
    %cst_202 = arith.constant dense<0.000000e+00> : vector<16x128xf32>
    %259 = tpu.matmul %256, %258, %cst_202 {dimension_numbers = #tpu.dot_dimension_numbers<[1], [0], [0], [1], [0, 0, 1, 1], [], []>} : vector<16x32xf32>, vector<32x128xf32>, vector<16x128xf32> -> vector<16x128xf32>
    %c0_203 = arith.constant 0 : index
    %c0_204 = arith.constant 0 : index
    %c0_205 = arith.constant 0 : index
    %260 = vector.load %arg9[%c0_203, %c0_204, %c0_205] : memref<2x1x128xf32, #tpu.memory_space<vmem>>, vector<1x1x128xf32>
    %261 = vector.shape_cast %260 : vector<1x1x128xf32> to vector<1x128xf32>
    %262 = vector.broadcast %261 : vector<1x128xf32> to vector<16x128xf32>
    %263 = arith.addf %259, %262 : vector<16x128xf32>
    %cst_206 = arith.constant 5.000000e-01 : f32
    %264 = vector.broadcast %cst_206 : f32 to vector<16x128xf32>
    %265 = arith.mulf %264, %263 : vector<16x128xf32>
    %cst_207 = arith.constant 4.471500e-02 : f32
    %266 = vector.broadcast %cst_207 : f32 to vector<16x128xf32>
    %267 = arith.mulf %266, %263 : vector<16x128xf32>
    %268 = arith.mulf %267, %263 : vector<16x128xf32>
    %269 = arith.mulf %268, %263 : vector<16x128xf32>
    %270 = arith.addf %263, %269 : vector<16x128xf32>
    %cst_208 = arith.constant 0.797884583 : f32
    %271 = vector.broadcast %cst_208 : f32 to vector<16x128xf32>
    %272 = arith.mulf %271, %270 : vector<16x128xf32>
    %273 = math.tanh %272 : vector<16x128xf32>
    %cst_209 = arith.constant 1.000000e+00 : f32
    %274 = vector.broadcast %cst_209 : f32 to vector<16x128xf32>
    %275 = arith.addf %274, %273 : vector<16x128xf32>
    %276 = arith.mulf %265, %275 : vector<16x128xf32>
    %c0_210 = arith.constant 0 : index
    %c0_211 = arith.constant 0 : index
    %c0_212 = arith.constant 0 : index
    %277 = vector.load %arg10[%c0_210, %c0_211, %c0_212] : memref<2x128x32xf32, #tpu.memory_space<vmem>>, vector<1x128x32xf32>
    %278 = vector.shape_cast %277 : vector<1x128x32xf32> to vector<128x32xf32>
    %cst_213 = arith.constant dense<0.000000e+00> : vector<16x32xf32>
    %279 = tpu.matmul %276, %278, %cst_213 {dimension_numbers = #tpu.dot_dimension_numbers<[1], [0], [0], [1], [0, 0, 1, 1], [], []>} : vector<16x128xf32>, vector<128x32xf32>, vector<16x32xf32> -> vector<16x32xf32>
    %c0_214 = arith.constant 0 : index
    %c0_215 = arith.constant 0 : index
    %c0_216 = arith.constant 0 : index
    %280 = vector.load %arg11[%c0_214, %c0_215, %c0_216] : memref<2x1x32xf32, #tpu.memory_space<vmem>>, vector<1x1x32xf32>
    %281 = vector.shape_cast %280 : vector<1x1x32xf32> to vector<1x32xf32>
    %282 = vector.broadcast %281 : vector<1x32xf32> to vector<16x32xf32>
    %283 = arith.addf %279, %282 : vector<16x32xf32>
    %284 = arith.addf %283, %256 : vector<16x32xf32>
    %c0_217 = arith.constant 0 : index
    %c2_218 = arith.constant 2 : index
    %c0_219 = arith.constant 0 : index
    %c0_220 = arith.constant 0 : index
    %285 = vector.load %arg7[%c0_217, %c2_218, %c0_219, %c0_220] : memref<2x4x1x32xf32, #tpu.memory_space<vmem>>, vector<1x1x1x32xf32>
    %286 = vector.shape_cast %285 : vector<1x1x1x32xf32> to vector<1x32xf32>
    %c0_221 = arith.constant 0 : index
    %c3_222 = arith.constant 3 : index
    %c0_223 = arith.constant 0 : index
    %c0_224 = arith.constant 0 : index
    %287 = vector.load %arg7[%c0_221, %c3_222, %c0_223, %c0_224] : memref<2x4x1x32xf32, #tpu.memory_space<vmem>>, vector<1x1x1x32xf32>
    %288 = vector.shape_cast %287 : vector<1x1x1x32xf32> to vector<1x32xf32>
    %cst_225 = arith.constant dense<0.000000e+00> : vector<16xf32>
    %289 = vector.multi_reduction <add>, %284, %cst_225 [1] : vector<16x32xf32> to vector<16xf32>
    %290 = vector.shape_cast %289 : vector<16xf32> to vector<16x1xf32>
    %cst_226 = arith.constant 3.200000e+01 : f32
    %291 = vector.broadcast %cst_226 : f32 to vector<16x1xf32>
    %292 = arith.divf %290, %291 : vector<16x1xf32>
    %293 = vector.broadcast %292 : vector<16x1xf32> to vector<16x32xf32>
    %294 = arith.subf %284, %293 : vector<16x32xf32>
    %295 = arith.mulf %294, %294 : vector<16x32xf32>
    %cst_227 = arith.constant dense<0.000000e+00> : vector<16xf32>
    %296 = vector.multi_reduction <add>, %295, %cst_227 [1] : vector<16x32xf32> to vector<16xf32>
    %297 = vector.shape_cast %296 : vector<16xf32> to vector<16x1xf32>
    %cst_228 = arith.constant 3.200000e+01 : f32
    %298 = vector.broadcast %cst_228 : f32 to vector<16x1xf32>
    %299 = arith.divf %297, %298 : vector<16x1xf32>
    %300 = vector.broadcast %292 : vector<16x1xf32> to vector<16x32xf32>
    %301 = arith.subf %284, %300 : vector<16x32xf32>
    %cst_229 = arith.constant 9.99999996E-13 : f32
    %302 = vector.broadcast %cst_229 : f32 to vector<16x1xf32>
    %303 = arith.addf %299, %302 : vector<16x1xf32>
    %304 = math.rsqrt %303 : vector<16x1xf32>
    %305 = vector.broadcast %304 : vector<16x1xf32> to vector<16x32xf32>
    %306 = arith.mulf %301, %305 : vector<16x32xf32>
    %307 = vector.broadcast %286 : vector<1x32xf32> to vector<16x32xf32>
    %308 = arith.mulf %306, %307 : vector<16x32xf32>
    %309 = vector.broadcast %288 : vector<1x32xf32> to vector<16x32xf32>
    %310 = arith.addf %308, %309 : vector<16x32xf32>
    %c1_230 = arith.constant 1 : index
    %c0_231 = arith.constant 0 : index
    %c0_232 = arith.constant 0 : index
    %c0_233 = arith.constant 0 : index
    %c0_234 = arith.constant 0 : index
    %311 = vector.load %arg3[%c1_230, %c0_231, %c0_232, %c0_233, %c0_234] : memref<2x3x4x32x8xf32, #tpu.memory_space<vmem>>, vector<1x1x1x32x8xf32>
    %312 = vector.shape_cast %311 : vector<1x1x1x32x8xf32> to vector<32x8xf32>
    %cst_235 = arith.constant dense<0.000000e+00> : vector<16x8xf32>
    %313 = tpu.matmul %310, %312, %cst_235 {dimension_numbers = #tpu.dot_dimension_numbers<[1], [0], [0], [1], [0, 0, 1, 1], [], []>} : vector<16x32xf32>, vector<32x8xf32>, vector<16x8xf32> -> vector<16x8xf32>
    %c1_236 = arith.constant 1 : index
    %c0_237 = arith.constant 0 : index
    %c0_238 = arith.constant 0 : index
    %c0_239 = arith.constant 0 : index
    %c0_240 = arith.constant 0 : index
    %314 = vector.load %arg4[%c1_236, %c0_237, %c0_238, %c0_239, %c0_240] : memref<2x3x4x1x8xf32, #tpu.memory_space<vmem>>, vector<1x1x1x1x8xf32>
    %315 = vector.shape_cast %314 : vector<1x1x1x1x8xf32> to vector<1x8xf32>
    %316 = vector.broadcast %315 : vector<1x8xf32> to vector<16x8xf32>
    %317 = arith.addf %313, %316 : vector<16x8xf32>
    %c1_241 = arith.constant 1 : index
    %c1_242 = arith.constant 1 : index
    %c0_243 = arith.constant 0 : index
    %c0_244 = arith.constant 0 : index
    %c0_245 = arith.constant 0 : index
    %318 = vector.load %arg3[%c1_241, %c1_242, %c0_243, %c0_244, %c0_245] : memref<2x3x4x32x8xf32, #tpu.memory_space<vmem>>, vector<1x1x1x32x8xf32>
    %319 = vector.shape_cast %318 : vector<1x1x1x32x8xf32> to vector<32x8xf32>
    %cst_246 = arith.constant dense<0.000000e+00> : vector<16x8xf32>
    %320 = tpu.matmul %310, %319, %cst_246 {dimension_numbers = #tpu.dot_dimension_numbers<[1], [0], [0], [1], [0, 0, 1, 1], [], []>} : vector<16x32xf32>, vector<32x8xf32>, vector<16x8xf32> -> vector<16x8xf32>
    %c1_247 = arith.constant 1 : index
    %c1_248 = arith.constant 1 : index
    %c0_249 = arith.constant 0 : index
    %c0_250 = arith.constant 0 : index
    %c0_251 = arith.constant 0 : index
    %321 = vector.load %arg4[%c1_247, %c1_248, %c0_249, %c0_250, %c0_251] : memref<2x3x4x1x8xf32, #tpu.memory_space<vmem>>, vector<1x1x1x1x8xf32>
    %322 = vector.shape_cast %321 : vector<1x1x1x1x8xf32> to vector<1x8xf32>
    %323 = vector.broadcast %322 : vector<1x8xf32> to vector<16x8xf32>
    %324 = arith.addf %320, %323 : vector<16x8xf32>
    %c1_252 = arith.constant 1 : index
    %c2_253 = arith.constant 2 : index
    %c0_254 = arith.constant 0 : index
    %c0_255 = arith.constant 0 : index
    %c0_256 = arith.constant 0 : index
    %325 = vector.load %arg3[%c1_252, %c2_253, %c0_254, %c0_255, %c0_256] : memref<2x3x4x32x8xf32, #tpu.memory_space<vmem>>, vector<1x1x1x32x8xf32>
    %326 = vector.shape_cast %325 : vector<1x1x1x32x8xf32> to vector<32x8xf32>
    %cst_257 = arith.constant dense<0.000000e+00> : vector<16x8xf32>
    %327 = tpu.matmul %310, %326, %cst_257 {dimension_numbers = #tpu.dot_dimension_numbers<[1], [0], [0], [1], [0, 0, 1, 1], [], []>} : vector<16x32xf32>, vector<32x8xf32>, vector<16x8xf32> -> vector<16x8xf32>
    %c1_258 = arith.constant 1 : index
    %c2_259 = arith.constant 2 : index
    %c0_260 = arith.constant 0 : index
    %c0_261 = arith.constant 0 : index
    %c0_262 = arith.constant 0 : index
    %328 = vector.load %arg4[%c1_258, %c2_259, %c0_260, %c0_261, %c0_262] : memref<2x3x4x1x8xf32, #tpu.memory_space<vmem>>, vector<1x1x1x1x8xf32>
    %329 = vector.shape_cast %328 : vector<1x1x1x1x8xf32> to vector<1x8xf32>
    %330 = vector.broadcast %329 : vector<1x8xf32> to vector<16x8xf32>
    %331 = arith.addf %327, %330 : vector<16x8xf32>
    %332 = vector.extract_strided_slice %317 {offsets = [0, 0], sizes = [8, 8], strides = [1, 1]} : vector<16x8xf32> to vector<8x8xf32>
    %333 = vector.extract_strided_slice %324 {offsets = [0, 0], sizes = [8, 8], strides = [1, 1]} : vector<16x8xf32> to vector<8x8xf32>
    %cst_263 = arith.constant dense<0.000000e+00> : vector<8x8xf32>
    %334 = tpu.matmul %332, %333, %cst_263 {dimension_numbers = #tpu.dot_dimension_numbers<[1], [1], [0], [0], [0, 0, 1, 0], [], []>} : vector<8x8xf32>, vector<8x8xf32>, vector<8x8xf32> -> vector<8x8xf32>
    %cst_264 = arith.constant dense<0xFF800000> : vector<8xf32>
    %335 = vector.multi_reduction <maximumf>, %334, %cst_264 [1] : vector<8x8xf32> to vector<8xf32>
    %336 = vector.shape_cast %335 : vector<8xf32> to vector<8x1xf32>
    %337 = vector.broadcast %336 : vector<8x1xf32> to vector<8x8xf32>
    %338 = arith.subf %334, %337 : vector<8x8xf32>
    %339 = math.exp %338 : vector<8x8xf32>
    %cst_265 = arith.constant dense<0.000000e+00> : vector<8xf32>
    %340 = vector.multi_reduction <add>, %339, %cst_265 [1] : vector<8x8xf32> to vector<8xf32>
    %341 = vector.shape_cast %340 : vector<8xf32> to vector<8x1xf32>
    %342 = tpu.reciprocal %341 {approx = true} : vector<8x1xf32> -> vector<8x1xf32>
    %343 = vector.broadcast %342 : vector<8x1xf32> to vector<8x8xf32>
    %344 = arith.mulf %339, %343 : vector<8x8xf32>
    %345 = vector.extract_strided_slice %331 {offsets = [0, 0], sizes = [8, 8], strides = [1, 1]} : vector<16x8xf32> to vector<8x8xf32>
    %cst_266 = arith.constant dense<0.000000e+00> : vector<8x8xf32>
    %346 = tpu.matmul %344, %345, %cst_266 {dimension_numbers = #tpu.dot_dimension_numbers<[1], [0], [0], [1], [0, 0, 1, 1], [], []>} : vector<8x8xf32>, vector<8x8xf32>, vector<8x8xf32> -> vector<8x8xf32>
    %347 = vector.extract_strided_slice %317 {offsets = [8, 0], sizes = [8, 8], strides = [1, 1]} : vector<16x8xf32> to vector<8x8xf32>
    %348 = vector.extract_strided_slice %324 {offsets = [8, 0], sizes = [8, 8], strides = [1, 1]} : vector<16x8xf32> to vector<8x8xf32>
    %cst_267 = arith.constant dense<0.000000e+00> : vector<8x8xf32>
    %349 = tpu.matmul %347, %348, %cst_267 {dimension_numbers = #tpu.dot_dimension_numbers<[1], [1], [0], [0], [0, 0, 1, 0], [], []>} : vector<8x8xf32>, vector<8x8xf32>, vector<8x8xf32> -> vector<8x8xf32>
    %cst_268 = arith.constant dense<0xFF800000> : vector<8xf32>
    %350 = vector.multi_reduction <maximumf>, %349, %cst_268 [1] : vector<8x8xf32> to vector<8xf32>
    %351 = vector.shape_cast %350 : vector<8xf32> to vector<8x1xf32>
    %352 = vector.broadcast %351 : vector<8x1xf32> to vector<8x8xf32>
    %353 = arith.subf %349, %352 : vector<8x8xf32>
    %354 = math.exp %353 : vector<8x8xf32>
    %cst_269 = arith.constant dense<0.000000e+00> : vector<8xf32>
    %355 = vector.multi_reduction <add>, %354, %cst_269 [1] : vector<8x8xf32> to vector<8xf32>
    %356 = vector.shape_cast %355 : vector<8xf32> to vector<8x1xf32>
    %357 = tpu.reciprocal %356 {approx = true} : vector<8x1xf32> -> vector<8x1xf32>
    %358 = vector.broadcast %357 : vector<8x1xf32> to vector<8x8xf32>
    %359 = arith.mulf %354, %358 : vector<8x8xf32>
    %360 = vector.extract_strided_slice %331 {offsets = [8, 0], sizes = [8, 8], strides = [1, 1]} : vector<16x8xf32> to vector<8x8xf32>
    %cst_270 = arith.constant dense<0.000000e+00> : vector<8x8xf32>
    %361 = tpu.matmul %359, %360, %cst_270 {dimension_numbers = #tpu.dot_dimension_numbers<[1], [0], [0], [1], [0, 0, 1, 1], [], []>} : vector<8x8xf32>, vector<8x8xf32>, vector<8x8xf32> -> vector<8x8xf32>
    %362 = tpu.concatenate %346, %361 in 0 : vector<8x8xf32>, vector<8x8xf32> -> vector<16x8xf32>
    %c1_271 = arith.constant 1 : index
    %c0_272 = arith.constant 0 : index
    %c0_273 = arith.constant 0 : index
    %c0_274 = arith.constant 0 : index
    %363 = vector.load %arg5[%c1_271, %c0_272, %c0_273, %c0_274] : memref<2x4x8x32xf32, #tpu.memory_space<vmem>>, vector<1x1x8x32xf32>
    %364 = vector.shape_cast %363 : vector<1x1x8x32xf32> to vector<8x32xf32>
    %cst_275 = arith.constant dense<0.000000e+00> : vector<16x32xf32>
    %365 = tpu.matmul %362, %364, %cst_275 {dimension_numbers = #tpu.dot_dimension_numbers<[1], [0], [0], [1], [0, 0, 1, 1], [], []>} : vector<16x8xf32>, vector<8x32xf32>, vector<16x32xf32> -> vector<16x32xf32>
    %c1_276 = arith.constant 1 : index
    %c0_277 = arith.constant 0 : index
    %c1_278 = arith.constant 1 : index
    %c0_279 = arith.constant 0 : index
    %c0_280 = arith.constant 0 : index
    %366 = vector.load %arg3[%c1_276, %c0_277, %c1_278, %c0_279, %c0_280] : memref<2x3x4x32x8xf32, #tpu.memory_space<vmem>>, vector<1x1x1x32x8xf32>
    %367 = vector.shape_cast %366 : vector<1x1x1x32x8xf32> to vector<32x8xf32>
    %cst_281 = arith.constant dense<0.000000e+00> : vector<16x8xf32>
    %368 = tpu.matmul %310, %367, %cst_281 {dimension_numbers = #tpu.dot_dimension_numbers<[1], [0], [0], [1], [0, 0, 1, 1], [], []>} : vector<16x32xf32>, vector<32x8xf32>, vector<16x8xf32> -> vector<16x8xf32>
    %c1_282 = arith.constant 1 : index
    %c0_283 = arith.constant 0 : index
    %c1_284 = arith.constant 1 : index
    %c0_285 = arith.constant 0 : index
    %c0_286 = arith.constant 0 : index
    %369 = vector.load %arg4[%c1_282, %c0_283, %c1_284, %c0_285, %c0_286] : memref<2x3x4x1x8xf32, #tpu.memory_space<vmem>>, vector<1x1x1x1x8xf32>
    %370 = vector.shape_cast %369 : vector<1x1x1x1x8xf32> to vector<1x8xf32>
    %371 = vector.broadcast %370 : vector<1x8xf32> to vector<16x8xf32>
    %372 = arith.addf %368, %371 : vector<16x8xf32>
    %c1_287 = arith.constant 1 : index
    %c1_288 = arith.constant 1 : index
    %c1_289 = arith.constant 1 : index
    %c0_290 = arith.constant 0 : index
    %c0_291 = arith.constant 0 : index
    %373 = vector.load %arg3[%c1_287, %c1_288, %c1_289, %c0_290, %c0_291] : memref<2x3x4x32x8xf32, #tpu.memory_space<vmem>>, vector<1x1x1x32x8xf32>
    %374 = vector.shape_cast %373 : vector<1x1x1x32x8xf32> to vector<32x8xf32>
    %cst_292 = arith.constant dense<0.000000e+00> : vector<16x8xf32>
    %375 = tpu.matmul %310, %374, %cst_292 {dimension_numbers = #tpu.dot_dimension_numbers<[1], [0], [0], [1], [0, 0, 1, 1], [], []>} : vector<16x32xf32>, vector<32x8xf32>, vector<16x8xf32> -> vector<16x8xf32>
    %c1_293 = arith.constant 1 : index
    %c1_294 = arith.constant 1 : index
    %c1_295 = arith.constant 1 : index
    %c0_296 = arith.constant 0 : index
    %c0_297 = arith.constant 0 : index
    %376 = vector.load %arg4[%c1_293, %c1_294, %c1_295, %c0_296, %c0_297] : memref<2x3x4x1x8xf32, #tpu.memory_space<vmem>>, vector<1x1x1x1x8xf32>
    %377 = vector.shape_cast %376 : vector<1x1x1x1x8xf32> to vector<1x8xf32>
    %378 = vector.broadcast %377 : vector<1x8xf32> to vector<16x8xf32>
    %379 = arith.addf %375, %378 : vector<16x8xf32>
    %c1_298 = arith.constant 1 : index
    %c2_299 = arith.constant 2 : index
    %c1_300 = arith.constant 1 : index
    %c0_301 = arith.constant 0 : index
    %c0_302 = arith.constant 0 : index
    %380 = vector.load %arg3[%c1_298, %c2_299, %c1_300, %c0_301, %c0_302] : memref<2x3x4x32x8xf32, #tpu.memory_space<vmem>>, vector<1x1x1x32x8xf32>
    %381 = vector.shape_cast %380 : vector<1x1x1x32x8xf32> to vector<32x8xf32>
    %cst_303 = arith.constant dense<0.000000e+00> : vector<16x8xf32>
    %382 = tpu.matmul %310, %381, %cst_303 {dimension_numbers = #tpu.dot_dimension_numbers<[1], [0], [0], [1], [0, 0, 1, 1], [], []>} : vector<16x32xf32>, vector<32x8xf32>, vector<16x8xf32> -> vector<16x8xf32>
    %c1_304 = arith.constant 1 : index
    %c2_305 = arith.constant 2 : index
    %c1_306 = arith.constant 1 : index
    %c0_307 = arith.constant 0 : index
    %c0_308 = arith.constant 0 : index
    %383 = vector.load %arg4[%c1_304, %c2_305, %c1_306, %c0_307, %c0_308] : memref<2x3x4x1x8xf32, #tpu.memory_space<vmem>>, vector<1x1x1x1x8xf32>
    %384 = vector.shape_cast %383 : vector<1x1x1x1x8xf32> to vector<1x8xf32>
    %385 = vector.broadcast %384 : vector<1x8xf32> to vector<16x8xf32>
    %386 = arith.addf %382, %385 : vector<16x8xf32>
    %387 = vector.extract_strided_slice %372 {offsets = [0, 0], sizes = [8, 8], strides = [1, 1]} : vector<16x8xf32> to vector<8x8xf32>
    %388 = vector.extract_strided_slice %379 {offsets = [0, 0], sizes = [8, 8], strides = [1, 1]} : vector<16x8xf32> to vector<8x8xf32>
    %cst_309 = arith.constant dense<0.000000e+00> : vector<8x8xf32>
    %389 = tpu.matmul %387, %388, %cst_309 {dimension_numbers = #tpu.dot_dimension_numbers<[1], [1], [0], [0], [0, 0, 1, 0], [], []>} : vector<8x8xf32>, vector<8x8xf32>, vector<8x8xf32> -> vector<8x8xf32>
    %cst_310 = arith.constant dense<0xFF800000> : vector<8xf32>
    %390 = vector.multi_reduction <maximumf>, %389, %cst_310 [1] : vector<8x8xf32> to vector<8xf32>
    %391 = vector.shape_cast %390 : vector<8xf32> to vector<8x1xf32>
    %392 = vector.broadcast %391 : vector<8x1xf32> to vector<8x8xf32>
    %393 = arith.subf %389, %392 : vector<8x8xf32>
    %394 = math.exp %393 : vector<8x8xf32>
    %cst_311 = arith.constant dense<0.000000e+00> : vector<8xf32>
    %395 = vector.multi_reduction <add>, %394, %cst_311 [1] : vector<8x8xf32> to vector<8xf32>
    %396 = vector.shape_cast %395 : vector<8xf32> to vector<8x1xf32>
    %397 = tpu.reciprocal %396 {approx = true} : vector<8x1xf32> -> vector<8x1xf32>
    %398 = vector.broadcast %397 : vector<8x1xf32> to vector<8x8xf32>
    %399 = arith.mulf %394, %398 : vector<8x8xf32>
    %400 = vector.extract_strided_slice %386 {offsets = [0, 0], sizes = [8, 8], strides = [1, 1]} : vector<16x8xf32> to vector<8x8xf32>
    %cst_312 = arith.constant dense<0.000000e+00> : vector<8x8xf32>
    %401 = tpu.matmul %399, %400, %cst_312 {dimension_numbers = #tpu.dot_dimension_numbers<[1], [0], [0], [1], [0, 0, 1, 1], [], []>} : vector<8x8xf32>, vector<8x8xf32>, vector<8x8xf32> -> vector<8x8xf32>
    %402 = vector.extract_strided_slice %372 {offsets = [8, 0], sizes = [8, 8], strides = [1, 1]} : vector<16x8xf32> to vector<8x8xf32>
    %403 = vector.extract_strided_slice %379 {offsets = [8, 0], sizes = [8, 8], strides = [1, 1]} : vector<16x8xf32> to vector<8x8xf32>
    %cst_313 = arith.constant dense<0.000000e+00> : vector<8x8xf32>
    %404 = tpu.matmul %402, %403, %cst_313 {dimension_numbers = #tpu.dot_dimension_numbers<[1], [1], [0], [0], [0, 0, 1, 0], [], []>} : vector<8x8xf32>, vector<8x8xf32>, vector<8x8xf32> -> vector<8x8xf32>
    %cst_314 = arith.constant dense<0xFF800000> : vector<8xf32>
    %405 = vector.multi_reduction <maximumf>, %404, %cst_314 [1] : vector<8x8xf32> to vector<8xf32>
    %406 = vector.shape_cast %405 : vector<8xf32> to vector<8x1xf32>
    %407 = vector.broadcast %406 : vector<8x1xf32> to vector<8x8xf32>
    %408 = arith.subf %404, %407 : vector<8x8xf32>
    %409 = math.exp %408 : vector<8x8xf32>
    %cst_315 = arith.constant dense<0.000000e+00> : vector<8xf32>
    %410 = vector.multi_reduction <add>, %409, %cst_315 [1] : vector<8x8xf32> to vector<8xf32>
    %411 = vector.shape_cast %410 : vector<8xf32> to vector<8x1xf32>
    %412 = tpu.reciprocal %411 {approx = true} : vector<8x1xf32> -> vector<8x1xf32>
    %413 = vector.broadcast %412 : vector<8x1xf32> to vector<8x8xf32>
    %414 = arith.mulf %409, %413 : vector<8x8xf32>
    %415 = vector.extract_strided_slice %386 {offsets = [8, 0], sizes = [8, 8], strides = [1, 1]} : vector<16x8xf32> to vector<8x8xf32>
    %cst_316 = arith.constant dense<0.000000e+00> : vector<8x8xf32>
    %416 = tpu.matmul %414, %415, %cst_316 {dimension_numbers = #tpu.dot_dimension_numbers<[1], [0], [0], [1], [0, 0, 1, 1], [], []>} : vector<8x8xf32>, vector<8x8xf32>, vector<8x8xf32> -> vector<8x8xf32>
    %417 = tpu.concatenate %401, %416 in 0 : vector<8x8xf32>, vector<8x8xf32> -> vector<16x8xf32>
    %c1_317 = arith.constant 1 : index
    %c1_318 = arith.constant 1 : index
    %c0_319 = arith.constant 0 : index
    %c0_320 = arith.constant 0 : index
    %418 = vector.load %arg5[%c1_317, %c1_318, %c0_319, %c0_320] : memref<2x4x8x32xf32, #tpu.memory_space<vmem>>, vector<1x1x8x32xf32>
    %419 = vector.shape_cast %418 : vector<1x1x8x32xf32> to vector<8x32xf32>
    %cst_321 = arith.constant dense<0.000000e+00> : vector<16x32xf32>
    %420 = tpu.matmul %417, %419, %cst_321 {dimension_numbers = #tpu.dot_dimension_numbers<[1], [0], [0], [1], [0, 0, 1, 1], [], []>} : vector<16x8xf32>, vector<8x32xf32>, vector<16x32xf32> -> vector<16x32xf32>
    %421 = arith.addf %365, %420 : vector<16x32xf32>
    %c1_322 = arith.constant 1 : index
    %c0_323 = arith.constant 0 : index
    %c2_324 = arith.constant 2 : index
    %c0_325 = arith.constant 0 : index
    %c0_326 = arith.constant 0 : index
    %422 = vector.load %arg3[%c1_322, %c0_323, %c2_324, %c0_325, %c0_326] : memref<2x3x4x32x8xf32, #tpu.memory_space<vmem>>, vector<1x1x1x32x8xf32>
    %423 = vector.shape_cast %422 : vector<1x1x1x32x8xf32> to vector<32x8xf32>
    %cst_327 = arith.constant dense<0.000000e+00> : vector<16x8xf32>
    %424 = tpu.matmul %310, %423, %cst_327 {dimension_numbers = #tpu.dot_dimension_numbers<[1], [0], [0], [1], [0, 0, 1, 1], [], []>} : vector<16x32xf32>, vector<32x8xf32>, vector<16x8xf32> -> vector<16x8xf32>
    %c1_328 = arith.constant 1 : index
    %c0_329 = arith.constant 0 : index
    %c2_330 = arith.constant 2 : index
    %c0_331 = arith.constant 0 : index
    %c0_332 = arith.constant 0 : index
    %425 = vector.load %arg4[%c1_328, %c0_329, %c2_330, %c0_331, %c0_332] : memref<2x3x4x1x8xf32, #tpu.memory_space<vmem>>, vector<1x1x1x1x8xf32>
    %426 = vector.shape_cast %425 : vector<1x1x1x1x8xf32> to vector<1x8xf32>
    %427 = vector.broadcast %426 : vector<1x8xf32> to vector<16x8xf32>
    %428 = arith.addf %424, %427 : vector<16x8xf32>
    %c1_333 = arith.constant 1 : index
    %c1_334 = arith.constant 1 : index
    %c2_335 = arith.constant 2 : index
    %c0_336 = arith.constant 0 : index
    %c0_337 = arith.constant 0 : index
    %429 = vector.load %arg3[%c1_333, %c1_334, %c2_335, %c0_336, %c0_337] : memref<2x3x4x32x8xf32, #tpu.memory_space<vmem>>, vector<1x1x1x32x8xf32>
    %430 = vector.shape_cast %429 : vector<1x1x1x32x8xf32> to vector<32x8xf32>
    %cst_338 = arith.constant dense<0.000000e+00> : vector<16x8xf32>
    %431 = tpu.matmul %310, %430, %cst_338 {dimension_numbers = #tpu.dot_dimension_numbers<[1], [0], [0], [1], [0, 0, 1, 1], [], []>} : vector<16x32xf32>, vector<32x8xf32>, vector<16x8xf32> -> vector<16x8xf32>
    %c1_339 = arith.constant 1 : index
    %c1_340 = arith.constant 1 : index
    %c2_341 = arith.constant 2 : index
    %c0_342 = arith.constant 0 : index
    %c0_343 = arith.constant 0 : index
    %432 = vector.load %arg4[%c1_339, %c1_340, %c2_341, %c0_342, %c0_343] : memref<2x3x4x1x8xf32, #tpu.memory_space<vmem>>, vector<1x1x1x1x8xf32>
    %433 = vector.shape_cast %432 : vector<1x1x1x1x8xf32> to vector<1x8xf32>
    %434 = vector.broadcast %433 : vector<1x8xf32> to vector<16x8xf32>
    %435 = arith.addf %431, %434 : vector<16x8xf32>
    %c1_344 = arith.constant 1 : index
    %c2_345 = arith.constant 2 : index
    %c2_346 = arith.constant 2 : index
    %c0_347 = arith.constant 0 : index
    %c0_348 = arith.constant 0 : index
    %436 = vector.load %arg3[%c1_344, %c2_345, %c2_346, %c0_347, %c0_348] : memref<2x3x4x32x8xf32, #tpu.memory_space<vmem>>, vector<1x1x1x32x8xf32>
    %437 = vector.shape_cast %436 : vector<1x1x1x32x8xf32> to vector<32x8xf32>
    %cst_349 = arith.constant dense<0.000000e+00> : vector<16x8xf32>
    %438 = tpu.matmul %310, %437, %cst_349 {dimension_numbers = #tpu.dot_dimension_numbers<[1], [0], [0], [1], [0, 0, 1, 1], [], []>} : vector<16x32xf32>, vector<32x8xf32>, vector<16x8xf32> -> vector<16x8xf32>
    %c1_350 = arith.constant 1 : index
    %c2_351 = arith.constant 2 : index
    %c2_352 = arith.constant 2 : index
    %c0_353 = arith.constant 0 : index
    %c0_354 = arith.constant 0 : index
    %439 = vector.load %arg4[%c1_350, %c2_351, %c2_352, %c0_353, %c0_354] : memref<2x3x4x1x8xf32, #tpu.memory_space<vmem>>, vector<1x1x1x1x8xf32>
    %440 = vector.shape_cast %439 : vector<1x1x1x1x8xf32> to vector<1x8xf32>
    %441 = vector.broadcast %440 : vector<1x8xf32> to vector<16x8xf32>
    %442 = arith.addf %438, %441 : vector<16x8xf32>
    %443 = vector.extract_strided_slice %428 {offsets = [0, 0], sizes = [8, 8], strides = [1, 1]} : vector<16x8xf32> to vector<8x8xf32>
    %444 = vector.extract_strided_slice %435 {offsets = [0, 0], sizes = [8, 8], strides = [1, 1]} : vector<16x8xf32> to vector<8x8xf32>
    %cst_355 = arith.constant dense<0.000000e+00> : vector<8x8xf32>
    %445 = tpu.matmul %443, %444, %cst_355 {dimension_numbers = #tpu.dot_dimension_numbers<[1], [1], [0], [0], [0, 0, 1, 0], [], []>} : vector<8x8xf32>, vector<8x8xf32>, vector<8x8xf32> -> vector<8x8xf32>
    %cst_356 = arith.constant dense<0xFF800000> : vector<8xf32>
    %446 = vector.multi_reduction <maximumf>, %445, %cst_356 [1] : vector<8x8xf32> to vector<8xf32>
    %447 = vector.shape_cast %446 : vector<8xf32> to vector<8x1xf32>
    %448 = vector.broadcast %447 : vector<8x1xf32> to vector<8x8xf32>
    %449 = arith.subf %445, %448 : vector<8x8xf32>
    %450 = math.exp %449 : vector<8x8xf32>
    %cst_357 = arith.constant dense<0.000000e+00> : vector<8xf32>
    %451 = vector.multi_reduction <add>, %450, %cst_357 [1] : vector<8x8xf32> to vector<8xf32>
    %452 = vector.shape_cast %451 : vector<8xf32> to vector<8x1xf32>
    %453 = tpu.reciprocal %452 {approx = true} : vector<8x1xf32> -> vector<8x1xf32>
    %454 = vector.broadcast %453 : vector<8x1xf32> to vector<8x8xf32>
    %455 = arith.mulf %450, %454 : vector<8x8xf32>
    %456 = vector.extract_strided_slice %442 {offsets = [0, 0], sizes = [8, 8], strides = [1, 1]} : vector<16x8xf32> to vector<8x8xf32>
    %cst_358 = arith.constant dense<0.000000e+00> : vector<8x8xf32>
    %457 = tpu.matmul %455, %456, %cst_358 {dimension_numbers = #tpu.dot_dimension_numbers<[1], [0], [0], [1], [0, 0, 1, 1], [], []>} : vector<8x8xf32>, vector<8x8xf32>, vector<8x8xf32> -> vector<8x8xf32>
    %458 = vector.extract_strided_slice %428 {offsets = [8, 0], sizes = [8, 8], strides = [1, 1]} : vector<16x8xf32> to vector<8x8xf32>
    %459 = vector.extract_strided_slice %435 {offsets = [8, 0], sizes = [8, 8], strides = [1, 1]} : vector<16x8xf32> to vector<8x8xf32>
    %cst_359 = arith.constant dense<0.000000e+00> : vector<8x8xf32>
    %460 = tpu.matmul %458, %459, %cst_359 {dimension_numbers = #tpu.dot_dimension_numbers<[1], [1], [0], [0], [0, 0, 1, 0], [], []>} : vector<8x8xf32>, vector<8x8xf32>, vector<8x8xf32> -> vector<8x8xf32>
    %cst_360 = arith.constant dense<0xFF800000> : vector<8xf32>
    %461 = vector.multi_reduction <maximumf>, %460, %cst_360 [1] : vector<8x8xf32> to vector<8xf32>
    %462 = vector.shape_cast %461 : vector<8xf32> to vector<8x1xf32>
    %463 = vector.broadcast %462 : vector<8x1xf32> to vector<8x8xf32>
    %464 = arith.subf %460, %463 : vector<8x8xf32>
    %465 = math.exp %464 : vector<8x8xf32>
    %cst_361 = arith.constant dense<0.000000e+00> : vector<8xf32>
    %466 = vector.multi_reduction <add>, %465, %cst_361 [1] : vector<8x8xf32> to vector<8xf32>
    %467 = vector.shape_cast %466 : vector<8xf32> to vector<8x1xf32>
    %468 = tpu.reciprocal %467 {approx = true} : vector<8x1xf32> -> vector<8x1xf32>
    %469 = vector.broadcast %468 : vector<8x1xf32> to vector<8x8xf32>
    %470 = arith.mulf %465, %469 : vector<8x8xf32>
    %471 = vector.extract_strided_slice %442 {offsets = [8, 0], sizes = [8, 8], strides = [1, 1]} : vector<16x8xf32> to vector<8x8xf32>
    %cst_362 = arith.constant dense<0.000000e+00> : vector<8x8xf32>
    %472 = tpu.matmul %470, %471, %cst_362 {dimension_numbers = #tpu.dot_dimension_numbers<[1], [0], [0], [1], [0, 0, 1, 1], [], []>} : vector<8x8xf32>, vector<8x8xf32>, vector<8x8xf32> -> vector<8x8xf32>
    %473 = tpu.concatenate %457, %472 in 0 : vector<8x8xf32>, vector<8x8xf32> -> vector<16x8xf32>
    %c1_363 = arith.constant 1 : index
    %c2_364 = arith.constant 2 : index
    %c0_365 = arith.constant 0 : index
    %c0_366 = arith.constant 0 : index
    %474 = vector.load %arg5[%c1_363, %c2_364, %c0_365, %c0_366] : memref<2x4x8x32xf32, #tpu.memory_space<vmem>>, vector<1x1x8x32xf32>
    %475 = vector.shape_cast %474 : vector<1x1x8x32xf32> to vector<8x32xf32>
    %cst_367 = arith.constant dense<0.000000e+00> : vector<16x32xf32>
    %476 = tpu.matmul %473, %475, %cst_367 {dimension_numbers = #tpu.dot_dimension_numbers<[1], [0], [0], [1], [0, 0, 1, 1], [], []>} : vector<16x8xf32>, vector<8x32xf32>, vector<16x32xf32> -> vector<16x32xf32>
    %477 = arith.addf %421, %476 : vector<16x32xf32>
    %c1_368 = arith.constant 1 : index
    %c0_369 = arith.constant 0 : index
    %c3_370 = arith.constant 3 : index
    %c0_371 = arith.constant 0 : index
    %c0_372 = arith.constant 0 : index
    %478 = vector.load %arg3[%c1_368, %c0_369, %c3_370, %c0_371, %c0_372] : memref<2x3x4x32x8xf32, #tpu.memory_space<vmem>>, vector<1x1x1x32x8xf32>
    %479 = vector.shape_cast %478 : vector<1x1x1x32x8xf32> to vector<32x8xf32>
    %cst_373 = arith.constant dense<0.000000e+00> : vector<16x8xf32>
    %480 = tpu.matmul %310, %479, %cst_373 {dimension_numbers = #tpu.dot_dimension_numbers<[1], [0], [0], [1], [0, 0, 1, 1], [], []>} : vector<16x32xf32>, vector<32x8xf32>, vector<16x8xf32> -> vector<16x8xf32>
    %c1_374 = arith.constant 1 : index
    %c0_375 = arith.constant 0 : index
    %c3_376 = arith.constant 3 : index
    %c0_377 = arith.constant 0 : index
    %c0_378 = arith.constant 0 : index
    %481 = vector.load %arg4[%c1_374, %c0_375, %c3_376, %c0_377, %c0_378] : memref<2x3x4x1x8xf32, #tpu.memory_space<vmem>>, vector<1x1x1x1x8xf32>
    %482 = vector.shape_cast %481 : vector<1x1x1x1x8xf32> to vector<1x8xf32>
    %483 = vector.broadcast %482 : vector<1x8xf32> to vector<16x8xf32>
    %484 = arith.addf %480, %483 : vector<16x8xf32>
    %c1_379 = arith.constant 1 : index
    %c1_380 = arith.constant 1 : index
    %c3_381 = arith.constant 3 : index
    %c0_382 = arith.constant 0 : index
    %c0_383 = arith.constant 0 : index
    %485 = vector.load %arg3[%c1_379, %c1_380, %c3_381, %c0_382, %c0_383] : memref<2x3x4x32x8xf32, #tpu.memory_space<vmem>>, vector<1x1x1x32x8xf32>
    %486 = vector.shape_cast %485 : vector<1x1x1x32x8xf32> to vector<32x8xf32>
    %cst_384 = arith.constant dense<0.000000e+00> : vector<16x8xf32>
    %487 = tpu.matmul %310, %486, %cst_384 {dimension_numbers = #tpu.dot_dimension_numbers<[1], [0], [0], [1], [0, 0, 1, 1], [], []>} : vector<16x32xf32>, vector<32x8xf32>, vector<16x8xf32> -> vector<16x8xf32>
    %c1_385 = arith.constant 1 : index
    %c1_386 = arith.constant 1 : index
    %c3_387 = arith.constant 3 : index
    %c0_388 = arith.constant 0 : index
    %c0_389 = arith.constant 0 : index
    %488 = vector.load %arg4[%c1_385, %c1_386, %c3_387, %c0_388, %c0_389] : memref<2x3x4x1x8xf32, #tpu.memory_space<vmem>>, vector<1x1x1x1x8xf32>
    %489 = vector.shape_cast %488 : vector<1x1x1x1x8xf32> to vector<1x8xf32>
    %490 = vector.broadcast %489 : vector<1x8xf32> to vector<16x8xf32>
    %491 = arith.addf %487, %490 : vector<16x8xf32>
    %c1_390 = arith.constant 1 : index
    %c2_391 = arith.constant 2 : index
    %c3_392 = arith.constant 3 : index
    %c0_393 = arith.constant 0 : index
    %c0_394 = arith.constant 0 : index
    %492 = vector.load %arg3[%c1_390, %c2_391, %c3_392, %c0_393, %c0_394] : memref<2x3x4x32x8xf32, #tpu.memory_space<vmem>>, vector<1x1x1x32x8xf32>
    %493 = vector.shape_cast %492 : vector<1x1x1x32x8xf32> to vector<32x8xf32>
    %cst_395 = arith.constant dense<0.000000e+00> : vector<16x8xf32>
    %494 = tpu.matmul %310, %493, %cst_395 {dimension_numbers = #tpu.dot_dimension_numbers<[1], [0], [0], [1], [0, 0, 1, 1], [], []>} : vector<16x32xf32>, vector<32x8xf32>, vector<16x8xf32> -> vector<16x8xf32>
    %c1_396 = arith.constant 1 : index
    %c2_397 = arith.constant 2 : index
    %c3_398 = arith.constant 3 : index
    %c0_399 = arith.constant 0 : index
    %c0_400 = arith.constant 0 : index
    %495 = vector.load %arg4[%c1_396, %c2_397, %c3_398, %c0_399, %c0_400] : memref<2x3x4x1x8xf32, #tpu.memory_space<vmem>>, vector<1x1x1x1x8xf32>
    %496 = vector.shape_cast %495 : vector<1x1x1x1x8xf32> to vector<1x8xf32>
    %497 = vector.broadcast %496 : vector<1x8xf32> to vector<16x8xf32>
    %498 = arith.addf %494, %497 : vector<16x8xf32>
    %499 = vector.extract_strided_slice %484 {offsets = [0, 0], sizes = [8, 8], strides = [1, 1]} : vector<16x8xf32> to vector<8x8xf32>
    %500 = vector.extract_strided_slice %491 {offsets = [0, 0], sizes = [8, 8], strides = [1, 1]} : vector<16x8xf32> to vector<8x8xf32>
    %cst_401 = arith.constant dense<0.000000e+00> : vector<8x8xf32>
    %501 = tpu.matmul %499, %500, %cst_401 {dimension_numbers = #tpu.dot_dimension_numbers<[1], [1], [0], [0], [0, 0, 1, 0], [], []>} : vector<8x8xf32>, vector<8x8xf32>, vector<8x8xf32> -> vector<8x8xf32>
    %cst_402 = arith.constant dense<0xFF800000> : vector<8xf32>
    %502 = vector.multi_reduction <maximumf>, %501, %cst_402 [1] : vector<8x8xf32> to vector<8xf32>
    %503 = vector.shape_cast %502 : vector<8xf32> to vector<8x1xf32>
    %504 = vector.broadcast %503 : vector<8x1xf32> to vector<8x8xf32>
    %505 = arith.subf %501, %504 : vector<8x8xf32>
    %506 = math.exp %505 : vector<8x8xf32>
    %cst_403 = arith.constant dense<0.000000e+00> : vector<8xf32>
    %507 = vector.multi_reduction <add>, %506, %cst_403 [1] : vector<8x8xf32> to vector<8xf32>
    %508 = vector.shape_cast %507 : vector<8xf32> to vector<8x1xf32>
    %509 = tpu.reciprocal %508 {approx = true} : vector<8x1xf32> -> vector<8x1xf32>
    %510 = vector.broadcast %509 : vector<8x1xf32> to vector<8x8xf32>
    %511 = arith.mulf %506, %510 : vector<8x8xf32>
    %512 = vector.extract_strided_slice %498 {offsets = [0, 0], sizes = [8, 8], strides = [1, 1]} : vector<16x8xf32> to vector<8x8xf32>
    %cst_404 = arith.constant dense<0.000000e+00> : vector<8x8xf32>
    %513 = tpu.matmul %511, %512, %cst_404 {dimension_numbers = #tpu.dot_dimension_numbers<[1], [0], [0], [1], [0, 0, 1, 1], [], []>} : vector<8x8xf32>, vector<8x8xf32>, vector<8x8xf32> -> vector<8x8xf32>
    %514 = vector.extract_strided_slice %484 {offsets = [8, 0], sizes = [8, 8], strides = [1, 1]} : vector<16x8xf32> to vector<8x8xf32>
    %515 = vector.extract_strided_slice %491 {offsets = [8, 0], sizes = [8, 8], strides = [1, 1]} : vector<16x8xf32> to vector<8x8xf32>
    %cst_405 = arith.constant dense<0.000000e+00> : vector<8x8xf32>
    %516 = tpu.matmul %514, %515, %cst_405 {dimension_numbers = #tpu.dot_dimension_numbers<[1], [1], [0], [0], [0, 0, 1, 0], [], []>} : vector<8x8xf32>, vector<8x8xf32>, vector<8x8xf32> -> vector<8x8xf32>
    %cst_406 = arith.constant dense<0xFF800000> : vector<8xf32>
    %517 = vector.multi_reduction <maximumf>, %516, %cst_406 [1] : vector<8x8xf32> to vector<8xf32>
    %518 = vector.shape_cast %517 : vector<8xf32> to vector<8x1xf32>
    %519 = vector.broadcast %518 : vector<8x1xf32> to vector<8x8xf32>
    %520 = arith.subf %516, %519 : vector<8x8xf32>
    %521 = math.exp %520 : vector<8x8xf32>
    %cst_407 = arith.constant dense<0.000000e+00> : vector<8xf32>
    %522 = vector.multi_reduction <add>, %521, %cst_407 [1] : vector<8x8xf32> to vector<8xf32>
    %523 = vector.shape_cast %522 : vector<8xf32> to vector<8x1xf32>
    %524 = tpu.reciprocal %523 {approx = true} : vector<8x1xf32> -> vector<8x1xf32>
    %525 = vector.broadcast %524 : vector<8x1xf32> to vector<8x8xf32>
    %526 = arith.mulf %521, %525 : vector<8x8xf32>
    %527 = vector.extract_strided_slice %498 {offsets = [8, 0], sizes = [8, 8], strides = [1, 1]} : vector<16x8xf32> to vector<8x8xf32>
    %cst_408 = arith.constant dense<0.000000e+00> : vector<8x8xf32>
    %528 = tpu.matmul %526, %527, %cst_408 {dimension_numbers = #tpu.dot_dimension_numbers<[1], [0], [0], [1], [0, 0, 1, 1], [], []>} : vector<8x8xf32>, vector<8x8xf32>, vector<8x8xf32> -> vector<8x8xf32>
    %529 = tpu.concatenate %513, %528 in 0 : vector<8x8xf32>, vector<8x8xf32> -> vector<16x8xf32>
    %c1_409 = arith.constant 1 : index
    %c3_410 = arith.constant 3 : index
    %c0_411 = arith.constant 0 : index
    %c0_412 = arith.constant 0 : index
    %530 = vector.load %arg5[%c1_409, %c3_410, %c0_411, %c0_412] : memref<2x4x8x32xf32, #tpu.memory_space<vmem>>, vector<1x1x8x32xf32>
    %531 = vector.shape_cast %530 : vector<1x1x8x32xf32> to vector<8x32xf32>
    %cst_413 = arith.constant dense<0.000000e+00> : vector<16x32xf32>
    %532 = tpu.matmul %529, %531, %cst_413 {dimension_numbers = #tpu.dot_dimension_numbers<[1], [0], [0], [1], [0, 0, 1, 1], [], []>} : vector<16x8xf32>, vector<8x32xf32>, vector<16x32xf32> -> vector<16x32xf32>
    %533 = arith.addf %477, %532 : vector<16x32xf32>
    %c1_414 = arith.constant 1 : index
    %c0_415 = arith.constant 0 : index
    %c0_416 = arith.constant 0 : index
    %534 = vector.load %arg6[%c1_414, %c0_415, %c0_416] : memref<2x1x32xf32, #tpu.memory_space<vmem>>, vector<1x1x32xf32>
    %535 = vector.shape_cast %534 : vector<1x1x32xf32> to vector<1x32xf32>
    %536 = vector.broadcast %535 : vector<1x32xf32> to vector<16x32xf32>
    %537 = arith.addf %533, %536 : vector<16x32xf32>
    %538 = arith.addf %537, %310 : vector<16x32xf32>
    %c1_417 = arith.constant 1 : index
    %c0_418 = arith.constant 0 : index
    %c0_419 = arith.constant 0 : index
    %c0_420 = arith.constant 0 : index
    %539 = vector.load %arg7[%c1_417, %c0_418, %c0_419, %c0_420] : memref<2x4x1x32xf32, #tpu.memory_space<vmem>>, vector<1x1x1x32xf32>
    %540 = vector.shape_cast %539 : vector<1x1x1x32xf32> to vector<1x32xf32>
    %c1_421 = arith.constant 1 : index
    %c1_422 = arith.constant 1 : index
    %c0_423 = arith.constant 0 : index
    %c0_424 = arith.constant 0 : index
    %541 = vector.load %arg7[%c1_421, %c1_422, %c0_423, %c0_424] : memref<2x4x1x32xf32, #tpu.memory_space<vmem>>, vector<1x1x1x32xf32>
    %542 = vector.shape_cast %541 : vector<1x1x1x32xf32> to vector<1x32xf32>
    %cst_425 = arith.constant dense<0.000000e+00> : vector<16xf32>
    %543 = vector.multi_reduction <add>, %538, %cst_425 [1] : vector<16x32xf32> to vector<16xf32>
    %544 = vector.shape_cast %543 : vector<16xf32> to vector<16x1xf32>
    %cst_426 = arith.constant 3.200000e+01 : f32
    %545 = vector.broadcast %cst_426 : f32 to vector<16x1xf32>
    %546 = arith.divf %544, %545 : vector<16x1xf32>
    %547 = vector.broadcast %546 : vector<16x1xf32> to vector<16x32xf32>
    %548 = arith.subf %538, %547 : vector<16x32xf32>
    %549 = arith.mulf %548, %548 : vector<16x32xf32>
    %cst_427 = arith.constant dense<0.000000e+00> : vector<16xf32>
    %550 = vector.multi_reduction <add>, %549, %cst_427 [1] : vector<16x32xf32> to vector<16xf32>
    %551 = vector.shape_cast %550 : vector<16xf32> to vector<16x1xf32>
    %cst_428 = arith.constant 3.200000e+01 : f32
    %552 = vector.broadcast %cst_428 : f32 to vector<16x1xf32>
    %553 = arith.divf %551, %552 : vector<16x1xf32>
    %554 = vector.broadcast %546 : vector<16x1xf32> to vector<16x32xf32>
    %555 = arith.subf %538, %554 : vector<16x32xf32>
    %cst_429 = arith.constant 9.99999996E-13 : f32
    %556 = vector.broadcast %cst_429 : f32 to vector<16x1xf32>
    %557 = arith.addf %553, %556 : vector<16x1xf32>
    %558 = math.rsqrt %557 : vector<16x1xf32>
    %559 = vector.broadcast %558 : vector<16x1xf32> to vector<16x32xf32>
    %560 = arith.mulf %555, %559 : vector<16x32xf32>
    %561 = vector.broadcast %540 : vector<1x32xf32> to vector<16x32xf32>
    %562 = arith.mulf %560, %561 : vector<16x32xf32>
    %563 = vector.broadcast %542 : vector<1x32xf32> to vector<16x32xf32>
    %564 = arith.addf %562, %563 : vector<16x32xf32>
    %c1_430 = arith.constant 1 : index
    %c0_431 = arith.constant 0 : index
    %c0_432 = arith.constant 0 : index
    %565 = vector.load %arg8[%c1_430, %c0_431, %c0_432] : memref<2x32x128xf32, #tpu.memory_space<vmem>>, vector<1x32x128xf32>
    %566 = vector.shape_cast %565 : vector<1x32x128xf32> to vector<32x128xf32>
    %cst_433 = arith.constant dense<0.000000e+00> : vector<16x128xf32>
    %567 = tpu.matmul %564, %566, %cst_433 {dimension_numbers = #tpu.dot_dimension_numbers<[1], [0], [0], [1], [0, 0, 1, 1], [], []>} : vector<16x32xf32>, vector<32x128xf32>, vector<16x128xf32> -> vector<16x128xf32>
    %c1_434 = arith.constant 1 : index
    %c0_435 = arith.constant 0 : index
    %c0_436 = arith.constant 0 : index
    %568 = vector.load %arg9[%c1_434, %c0_435, %c0_436] : memref<2x1x128xf32, #tpu.memory_space<vmem>>, vector<1x1x128xf32>
    %569 = vector.shape_cast %568 : vector<1x1x128xf32> to vector<1x128xf32>
    %570 = vector.broadcast %569 : vector<1x128xf32> to vector<16x128xf32>
    %571 = arith.addf %567, %570 : vector<16x128xf32>
    %cst_437 = arith.constant 5.000000e-01 : f32
    %572 = vector.broadcast %cst_437 : f32 to vector<16x128xf32>
    %573 = arith.mulf %572, %571 : vector<16x128xf32>
    %cst_438 = arith.constant 4.471500e-02 : f32
    %574 = vector.broadcast %cst_438 : f32 to vector<16x128xf32>
    %575 = arith.mulf %574, %571 : vector<16x128xf32>
    %576 = arith.mulf %575, %571 : vector<16x128xf32>
    %577 = arith.mulf %576, %571 : vector<16x128xf32>
    %578 = arith.addf %571, %577 : vector<16x128xf32>
    %cst_439 = arith.constant 0.797884583 : f32
    %579 = vector.broadcast %cst_439 : f32 to vector<16x128xf32>
    %580 = arith.mulf %579, %578 : vector<16x128xf32>
    %581 = math.tanh %580 : vector<16x128xf32>
    %cst_440 = arith.constant 1.000000e+00 : f32
    %582 = vector.broadcast %cst_440 : f32 to vector<16x128xf32>
    %583 = arith.addf %582, %581 : vector<16x128xf32>
    %584 = arith.mulf %573, %583 : vector<16x128xf32>
    %c1_441 = arith.constant 1 : index
    %c0_442 = arith.constant 0 : index
    %c0_443 = arith.constant 0 : index
    %585 = vector.load %arg10[%c1_441, %c0_442, %c0_443] : memref<2x128x32xf32, #tpu.memory_space<vmem>>, vector<1x128x32xf32>
    %586 = vector.shape_cast %585 : vector<1x128x32xf32> to vector<128x32xf32>
    %cst_444 = arith.constant dense<0.000000e+00> : vector<16x32xf32>
    %587 = tpu.matmul %584, %586, %cst_444 {dimension_numbers = #tpu.dot_dimension_numbers<[1], [0], [0], [1], [0, 0, 1, 1], [], []>} : vector<16x128xf32>, vector<128x32xf32>, vector<16x32xf32> -> vector<16x32xf32>
    %c1_445 = arith.constant 1 : index
    %c0_446 = arith.constant 0 : index
    %c0_447 = arith.constant 0 : index
    %588 = vector.load %arg11[%c1_445, %c0_446, %c0_447] : memref<2x1x32xf32, #tpu.memory_space<vmem>>, vector<1x1x32xf32>
    %589 = vector.shape_cast %588 : vector<1x1x32xf32> to vector<1x32xf32>
    %590 = vector.broadcast %589 : vector<1x32xf32> to vector<16x32xf32>
    %591 = arith.addf %587, %590 : vector<16x32xf32>
    %592 = arith.addf %591, %564 : vector<16x32xf32>
    %c1_448 = arith.constant 1 : index
    %c2_449 = arith.constant 2 : index
    %c0_450 = arith.constant 0 : index
    %c0_451 = arith.constant 0 : index
    %593 = vector.load %arg7[%c1_448, %c2_449, %c0_450, %c0_451] : memref<2x4x1x32xf32, #tpu.memory_space<vmem>>, vector<1x1x1x32xf32>
    %594 = vector.shape_cast %593 : vector<1x1x1x32xf32> to vector<1x32xf32>
    %c1_452 = arith.constant 1 : index
    %c3_453 = arith.constant 3 : index
    %c0_454 = arith.constant 0 : index
    %c0_455 = arith.constant 0 : index
    %595 = vector.load %arg7[%c1_452, %c3_453, %c0_454, %c0_455] : memref<2x4x1x32xf32, #tpu.memory_space<vmem>>, vector<1x1x1x32xf32>
    %596 = vector.shape_cast %595 : vector<1x1x1x32xf32> to vector<1x32xf32>
    %cst_456 = arith.constant dense<0.000000e+00> : vector<16xf32>
    %597 = vector.multi_reduction <add>, %592, %cst_456 [1] : vector<16x32xf32> to vector<16xf32>
    %598 = vector.shape_cast %597 : vector<16xf32> to vector<16x1xf32>
    %cst_457 = arith.constant 3.200000e+01 : f32
    %599 = vector.broadcast %cst_457 : f32 to vector<16x1xf32>
    %600 = arith.divf %598, %599 : vector<16x1xf32>
    %601 = vector.broadcast %600 : vector<16x1xf32> to vector<16x32xf32>
    %602 = arith.subf %592, %601 : vector<16x32xf32>
    %603 = arith.mulf %602, %602 : vector<16x32xf32>
    %cst_458 = arith.constant dense<0.000000e+00> : vector<16xf32>
    %604 = vector.multi_reduction <add>, %603, %cst_458 [1] : vector<16x32xf32> to vector<16xf32>
    %605 = vector.shape_cast %604 : vector<16xf32> to vector<16x1xf32>
    %cst_459 = arith.constant 3.200000e+01 : f32
    %606 = vector.broadcast %cst_459 : f32 to vector<16x1xf32>
    %607 = arith.divf %605, %606 : vector<16x1xf32>
    %608 = vector.broadcast %600 : vector<16x1xf32> to vector<16x32xf32>
    %609 = arith.subf %592, %608 : vector<16x32xf32>
    %cst_460 = arith.constant 9.99999996E-13 : f32
    %610 = vector.broadcast %cst_460 : f32 to vector<16x1xf32>
    %611 = arith.addf %607, %610 : vector<16x1xf32>
    %612 = math.rsqrt %611 : vector<16x1xf32>
    %613 = vector.broadcast %612 : vector<16x1xf32> to vector<16x32xf32>
    %614 = arith.mulf %609, %613 : vector<16x32xf32>
    %615 = vector.broadcast %594 : vector<1x32xf32> to vector<16x32xf32>
    %616 = arith.mulf %614, %615 : vector<16x32xf32>
    %617 = vector.broadcast %596 : vector<1x32xf32> to vector<16x32xf32>
    %618 = arith.addf %616, %617 : vector<16x32xf32>
    %c0_461 = arith.constant 0 : index
    %c0_462 = arith.constant 0 : index
    %619 = vector.load %arg14[%c0_461, %c0_462] : memref<16x32xf32, #tpu.memory_space<vmem>>, vector<16x32xf32>
    tpu.vector_store %arg14[%c0_461, %c0_462], %618 {strides = array<i32>} : memref<16x32xf32, #tpu.memory_space<vmem>>, vector<16x32xf32>,
    %c0_463 = arith.constant 0 : index
    %c0_464 = arith.constant 0 : index
    %620 = vector.load %arg12[%c0_463, %c0_464] : memref<1x32xf32, #tpu.memory_space<vmem>>, vector<1x32xf32>
    %621 = vector.broadcast %620 : vector<1x32xf32> to vector<16x32xf32>
    %622 = arith.mulf %618, %621 : vector<16x32xf32>
    %cst_465 = arith.constant dense<0.000000e+00> : vector<16xf32>
    %623 = vector.multi_reduction <add>, %622, %cst_465 [1] : vector<16x32xf32> to vector<16xf32>
    %624 = vector.shape_cast %623 : vector<16xf32> to vector<16x1xf32>
    %c0_466 = arith.constant 0 : index
    %625 = memref.load %arg13[%c0_466] : memref<1xf32, #tpu.memory_space<smem>>
    %626 = vector.broadcast %625 : f32 to vector<16x1xf32>
    %627 = arith.addf %624, %626 : vector<16x1xf32>
    %cst_467 = arith.constant 0.000000e+00 : f32
    %628 = vector.broadcast %cst_467 : f32 to vector<16x1xf32>
    %629 = arith.subf %628, %627 : vector<16x1xf32>
    %630 = math.exp %629 : vector<16x1xf32>
    %cst_468 = arith.constant 1.000000e+00 : f32
    %631 = vector.broadcast %cst_468 : f32 to vector<16x1xf32>
    %632 = arith.addf %631, %630 : vector<16x1xf32>
    %633 = tpu.reciprocal %632 {approx = true} : vector<16x1xf32> -> vector<16x1xf32>
    %c0_469 = arith.constant 0 : index
    %c0_470 = arith.constant 0 : index
    %634 = vector.load %arg15[%c0_469, %c0_470] : memref<16x1xf32, #tpu.memory_space<vmem>>, vector<16x1xf32>
    tpu.vector_store %arg15[%c0_469, %c0_470], %633 {strides = array<i32>} : memref<16x1xf32, #tpu.memory_space<vmem>>, vector<16x1xf32>,
    return
  }
  func.func @transform_0(%arg0: i32) -> (i32, i32) {
    %c0_i32 = arith.constant 0 : i32
    %c0_i32_0 = arith.constant 0 : i32
    return %arg0, %c0_i32 : i32, i32
  }
  func.func @transform_1(%arg0: i32) -> (i32, i32) {
    %c0_i32 = arith.constant 0 : i32
    %c0_i32_0 = arith.constant 0 : i32
    %c0_i32_1 = arith.constant 0 : i32
    return %c0_i32, %c0_i32_0 : i32, i32
  }
  func.func @transform_2(%arg0: i32) -> (i32, i32, i32, i32, i32) {
    %c0_i32 = arith.constant 0 : i32
    %c0_i32_0 = arith.constant 0 : i32
    %c0_i32_1 = arith.constant 0 : i32
    %c0_i32_2 = arith.constant 0 : i32
    %c0_i32_3 = arith.constant 0 : i32
    %c0_i32_4 = arith.constant 0 : i32
    return %c0_i32, %c0_i32_0, %c0_i32_1, %c0_i32_2, %c0_i32_3 : i32, i32, i32, i32, i32
  }
  func.func @transform_3(%arg0: i32) -> (i32, i32, i32, i32, i32) {
    %c0_i32 = arith.constant 0 : i32
    %c0_i32_0 = arith.constant 0 : i32
    %c0_i32_1 = arith.constant 0 : i32
    %c0_i32_2 = arith.constant 0 : i32
    %c0_i32_3 = arith.constant 0 : i32
    %c0_i32_4 = arith.constant 0 : i32
    return %c0_i32, %c0_i32_0, %c0_i32_1, %c0_i32_2, %c0_i32_3 : i32, i32, i32, i32, i32
  }
  func.func @transform_4(%arg0: i32) -> (i32, i32, i32, i32) {
    %c0_i32 = arith.constant 0 : i32
    %c0_i32_0 = arith.constant 0 : i32
    %c0_i32_1 = arith.constant 0 : i32
    %c0_i32_2 = arith.constant 0 : i32
    %c0_i32_3 = arith.constant 0 : i32
    return %c0_i32, %c0_i32_0, %c0_i32_1, %c0_i32_2 : i32, i32, i32, i32
  }
  func.func @transform_5(%arg0: i32) -> (i32, i32, i32) {
    %c0_i32 = arith.constant 0 : i32
    %c0_i32_0 = arith.constant 0 : i32
    %c0_i32_1 = arith.constant 0 : i32
    %c0_i32_2 = arith.constant 0 : i32
    return %c0_i32, %c0_i32_0, %c0_i32_1 : i32, i32, i32
  }
  func.func @transform_6(%arg0: i32) -> (i32, i32, i32, i32) {
    %c0_i32 = arith.constant 0 : i32
    %c0_i32_0 = arith.constant 0 : i32
    %c0_i32_1 = arith.constant 0 : i32
    %c0_i32_2 = arith.constant 0 : i32
    %c0_i32_3 = arith.constant 0 : i32
    return %c0_i32, %c0_i32_0, %c0_i32_1, %c0_i32_2 : i32, i32, i32, i32
  }
  func.func @transform_7(%arg0: i32) -> (i32, i32, i32) {
    %c0_i32 = arith.constant 0 : i32
    %c0_i32_0 = arith.constant 0 : i32
    %c0_i32_1 = arith.constant 0 : i32
    %c0_i32_2 = arith.constant 0 : i32
    return %c0_i32, %c0_i32_0, %c0_i32_1 : i32, i32, i32
  }
  func.func @transform_8(%arg0: i32) -> (i32, i32, i32) {
    %c0_i32 = arith.constant 0 : i32
    %c0_i32_0 = arith.constant 0 : i32
    %c0_i32_1 = arith.constant 0 : i32
    %c0_i32_2 = arith.constant 0 : i32
    return %c0_i32, %c0_i32_0, %c0_i32_1 : i32, i32, i32
  }
  func.func @transform_9(%arg0: i32) -> (i32, i32, i32) {
    %c0_i32 = arith.constant 0 : i32
    %c0_i32_0 = arith.constant 0 : i32
    %c0_i32_1 = arith.constant 0 : i32
    %c0_i32_2 = arith.constant 0 : i32
    return %c0_i32, %c0_i32_0, %c0_i32_1 : i32, i32, i32
  }
  func.func @transform_10(%arg0: i32) -> (i32, i32, i32) {
    %c0_i32 = arith.constant 0 : i32
    %c0_i32_0 = arith.constant 0 : i32
    %c0_i32_1 = arith.constant 0 : i32
    %c0_i32_2 = arith.constant 0 : i32
    return %c0_i32, %c0_i32_0, %c0_i32_1 : i32, i32, i32
  }
  func.func @transform_11(%arg0: i32) -> (i32, i32) {
    %c0_i32 = arith.constant 0 : i32
    %c0_i32_0 = arith.constant 0 : i32
    %c0_i32_1 = arith.constant 0 : i32
    return %c0_i32, %c0_i32_0 : i32, i32
  }
  func.func @transform_12(%arg0: i32) -> i32 {
    %c0_i32 = arith.constant 0 : i32
    %c0_i32_0 = arith.constant 0 : i32
    return %c0_i32 : i32
  }
  func.func @transform_13(%arg0: i32) -> (i32, i32) {
    %c0_i32 = arith.constant 0 : i32
    %c0_i32_0 = arith.constant 0 : i32
    return %arg0, %c0_i32 : i32, i32
  }
  func.func @transform_14(%arg0: i32) -> (i32, i32) {
    %c0_i32 = arith.constant 0 : i32
    %c0_i32_0 = arith.constant 0 : i32
    return %arg0, %c0_i32 : i32, i32
  }
}

</mosaic_0001>

<bundles_post_ra>
// kernel: tpu_custom_call.1
= control target key start
LH: loop header
LB: loop body
LE: loop exit
PB: predicated region body
PF: predicated region fallthrough
CT: control target
= control target key end

     0   :  { %vm65_vm0 = vcmask 261120   ;;  %s8663_s0 = inlined_call_operand.vmem [shape: f32[16,32], index: 0, kind: input, shape index: {}]   ;;  %s8664_s1 = inlined_call_operand.vmem [shape: f32[16,32], index: 1, kind: input, shape index: {}]   ;;  %s8665_s2 = inlined_call_operand.vmem [shape: f32[2,3,4,32,8], index: 2, kind: input, shape index: {}]   ;;  %s8666_s3 = inlined_call_operand.vmem [shape: f32[2,3,4,1,8], index: 3, kind: input, shape index: {}]   ;;  %s8667_s4 = inlined_call_operand.vmem [shape: f32[2,4,8,32], index: 4, kind: input, shape index: {}]   ;;  %s8668_s5 = inlined_call_operand.vmem [shape: f32[2,1,32], index: 5, kind: input, shape index: {}]   ;;  %s8669_s6 = inlined_call_operand.vmem [shape: f32[2,4,1,32], index: 6, kind: input, shape index: {}]   ;;  %s8670_s7 = inlined_call_operand.vmem [shape: f32[2,32,128], index: 7, kind: input, shape index: {}]   ;;  %s8671_s8 = inlined_call_operand.vmem [shape: f32[2,1,128], index: 8, kind: input, shape index: {}]   ;;  %s8672_s9 = inlined_call_operand.vmem [shape: f32[2,128,32], index: 9, kind: input, shape index: {}]   ;;  %s8673_s10 = inlined_call_operand.vmem [shape: f32[2,1,32], index: 10, kind: input, shape index: {}]   ;;  %s8674_s11 = inlined_call_operand.vmem [shape: f32[1,32], index: 11, kind: input, shape index: {}]   ;;  %s8675_s12 = inlined_call_operand.<no memory space> [shape: f32[1], index: 12, kind: input, shape index: {}]   ;;  %s8676_s13 = inlined_call_operand.hbm [shape: f32[16,32], index: 13, kind: output, shape index: {0}]   ;;  %s8677_s14 = inlined_call_operand.vmem [shape: f32[16,1], index: 14, kind: output, shape index: {1}]  }
   0x1   :  { %v54_v0 = vld [vmem:[%s8665_s2] sm:$0xff]  ;;  %v55_v1 = vld [vmem:[%s8665_s2 + $0x8] sm:$0xff]  ;;  %v56_v2 = vld [vmem:[%s8665_s2 + $0x10] sm:$0xff] }
   0x2   :  { %v7237_v3 = vpack.c.bf16 %v55_v1, %v54_v0  ;;  %v57_v4 = vld [vmem:[%s8665_s2 + $0x18] sm:$0xff]  ;;  %v48_v5 = vld [vmem:[%s8663_s0] sm:$0xff]  ;;  %v6098_v10 = vld [vmem:[%s8665_s2 + $0x88] sm:$0xff] }
   0x3   :  { %v50_v6 = vld [vmem:[%s8664_s1] sm:$0xff]  ;;  %v7241_v7 = vpack.c.bf16 %v57_v4, %v56_v2  ;;  %v49_v11 = vld [vmem:[%s8663_s0 + $0x8] sm:$0xff] }
   0x4   :  { %v7744_v8 = vadd.f32 %v50_v6, %v48_v5  ;;  %v6097_v9 = vld [vmem:[%s8665_s2 + $0x80] sm:$0xff]  ;;  %7238 = vmatprep.subr.bf16.mxu1 %v7237_v3  ;;  %v51_v12 = vld [vmem:[%s8664_s1 + $0x8] sm:$0xff] }
   0x5   :  { %7240 = vmatpush3.bf16.msra.mxu1 %v7237_v3 }
   0x6   :  { %6689 = vmatprep.mubr.msk.f32.mxu1 %vm65_vm0, %v7744_v8 }
   0x7   :  { %21 = vsyncpa [#allocation4], 0  ;;  %7242 = vmatprep.subr.bf16.mxu1 %v7241_v7  ;;  %v7245_v13 = vpack.c.bf16 %v6098_v10, %v6097_v9  ;;  %v6099_v14 = vld [vmem:[%s8665_s2 + $0x90] sm:$0xff]  ;;  %v6100_v15 = vld [vmem:[%s8665_s2 + $0x98] sm:$0xff]  ;;  %v7766_v16 = vadd.f32 %v51_v12, %v49_v11  ;;  %v7646_v24 = vmov 0.0   ;;  %vm7647_vm1 = vmmov 0  }
   0x8   :  { %v7249_v17 = vpack.c.bf16 %v6100_v15, %v6099_v14  ;;  %v6105_v18 = vld [vmem:[%s8665_s2 + $0x100] sm:$0xff]  ;;  %v6106_v19 = vld [vmem:[%s8665_s2 + $0x108] sm:$0xff]  ;;  %v6107_v21 = vld [vmem:[%s8665_s2 + $0x110] sm:$0xff]  ;;  %6724 = vmatprep.subr.mxu0 %v7646_v24  ;;  %6726 = vmatprep.mubr.msk.f32.mxu0 %vm7647_vm1, %v7646_v24  ;;  %vm323_vm2 = vcmask 64512  }
   0x9   :  { %7244 = vmatpush3.bf16.msra.mxu1 %v7241_v7  ;;  %v7253_v20 = vpack.c.bf16 %v6106_v19, %v6105_v18  ;;  %v6108_v22 = vld [vmem:[%s8665_s2 + $0x118] sm:$0xff]  ;;  %v6102_v27 = vld [vmem:[%s8666_s3 + $0x4] ss:$0 sm:$0xff]  ;;  %v6094_v29 = vld [vmem:[%s8666_s3] ss:$0 sm:$0xff] }
   0xa   :  { %7246 = vmatprep.subr.bf16.mxu1 %v7245_v13  ;;  %v7257_v23 = vpack.c.bf16 %v6108_v22, %v6107_v21  ;;  %v6110_v35 = vld [vmem:[%s8666_s3 + $0x8] ss:$0 sm:$0xff]  ;;  %v6119_v56 = vld [vmem:[%s8665_s2 + $0x20] sm:$0xff]  ;;  %v6121_v59 = vld [vmem:[%s8665_s2 + $0x30] sm:$0xff] }
   0xb   :  { %v6120_v57 = vld [vmem:[%s8665_s2 + $0x28] sm:$0xff]  ;;  %v6122_v60 = vld [vmem:[%s8665_s2 + $0x38] sm:$0xff]  ;;  %v6127_v0 = vld [vmem:[%s8665_s2 + $0xa0] sm:$0xff] }
   0xc   :  { %6690 = vmatmul.mubr.msk.f32.vlgmr.msra.gmra.mrb[0].mxu1 %vm65_vm0, %v7766_v16  ;;  %v7261_v58 = vpack.c.bf16 %v6120_v57, %v6119_v56  ;;  %v7265_v61 = vpack.c.bf16 %v6122_v60, %v6121_v59  ;;  %v6128_v1 = vld [vmem:[%s8665_s2 + $0xa8] sm:$0xff]  ;;  %v6129_v5 = vld [vmem:[%s8665_s2 + $0xb0] sm:$0xff]  ;;  %v6130_v6 = vld [vmem:[%s8665_s2 + $0xb8] sm:$0xff] }
   0xd   :  { %7248 = vmatpush3.bf16.msra.mxu1 %v7245_v13  ;;  %6700 = vmatprep.mubr.msk.f32.mxu1 %vm65_vm0, %v7744_v8  ;;  %v7269_v4 = vpack.c.bf16 %v6128_v1, %v6127_v0  ;;  %v7273_v10 = vpack.c.bf16 %v6130_v6, %v6129_v5  ;;  %v6135_v11 = vld [vmem:[%s8665_s2 + $0x120] sm:$0xff]  ;;  %v6136_v12 = vld [vmem:[%s8665_s2 + $0x128] sm:$0xff]  ;;  %v6137_v14 = vld [vmem:[%s8665_s2 + $0x130] sm:$0xff] }
   0xe   :  { %7250 = vmatprep.subr.bf16.mxu1 %v7249_v17  ;;  %v7277_v13 = vpack.c.bf16 %v6136_v12, %v6135_v11  ;;  %v6138_v15 = vld [vmem:[%s8665_s2 + $0x138] sm:$0xff]  ;;  %v6149_v60 = vld [vmem:[%s8667_s4 + $0x8] sm:$0xff]  ;;  %v6156_v1 = vld [vmem:[%s8665_s2 + $0x50] sm:$0xff] }
   0xf   :  { %v6162_v5 = vld [vmem:[%s8665_s2 + $0xc0] sm:$0xff]  ;;  %v6163_v6 = vld [vmem:[%s8665_s2 + $0xc8] sm:$0xff]  ;;  %v6164_v12 = vld [vmem:[%s8665_s2 + $0xd0] sm:$0xff] }
  0x11   :  { %7252 = vmatpush3.bf16.msra.mxu1 %v7249_v17  ;;  %v7281_v17 = vpack.c.bf16 %v6138_v15, %v6137_v14 }
  0x12   :  { %7254 = vmatprep.subr.bf16.mxu1 %v7253_v20 }
  0x14   :  { %6701 = vmatmul.mubr.msk.f32.vlgmr.msra.gmra.mrb[2].mxu1 %vm65_vm0, %v7766_v16 }
  0x15   :  { %7256 = vmatpush3.bf16.msra.mxu1 %v7253_v20  ;;  %6711 = vmatprep.mubr.msk.f32.mxu1 %vm65_vm0, %v7744_v8 }
  0x16   :  { %7258 = vmatprep.subr.bf16.mxu1 %v7257_v23 }
  0x19   :  { %7260 = vmatpush3.bf16.msra.mxu1 %v7257_v23 }
  0x1a   :  { %6714 = vmatprep.subr.mxu1 %v7646_v24 }
  0x1c   :  { %6712 = vmatmul.mubr.msk.f32.vlgmr.msra.gmra.mrb[4].mxu1 %vm65_vm0, %v7766_v16 }
  0x1d   :  { %6716 = vmatprep.mubr.msk.f32.mxu1 %vm7647_vm1, %v7646_v24 }
  0xdf   :  { %v6691_v25 = vpop.f32.mrb[0].mxu1 }
  0xe0   :  { %v138_v26 = vpop.f32.mrb[1].mxu1  ;;  %v144_v33 = vadd.f32 %v6691_v25, %v6094_v29  ;;  %v6132_v25 = vld [vmem:[%s8666_s3 + $0x5] ss:$0 sm:$0xff] }
  0xe1   :  { %v139_v34 = vadd.f32 %v6094_v29, %v138_v26  ;;  %v6124_v26 = vld [vmem:[%s8666_s3 + $0x1] ss:$0 sm:$0xff] }
  0xe7   :  { %v6702_v28 = vpop.f32.mrb[2].mxu1 }
  0xe8   :  { %v232_v30 = vadd.f32 %v6702_v28, %v6102_v27  ;;  %v226_v31 = vpop.f32.mrb[3].mxu1 }
  0xe9   :  { %v227_v32 = vadd.f32 %v6102_v27, %v226_v31 }
  0xea   :  { %6725 = vmatpush3.xpose.msk.msra.mxu0 %vm323_vm2, %v232_v30 }
  0xeb   :  { %6715 = vmatpush3.xpose.msk.msra.mxu1 %vm323_vm2, %v227_v32  ;;  %7262 = vmatprep.subr.bf16.mxu0 %v7261_v58 }
  0xec   :  { %6719 = vmatprep.subr.mxu1 %v7646_v24 }
  0xed   :  { %6727 = vmatmul.mubr.msk.f32.vlgmr.msra.gmra.mrb[0].mxu0 %vm323_vm2, %v144_v33  ;;  %v6140_v33 = vld [vmem:[%s8666_s3 + $0x9] ss:$0 sm:$0xff] }
  0xee   :  { %6717 = vmatmul.mubr.msk.f32.vlgmr.msra.gmra.mrb[6].mxu1 %vm323_vm2, %v139_v34  ;;  %6742 = vmatprep.mubr.msk.f32.mxu0 %vm65_vm0, %v7744_v8 }
  0xef   :  { %6721 = vmatprep.mubr.msk.f32.mxu1 %vm7647_vm1, %v7646_v24  ;;  %v6713_v36 = vpop.f32.mrb[4].mxu1  ;;  %7264 = vmatpush3.bf16.msra.mxu0 %v7261_v58 }
  0xf0   :  { %v320_v37 = vadd.f32 %v6713_v36, %v6110_v35  ;;  %v314_v38 = vpop.f32.mrb[5].mxu1  ;;  %7266 = vmatprep.subr.bf16.mxu0 %v7265_v61 }
  0xf1   :  { %v315_v39 = vadd.f32 %v6110_v35, %v314_v38 }
  0xf3   :  { %6720 = vmatpush3.msra.mxu1 %v315_v39  ;;  %7268 = vmatpush3.bf16.msra.mxu0 %v7265_v61  ;;  %v644_v61 = vld [vmem:[%s8667_s4] sm:$0xff] }
  0xf4   :  { %6729 = vmatprep.subr.mxu1 %v7646_v24  ;;  %7278 = vmatprep.subr.bf16.mxu0 %v7277_v13 }
  0xf6   :  { %6743 = vmatmul.mubr.msk.f32.vlgmr.msra.gmra.mrb[2].mxu0 %vm65_vm0, %v7766_v16 }
  0xf7   :  { %6764 = vmatprep.mubr.msk.f32.mxu0 %vm65_vm0, %v7744_v8  ;;  %7280 = vmatpush3.bf16.msra.mxu0 %v7277_v13  ;;  %v6165_v13 = vld [vmem:[%s8665_s2 + $0xd8] sm:$0xff] }
  0xf8   :  { %7282 = vmatprep.subr.bf16.mxu0 %v7281_v17  ;;  %v7297_v14 = vpack.c.bf16 %v6165_v13, %v6164_v12 }
  0xfb   :  { %7284 = vmatpush3.bf16.msra.mxu0 %v7281_v17 }
  0xfc   :  { %6777 = vmatprep.subr.mxu0 %v7646_v24 }
  0xfe   :  { %6765 = vmatmul.mubr.msk.f32.vlgmr.msra.gmra.mrb[4].mxu0 %vm65_vm0, %v7766_v16 }
  0xff   :  { %6779 = vmatprep.mubr.msk.f32.mxu0 %vm7647_vm1, %v7646_v24 }
 0x1c0   :  { %v556_v40 = vpop.f32.mrb[0].mxu0 }
 0x1c1   :  { %v396_v41 = vpop.f32.mrb[6].mxu1  ;;  %v6728_v42 = vpop.f32.mrb[1].mxu0  ;;  %v560_v45 = vsel %vm323_vm2, %v556_v40, -inf }
 0x1c2   :  { %v6718_v43 = vpop.f32.mrb[7].mxu1  ;;  %v400_v44 = vsel %vm323_vm2, %v396_v41, -inf }
 0x1c3   :  { %401 = vmax.xlane.f32.xlu0 %v400_v44 }
 0x1c7   :  { %561 = vmax.xlane.f32.xlu0 %v560_v45 }
 0x1c9   :  { %v6744_v18 = vpop.f32.mrb[2].mxu0 }
 0x1ca   :  { %v724_v19 = vpop.f32.mrb[3].mxu0  ;;  %v730_v31 = vadd.f32 %v6744_v18, %v6124_v26  ;;  %v6167_v18 = vld [vmem:[%s8666_s3 + $0x6] ss:$0 sm:$0xff] }
 0x1cb   :  { %v725_v32 = vadd.f32 %v6124_v26, %v724_v19 }
 0x1d1   :  { %v6766_v34 = vpop.f32.mrb[4].mxu0 }
 0x1d2   :  { %v906_v35 = vadd.f32 %v6766_v34, %v6140_v33  ;;  %v900_v36 = vpop.f32.mrb[5].mxu0 }
 0x250   :  { %v402_v46 = vpop.xlane.xlu0 %401 }
 0x251   :  { %v403_v47 = vsub.f32 %v396_v41, %v402_v46 }
 0x253   :  { %v404_v48 = vmul.f32 1.442695, %v403_v47 }
 0x254   :  { %v562_v49 = vpop.xlane.xlu0 %561 }
 0x255   :  { %7526 = vpow2.f32 %v404_v48  ;;  %v563_v50 = vsub.f32 %v556_v40, %v562_v49 }
 0x257   :  { %v564_v51 = vmul.f32 1.442695, %v563_v50 }
 0x259   :  { %7528 = vpow2.f32 %v564_v51 }
 0x25f   :  { %v7527_v52 = vpop.eup %7526 }
 0x260   :  { %v406_v53 = vsel %vm323_vm2, %v7527_v52, 0.0 }
 0x261   :  { %407 = vadd.xlane.f32.xlu1 %v406_v53 }
 0x263   :  { %v7529_v54 = vpop.eup %7528 }
 0x264   :  { %v566_v55 = vsel %vm323_vm2, %v7529_v54, 0.0 }
 0x265   :  { %567 = vadd.xlane.f32.xlu1 %v566_v55 }
 0x2ee   :  { %v408_v62 = vpop.xlane.xlu1 %407 }
 0x2ef   :  { %7530 = vrcp.f32 %v408_v62  ;;  %v6154_v62 = vld [vmem:[%s8665_s2 + $0x40] sm:$0xff] }
 0x2f2   :  { %v568_v63 = vpop.xlane.xlu1 %567 }
 0x2f3   :  { %7532 = vrcp.f32 %v568_v63  ;;  %v6155_v63 = vld [vmem:[%s8665_s2 + $0x48] sm:$0xff] }
 0x2f4   :  { %v7285_v0 = vpack.c.bf16 %v6155_v63, %v6154_v62  ;;  %v6196_v62 = vld [vmem:[%s8665_s2 + $0xe8] sm:$0xff] }
 0x2f9   :  { %v7531_v2 = vpop.eup %7530 }
 0x2fa   :  { %v410_v3 = vmul.f32 %v7531_v2, %v7527_v52  ;;  %v6157_v2 = vld [vmem:[%s8665_s2 + $0x58] sm:$0xff] }
 0x2fc   :  { %6722 = vmatmul.mubr.msk.f32.vlgmr.msra.gmra.mrb[8].mxu1 %vm323_vm2, %v410_v3  ;;  %v7289_v3 = vpack.c.bf16 %v6157_v2, %v6156_v1  ;;  %v6188_v1 = vld [vmem:[%s8665_s2 + $0x68] sm:$0xff] }
 0x2fd   :  { %v7533_v7 = vpop.eup %7532  ;;  %6730 = vmatpush3.msra.mxu1 %v320_v37  ;;  %6731 = vmatprep.mubr.msk.f32.mxu1 %vm7647_vm1, %v7646_v24  ;;  %v901_v37 = vadd.f32 %v6140_v33, %v900_v36 }
 0x2fe   :  { %v570_v9 = vmul.f32 %v7533_v7, %v7529_v54  ;;  %7270 = vmatprep.subr.bf16.mxu1 %v7269_v4 }
 0x300   :  { %6732 = vmatmul.mubr.msk.f32.vlgmr.msra.gmra.mrb[10].mxu1 %vm323_vm2, %v570_v9  ;;  %v7293_v9 = vpack.c.bf16 %v6163_v6, %v6162_v5  ;;  %v6203_v6 = vld [vmem:[%s8665_s2 + $0x160] sm:$0xff] }
 0x301   :  { %7272 = vmatpush3.bf16.msra.mxu1 %v7269_v4  ;;  %6753 = vmatprep.mubr.msk.f32.mxu1 %vm65_vm0, %v7744_v8 }
 0x302   :  { %7274 = vmatprep.subr.bf16.mxu1 %v7273_v10 }
 0x305   :  { %7276 = vmatpush3.bf16.msra.mxu1 %v7273_v10 }
 0x306   :  { %6767 = vmatprep.subr.mxu1 %v7646_v24 }
 0x308   :  { %6754 = vmatmul.mubr.msk.f32.vlgmr.msra.gmra.mrb[12].mxu1 %vm65_vm0, %v7766_v16 }
 0x309   :  { %6769 = vmatprep.mubr.msk.f32.mxu1 %vm7647_vm1, %v7646_v24 }
 0x3cf   :  { %v7875_v20 = vpop.f32.mrb[8].mxu1 }
 0x3d0   :  { %v6723_v21 = vpop.f32.mrb[9].mxu1 }
 0x3d3   :  { %v7877_v22 = vpop.f32.mrb[10].mxu1 }
 0x3d4   :  { %v6733_v23 = vpop.f32.mrb[11].mxu1 }
 0x3db   :  { %v6755_v27 = vpop.f32.mrb[12].mxu1 }
 0x3dc   :  { %v818_v28 = vadd.f32 %v6755_v27, %v6132_v25  ;;  %v812_v29 = vpop.f32.mrb[13].mxu1  ;;  %v6170_v27 = vld [vmem:[%s8665_s2 + $0x140] sm:$0xff] }
 0x3dd   :  { %v813_v30 = vadd.f32 %v6132_v25, %v812_v29  ;;  %v6172_v29 = vld [vmem:[%s8665_s2 + $0x150] sm:$0xff] }
 0x3de   :  { %6778 = vmatpush3.xpose.msk.msra.mxu0 %vm323_vm2, %v818_v28  ;;  %v6171_v28 = vld [vmem:[%s8665_s2 + $0x148] sm:$0xff] }
 0x3df   :  { %6768 = vmatpush3.xpose.msk.msra.mxu1 %vm323_vm2, %v813_v30  ;;  %6787 = vmatprep.subr.mxu0 %v6149_v60  ;;  %v7301_v30 = vpack.c.bf16 %v6171_v28, %v6170_v27  ;;  %v6200_v28 = vld [vmem:[%s8666_s3 + $0x7] ss:$0 sm:$0xff] }
 0x3e0   :  { %6772 = vmatprep.subr.mxu1 %v7646_v24 }
 0x3e1   :  { %6780 = vmatmul.mubr.msk.f32.vlgmr.msra.gmra.mrb[6].mxu0 %vm323_vm2, %v730_v31  ;;  %v6173_v31 = vld [vmem:[%s8665_s2 + $0x158] sm:$0xff] }
 0x3e2   :  { %6770 = vmatmul.mubr.msk.f32.vlgmr.msra.gmra.mrb[14].mxu1 %vm323_vm2, %v725_v32  ;;  %6788 = vmatpush3.msra.mxu0 %v6149_v60  ;;  %v7305_v32 = vpack.c.bf16 %v6173_v31, %v6172_v29  ;;  %v6184_v60 = vld [vmem:[%s8667_s4 + $0x10] sm:$0xff]  ;;  %v6192_v29 = vld [vmem:[%s8666_s3 + $0x3] ss:$0 sm:$0xff] }
 0x3e3   :  { %6774 = vmatprep.mubr.msk.f32.mxu1 %vm7647_vm1, %v7646_v24  ;;  %6773 = vmatpush3.msra.mxu1 %v901_v37 }
 0x3e4   :  { %6782 = vmatprep.subr.mxu1 %v7646_v24  ;;  %6792 = vmatprep.subr.mxu0 %v644_v61 }
 0x4b4   :  { %v1141_v38 = vpop.f32.mrb[6].mxu0 }
 0x4b5   :  { %v981_v39 = vpop.f32.mrb[14].mxu1  ;;  %v6781_v40 = vpop.f32.mrb[7].mxu0  ;;  %v1145_v41 = vsel %vm323_vm2, %v1141_v38, -inf }
 0x4b6   :  { %1146 = vmax.xlane.f32.xlu1 %v1145_v41  ;;  %v6771_v42 = vpop.f32.mrb[15].mxu1  ;;  %v985_v43 = vsel %vm323_vm2, %v981_v39, -inf }
 0x4b7   :  { %986 = vmax.xlane.f32.xlu0 %v985_v43 }
 0x543   :  { %v1147_v44 = vpop.xlane.xlu1 %1146 }
 0x544   :  { %v1148_v45 = vsub.f32 %v1141_v38, %v1147_v44  ;;  %v987_v46 = vpop.xlane.xlu0 %986 }
 0x545   :  { %v988_v47 = vsub.f32 %v981_v39, %v987_v46 }
 0x546   :  { %v1149_v48 = vmul.f32 1.442695, %v1148_v45 }
 0x547   :  { %v989_v49 = vmul.f32 1.442695, %v988_v47 }
 0x548   :  { %7534 = vpow2.f32 %v1149_v48 }
 0x549   :  { %7536 = vpow2.f32 %v989_v49 }
 0x552   :  { %v7535_v50 = vpop.eup %7534 }
 0x553   :  { %v7537_v51 = vpop.eup %7536  ;;  %v1151_v52 = vsel %vm323_vm2, %v7535_v50, 0.0 }
 0x554   :  { %1152 = vadd.xlane.f32.xlu1 %v1151_v52  ;;  %v991_v53 = vsel %vm323_vm2, %v7537_v51, 0.0 }
 0x555   :  { %992 = vadd.xlane.f32.xlu0 %v991_v53 }
 0x5e1   :  { %v1153_v54 = vpop.xlane.xlu1 %1152 }
 0x5e2   :  { %v993_v55 = vpop.xlane.xlu0 %992 }
 0x5e3   :  { %7538 = vrcp.f32 %v993_v55 }
 0x5e4   :  { %7540 = vrcp.f32 %v1153_v54 }
 0x5ed   :  { %v7539_v56 = vpop.eup %7538 }
 0x5ee   :  { %v995_v57 = vmul.f32 %v7539_v56, %v7537_v51  ;;  %v7541_v58 = vpop.eup %7540 }
 0x5ef   :  { %v1155_v59 = vmul.f32 %v7541_v58, %v7535_v50  ;;  %v6175_v50 = vld [vmem:[%s8666_s3 + $0xa] ss:$0 sm:$0xff] }
 0x5f0   :  { %6775 = vmatmul.mubr.msk.f32.vlgmr.msra.gmra.mrb[16].mxu1 %vm323_vm2, %v995_v57 }
 0x5f1   :  { %6783 = vmatpush3.msra.mxu1 %v906_v35  ;;  %6784 = vmatprep.mubr.msk.f32.mxu1 %vm7647_vm1, %v7646_v24 }
 0x5f2   :  { %7286 = vmatprep.subr.bf16.mxu1 %v7285_v0 }
 0x5f4   :  { %6785 = vmatmul.mubr.msk.f32.vlgmr.msra.gmra.mrb[18].mxu1 %vm323_vm2, %v1155_v59 }
 0x5f5   :  { %6805 = vmatprep.mubr.msk.f32.mxu1 %vm65_vm0, %v7744_v8  ;;  %7288 = vmatpush3.bf16.msra.mxu1 %v7285_v0  ;;  %v6187_v0 = vld [vmem:[%s8665_s2 + $0x60] sm:$0xff] }
 0x5f6   :  { %7290 = vmatprep.subr.bf16.mxu1 %v7289_v3  ;;  %v7309_v2 = vpack.c.bf16 %v6188_v1, %v6187_v0  ;;  %v6220_v0 = vld [vmem:[%s8668_s5] ss:$0 sm:$0xff] }
 0x5f9   :  { %7292 = vmatpush3.bf16.msra.mxu1 %v7289_v3  ;;  %v6189_v3 = vld [vmem:[%s8665_s2 + $0x70] sm:$0xff] }
 0x5fa   :  { %7302 = vmatprep.subr.bf16.mxu1 %v7301_v30 }
 0x5fc   :  { %6806 = vmatmul.mubr.msk.f32.vlgmr.msra.gmra.mrb[20].mxu1 %vm65_vm0, %v7766_v16 }
 0x5fd   :  { %6827 = vmatprep.mubr.msk.f32.mxu1 %vm65_vm0, %v7744_v8  ;;  %7304 = vmatpush3.bf16.msra.mxu1 %v7301_v30 }
 0x5fe   :  { %7306 = vmatprep.subr.bf16.mxu1 %v7305_v32 }
 0x601   :  { %7308 = vmatpush3.bf16.msra.mxu1 %v7305_v32 }
 0x602   :  { %6835 = vmatprep.subr.mxu1 %v7646_v24 }
 0x604   :  { %6828 = vmatmul.mubr.msk.f32.vlgmr.msra.gmra.mrb[22].mxu1 %vm65_vm0, %v7766_v16 }
 0x605   :  { %6837 = vmatprep.mubr.msk.f32.mxu1 %vm7647_vm1, %v7646_v24 }
 0x6c3   :  { %v1065_v4 = vpop.f32.mrb[16].mxu1 }
 0x6c4   :  { %v6776_v7 = vpop.f32.mrb[17].mxu1  ;;  %6789 = vmatprep.mubr.msk.f32.mxu0 %vm323_vm2, %v1065_v4  ;;  %v6190_v4 = vld [vmem:[%s8665_s2 + $0x78] sm:$0xff] }
 0x6c5   :  { %v7313_v5 = vpack.c.bf16 %v6190_v4, %v6189_v3  ;;  %v6204_v7 = vld [vmem:[%s8665_s2 + $0x168] sm:$0xff] }
 0x6c7   :  { %v1225_v10 = vpop.f32.mrb[18].mxu1 }
 0x6c8   :  { %v6786_v11 = vpop.f32.mrb[19].mxu1  ;;  %6790 = vmatmul.mubr.msk.f32.vlgmr.msra.gmra.mrb[8].mxu0 %vm323_vm2, %v1225_v10  ;;  %v7325_v10 = vpack.c.bf16 %v6204_v7, %v6203_v6 }
 0x6c9   :  { %6793 = vmatpush3.msra.mxu0 %v644_v61  ;;  %6794 = vmatprep.mubr.msk.f32.mxu0 %vm323_vm2, %v7875_v20  ;;  %v6159_v20 = vld [vmem:[%s8666_s3 + $0x2] ss:$0 sm:$0xff]  ;;  %v6206_v11 = vld [vmem:[%s8665_s2 + $0x178] sm:$0xff] }
 0x6ca   :  { %7294 = vmatprep.subr.bf16.mxu0 %v7293_v9  ;;  %v6195_v61 = vld [vmem:[%s8665_s2 + $0xe0] sm:$0xff] }
 0x6cb   :  { %v7317_v63 = vpack.c.bf16 %v6196_v62, %v6195_v61 }
 0x6cf   :  { %v6807_v15 = vpop.f32.mrb[20].mxu1 }
 0x6d0   :  { %6795 = vmatmul.mubr.msk.f32.vlgmr.msra.gmra.mrb[8].mxu0 %vm323_vm2, %v7877_v22  ;;  %v1472_v17 = vpop.f32.mrb[21].mxu1  ;;  %v1478_v26 = vadd.f32 %v6807_v15, %v6159_v20  ;;  %v6198_v15 = vld [vmem:[%s8665_s2 + $0xf8] sm:$0xff] }
 0x6d1   :  { %7296 = vmatpush3.bf16.msra.mxu0 %v7293_v9  ;;  %6816 = vmatprep.mubr.msk.f32.mxu0 %vm65_vm0, %v7744_v8  ;;  %v1473_v23 = vadd.f32 %v6159_v20, %v1472_v17  ;;  %v6205_v9 = vld [vmem:[%s8665_s2 + $0x170] sm:$0xff] }
 0x6d2   :  { %7298 = vmatprep.subr.bf16.mxu0 %v7297_v14  ;;  %v7329_v12 = vpack.c.bf16 %v6206_v11, %v6205_v9 }
 0x6d5   :  { %7300 = vmatpush3.bf16.msra.mxu0 %v7297_v14  ;;  %v6197_v14 = vld [vmem:[%s8665_s2 + $0xf0] sm:$0xff] }
 0x6d6   :  { %6830 = vmatprep.subr.mxu0 %v7646_v24 }
 0x6d7   :  { %v6829_v49 = vpop.f32.mrb[22].mxu1 }
 0x6d8   :  { %6817 = vmatmul.mubr.msk.f32.vlgmr.msra.gmra.mrb[10].mxu0 %vm65_vm0, %v7766_v16  ;;  %v1648_v51 = vpop.f32.mrb[23].mxu1  ;;  %v1654_v52 = vadd.f32 %v6829_v49, %v6175_v50 }
 0x6d9   :  { %6832 = vmatprep.mubr.msk.f32.mxu0 %vm7647_vm1, %v7646_v24  ;;  %v1649_v53 = vadd.f32 %v6175_v50, %v1648_v51 }
 0x6db   :  { %6836 = vmatpush3.msra.mxu1 %v1649_v53 }
 0x6dc   :  { %6845 = vmatprep.subr.mxu1 %v7646_v24 }
 0x7ab   :  { %v6818_v19 = vpop.f32.mrb[10].mxu0 }
 0x7ac   :  { %v1560_v21 = vpop.f32.mrb[11].mxu0  ;;  %v1566_v25 = vadd.f32 %v6818_v19, %v6167_v18 }
 0x7ad   :  { %v1561_v22 = vadd.f32 %v6167_v18, %v1560_v21  ;;  %v7321_v18 = vpack.c.bf16 %v6198_v15, %v6197_v14 }
 0x7af   :  { %6831 = vmatpush3.xpose.msk.msra.mxu0 %vm323_vm2, %v1561_v22 }
 0x7b0   :  { %6840 = vmatprep.subr.mxu0 %v7646_v24 }
 0x7b2   :  { %6833 = vmatmul.mubr.msk.f32.vlgmr.msra.gmra.mrb[12].mxu0 %vm323_vm2, %v1473_v23  ;;  %v6208_v23 = vld [vmem:[%s8666_s3 + $0xb] ss:$0 sm:$0xff] }
 0x7b3   :  { %6841 = vmatpush3.xpose.msk.msra.mxu0 %vm323_vm2, %v1566_v25  ;;  %6842 = vmatprep.mubr.msk.f32.mxu0 %vm7647_vm1, %v7646_v24 }
 0x7b4   :  { %6850 = vmatprep.subr.mxu0 %v6184_v60 }
 0x7b6   :  { %6843 = vmatmul.mubr.msk.f32.vlgmr.msra.gmra.mrb[14].mxu0 %vm323_vm2, %v1478_v26 }
 0x7b7   :  { %6851 = vmatpush3.msra.mxu0 %v6184_v60 }
 0x7b8   :  { %7318 = vmatprep.subr.bf16.mxu0 %v7317_v63 }
 0x885   :  { %v1729_v33 = vpop.f32.mrb[12].mxu0 }
 0x886   :  { %v6834_v34 = vpop.f32.mrb[13].mxu0  ;;  %v1733_v35 = vsel %vm323_vm2, %v1729_v33, -inf }
 0x887   :  { %1734 = vmax.xlane.f32.xlu0 %v1733_v35 }
 0x889   :  { %v1889_v36 = vpop.f32.mrb[14].mxu0 }
 0x88a   :  { %v6844_v37 = vpop.f32.mrb[15].mxu0  ;;  %v1893_v38 = vsel %vm323_vm2, %v1889_v36, -inf }
 0x88b   :  { %1894 = vmax.xlane.f32.xlu1 %v1893_v38 }
 0x914   :  { %v1735_v39 = vpop.xlane.xlu0 %1734 }
 0x915   :  { %v1736_v40 = vsub.f32 %v1729_v33, %v1735_v39 }
 0x917   :  { %v1737_v41 = vmul.f32 1.442695, %v1736_v40 }
 0x918   :  { %v1895_v42 = vpop.xlane.xlu1 %1894 }
 0x919   :  { %7542 = vpow2.f32 %v1737_v41  ;;  %v1896_v43 = vsub.f32 %v1889_v36, %v1895_v42 }
 0x91b   :  { %v1897_v44 = vmul.f32 1.442695, %v1896_v43 }
 0x91d   :  { %7544 = vpow2.f32 %v1897_v44 }
 0x923   :  { %v7543_v45 = vpop.eup %7542 }
 0x924   :  { %v1739_v46 = vsel %vm323_vm2, %v7543_v45, 0.0 }
 0x925   :  { %1740 = vadd.xlane.f32.xlu0 %v1739_v46 }
 0x927   :  { %v7545_v47 = vpop.eup %7544 }
 0x928   :  { %v1899_v48 = vsel %vm323_vm2, %v7545_v47, 0.0 }
 0x929   :  { %1900 = vadd.xlane.f32.xlu1 %v1899_v48 }
 0x9b2   :  { %v1741_v54 = vpop.xlane.xlu0 %1740 }
 0x9b3   :  { %7546 = vrcp.f32 %v1741_v54 }
 0x9b6   :  { %v1901_v55 = vpop.xlane.xlu1 %1900 }
 0x9b7   :  { %7548 = vrcp.f32 %v1901_v55 }
 0x9bd   :  { %v7547_v56 = vpop.eup %7546 }
 0x9be   :  { %v1743_v57 = vmul.f32 %v7547_v56, %v7543_v45 }
 0x9c0   :  { %6838 = vmatmul.mubr.msk.f32.vlgmr.msra.gmra.mrb[24].mxu1 %vm323_vm2, %v1743_v57 }
 0x9c1   :  { %v7549_v58 = vpop.eup %7548  ;;  %6846 = vmatpush3.msra.mxu1 %v1654_v52  ;;  %6847 = vmatprep.mubr.msk.f32.mxu1 %vm7647_vm1, %v7646_v24 }
 0x9c2   :  { %v1903_v59 = vmul.f32 %v7549_v58, %v7545_v47  ;;  %7310 = vmatprep.subr.bf16.mxu1 %v7309_v2 }
 0x9c4   :  { %6848 = vmatmul.mubr.msk.f32.vlgmr.msra.gmra.mrb[26].mxu1 %vm323_vm2, %v1903_v59  ;;  %v6217_v59 = vld [vmem:[%s8667_s4 + $0x18] sm:$0xff] }
 0x9c5   :  { %6863 = vmatprep.mubr.msk.f32.mxu1 %vm65_vm0, %v7744_v8  ;;  %7312 = vmatpush3.bf16.msra.mxu1 %v7309_v2 }
 0x9c6   :  { %7314 = vmatprep.subr.bf16.mxu1 %v7313_v5 }
 0x9c9   :  { %7316 = vmatpush3.bf16.msra.mxu1 %v7313_v5 }
 0x9ca   :  { %7326 = vmatprep.subr.bf16.mxu1 %v7325_v10 }
 0x9cc   :  { %6864 = vmatmul.mubr.msk.f32.vlgmr.msra.gmra.mrb[28].mxu1 %vm65_vm0, %v7766_v16 }
 0x9cd   :  { %6885 = vmatprep.mubr.msk.f32.mxu1 %vm65_vm0, %v7744_v8  ;;  %7328 = vmatpush3.bf16.msra.mxu1 %v7325_v10 }
 0x9ce   :  { %7330 = vmatprep.subr.bf16.mxu1 %v7329_v12 }
 0x9d1   :  { %7332 = vmatpush3.bf16.msra.mxu1 %v7329_v12 }
 0x9d2   :  { %6898 = vmatprep.subr.mxu1 %v7646_v24 }
 0x9d4   :  { %6886 = vmatmul.mubr.msk.f32.vlgmr.msra.gmra.mrb[30].mxu1 %vm65_vm0, %v7766_v16 }
 0x9d5   :  { %6900 = vmatprep.mubr.msk.f32.mxu1 %vm7647_vm1, %v7646_v24 }
 0xa93   :  { %v1813_v13 = vpop.f32.mrb[24].mxu1 }
 0xa94   :  { %v6839_v17 = vpop.f32.mrb[25].mxu1  ;;  %6852 = vmatprep.mubr.msk.f32.mxu0 %vm323_vm2, %v1813_v13 }
 0xa97   :  { %v1973_v19 = vpop.f32.mrb[26].mxu1 }
 0xa98   :  { %v6849_v20 = vpop.f32.mrb[27].mxu1  ;;  %6853 = vmatmul.mubr.msk.f32.vlgmr.msra.gmra.mrb[8].mxu0 %vm323_vm2, %v1973_v19 }
 0xa99   :  { %7320 = vmatpush3.bf16.msra.mxu0 %v7317_v63  ;;  %6874 = vmatprep.mubr.msk.f32.mxu0 %vm65_vm0, %v7744_v8  ;;  %v2789_v20 = vld [vmem:[%s8670_s7 + $0x8] sm:$0xff] }
 0xa9a   :  { %7322 = vmatprep.subr.bf16.mxu0 %v7321_v18 }
 0xa9d   :  { %7324 = vmatpush3.bf16.msra.mxu0 %v7321_v18 }
 0xa9e   :  { %6888 = vmatprep.subr.mxu0 %v7646_v24 }
 0xa9f   :  { %v6865_v21 = vpop.f32.mrb[28].mxu1 }
 0xaa0   :  { %6875 = vmatmul.mubr.msk.f32.vlgmr.msra.gmra.mrb[16].mxu0 %vm65_vm0, %v7766_v16  ;;  %v2141_v22 = vpop.f32.mrb[29].mxu1  ;;  %v2147_v34 = vadd.f32 %v6865_v21, %v6192_v29 }
 0xaa1   :  { %6890 = vmatprep.mubr.msk.f32.mxu0 %vm7647_vm1, %v7646_v24  ;;  %v2142_v35 = vadd.f32 %v6192_v29, %v2141_v22  ;;  %v2790_v22 = vld [vmem:[%s8670_s7 + $0x10] sm:$0xff] }
 0xaa7   :  { %v6887_v25 = vpop.f32.mrb[30].mxu1 }
 0xaa8   :  { %v2323_v26 = vadd.f32 %v6887_v25, %v6208_v23  ;;  %v2317_v27 = vpop.f32.mrb[31].mxu1 }
 0xaa9   :  { %v2318_v36 = vadd.f32 %v6208_v23, %v2317_v27  ;;  %v2791_v23 = vld [vmem:[%s8670_s7 + $0x18] sm:$0xff]  ;;  %v2899_v27 = vld [vmem:[%s8672_s9 + $0x8] sm:$0xff] }
 0xaaa   :  { %v7337_v25 = vpack.c.bf16 %v2791_v23, %v2790_v22 }
 0xb73   :  { %v6876_v30 = vpop.f32.mrb[16].mxu0 }
 0xb74   :  { %v2235_v31 = vadd.f32 %v6876_v30, %v6200_v28  ;;  %v2229_v32 = vpop.f32.mrb[17].mxu0 }
 0xb75   :  { %v2230_v33 = vadd.f32 %v6200_v28, %v2229_v32 }
 0xb76   :  { %6899 = vmatpush3.xpose.msk.msra.mxu1 %vm323_vm2, %v2235_v31 }
 0xb77   :  { %6889 = vmatpush3.xpose.msk.msra.mxu0 %vm323_vm2, %v2230_v33 }
 0xb78   :  { %6893 = vmatprep.subr.mxu0 %v7646_v24 }
 0xb79   :  { %6901 = vmatmul.mubr.msk.f32.vlgmr.msra.gmra.mrb[32].mxu1 %vm323_vm2, %v2147_v34 }
 0xb7a   :  { %6891 = vmatmul.mubr.msk.f32.vlgmr.msra.gmra.mrb[18].mxu0 %vm323_vm2, %v2142_v35 }
 0xb7b   :  { %6894 = vmatpush3.msra.mxu0 %v2318_v36  ;;  %6895 = vmatprep.mubr.msk.f32.mxu0 %vm7647_vm1, %v7646_v24  ;;  %v6222_v36 = vld [vmem:[%s8669_s6] ss:$0 sm:$0xff] }
 0xb7c   :  { %6903 = vmatprep.subr.mxu0 %v7646_v24 }
 0xc4c   :  { %v2558_v37 = vpop.f32.mrb[32].mxu1 }
 0xc4d   :  { %v2398_v38 = vpop.f32.mrb[18].mxu0  ;;  %v6902_v39 = vpop.f32.mrb[33].mxu1  ;;  %v2562_v40 = vsel %vm323_vm2, %v2558_v37, -inf }
 0xc4e   :  { %2563 = vmax.xlane.f32.xlu1 %v2562_v40  ;;  %v6892_v41 = vpop.f32.mrb[19].mxu0  ;;  %v2402_v42 = vsel %vm323_vm2, %v2398_v38, -inf  ;;  %v6223_v40 = vld [vmem:[%s8669_s6 + $0x1] ss:$0 sm:$0xff] }
 0xc4f   :  { %2403 = vmax.xlane.f32.xlu0 %v2402_v42 }
 0xcdb   :  { %v2564_v43 = vpop.xlane.xlu1 %2563 }
 0xcdc   :  { %v2565_v44 = vsub.f32 %v2558_v37, %v2564_v43  ;;  %v2404_v45 = vpop.xlane.xlu0 %2403 }
 0xcdd   :  { %v2405_v46 = vsub.f32 %v2398_v38, %v2404_v45  ;;  %v2900_v45 = vld [vmem:[%s8672_s9 + $0x10] sm:$0xff] }
 0xcde   :  { %v2566_v47 = vmul.f32 1.442695, %v2565_v44 }
 0xcdf   :  { %v2406_v48 = vmul.f32 1.442695, %v2405_v46  ;;  %v2901_v46 = vld [vmem:[%s8672_s9 + $0x18] sm:$0xff] }
 0xce0   :  { %7550 = vpow2.f32 %v2566_v47  ;;  %v7345_v47 = vpack.c.bf16 %v2901_v46, %v2900_v45  ;;  %v6233_v46 = vld [vmem:[%s8665_s2 + $0x188] sm:$0xff] }
 0xce1   :  { %7552 = vpow2.f32 %v2406_v48  ;;  %v2902_v48 = vld [vmem:[%s8672_s9 + $0x20] sm:$0xff] }
 0xcea   :  { %v7551_v49 = vpop.eup %7550 }
 0xceb   :  { %v7553_v50 = vpop.eup %7552  ;;  %v2568_v51 = vsel %vm323_vm2, %v7551_v49, 0.0 }
 0xcec   :  { %2569 = vadd.xlane.f32.xlu1 %v2568_v51  ;;  %v2408_v52 = vsel %vm323_vm2, %v7553_v50, 0.0  ;;  %v2904_v51 = vld [vmem:[%s8672_s9 + $0x30] sm:$0xff] }
 0xced   :  { %2409 = vadd.xlane.f32.xlu0 %v2408_v52  ;;  %v2905_v52 = vld [vmem:[%s8672_s9 + $0x38] sm:$0xff] }
 0xd79   :  { %v2570_v53 = vpop.xlane.xlu1 %2569 }
 0xd7a   :  { %v2410_v54 = vpop.xlane.xlu0 %2409 }
 0xd7b   :  { %7554 = vrcp.f32 %v2410_v54  ;;  %v2906_v54 = vld [vmem:[%s8672_s9 + $0x40] sm:$0xff] }
 0xd7c   :  { %7556 = vrcp.f32 %v2570_v53  ;;  %v7353_v53 = vpack.c.bf16 %v2905_v52, %v2904_v51  ;;  %v6240_v51 = vld [vmem:[%s8665_s2 + $0x200] sm:$0xff]  ;;  %v6241_v52 = vld [vmem:[%s8665_s2 + $0x208] sm:$0xff] }
 0xd85   :  { %v7555_v55 = vpop.eup %7554 }
 0xd86   :  { %v2412_v56 = vmul.f32 %v7555_v55, %v7553_v50  ;;  %v7557_v57 = vpop.eup %7556  ;;  %v2907_v55 = vld [vmem:[%s8672_s9 + $0x48] sm:$0xff] }
 0xd87   :  { %v2572_v58 = vmul.f32 %v7557_v57, %v7551_v49  ;;  %v2903_v49 = vld [vmem:[%s8672_s9 + $0x28] sm:$0xff]  ;;  %v2908_v57 = vld [vmem:[%s8672_s9 + $0x50] sm:$0xff] }
 0xd88   :  { %6896 = vmatmul.mubr.msk.f32.vlgmr.msra.gmra.mrb[20].mxu0 %vm323_vm2, %v2412_v56  ;;  %v7349_v50 = vpack.c.bf16 %v2903_v49, %v2902_v48  ;;  %v7357_v56 = vpack.c.bf16 %v2907_v55, %v2906_v54  ;;  %v6234_v48 = vld [vmem:[%s8665_s2 + $0x190] sm:$0xff]  ;;  %v6235_v49 = vld [vmem:[%s8665_s2 + $0x198] sm:$0xff] }
 0xd89   :  { %6904 = vmatpush3.msra.mxu0 %v2323_v26  ;;  %6905 = vmatprep.mubr.msk.f32.mxu0 %vm7647_vm1, %v7646_v24  ;;  %v2898_v26 = vld [vmem:[%s8672_s9] sm:$0xff] }
 0xd8a   :  { %6908 = vmatprep.subr.mxu0 %v6217_v59  ;;  %v7341_v28 = vpack.c.bf16 %v2899_v27, %v2898_v26  ;;  %v6227_v26 = vld [vmem:[%s8673_s10] ss:$0 sm:$0xff] }
 0xd8c   :  { %6906 = vmatmul.mubr.msk.f32.vlgmr.msra.gmra.mrb[22].mxu0 %vm323_vm2, %v2572_v58  ;;  %v2909_v58 = vld [vmem:[%s8672_s9 + $0x58] sm:$0xff] }
 0xd8d   :  { %6909 = vmatpush3.msra.mxu0 %v6217_v59  ;;  %v7361_v59 = vpack.c.bf16 %v2909_v58, %v2908_v57 }
 0xd8e   :  { %7342 = vmatprep.subr.bf16.mxu0 %v7341_v28 }
 0xe5b   :  { %v2482_v60 = vpop.f32.mrb[20].mxu0 }
 0xe5c   :  { %v6897_v61 = vpop.f32.mrb[21].mxu0  ;;  %6910 = vmatprep.mubr.msk.f32.mxu0 %vm323_vm2, %v2482_v60  ;;  %v2910_v60 = vld [vmem:[%s8672_s9 + $0x60] sm:$0xff] }
 0xe5d   :  { %v2911_v61 = vld [vmem:[%s8672_s9 + $0x68] sm:$0xff] }
 0xe5f   :  { %v2642_v62 = vpop.f32.mrb[22].mxu0 }
 0xe60   :  { %v6907_v63 = vpop.f32.mrb[23].mxu0  ;;  %6911 = vmatmul.mubr.msk.f32.vlgmr.msra.gmra.mrb[8].mxu0 %vm323_vm2, %v2642_v62  ;;  %v7365_v62 = vpack.c.bf16 %v2911_v61, %v2910_v60  ;;  %v6230_v61 = vld [vmem:[%s8669_s6 + $0x2] ss:$0 sm:$0xff] }
 0xe61   :  { %7344 = vmatpush3.bf16.msra.mxu0 %v7341_v28  ;;  %v2912_v63 = vld [vmem:[%s8672_s9 + $0x70] sm:$0xff] }
 0xe62   :  { %7346 = vmatprep.subr.bf16.mxu0 %v7345_v47 }
 0xe65   :  { %7348 = vmatpush3.bf16.msra.mxu0 %v7345_v47 }
 0xe66   :  { %7350 = vmatprep.subr.bf16.mxu0 %v7349_v50 }
 0xe69   :  { %7352 = vmatpush3.bf16.msra.mxu0 %v7349_v50  ;;  %v7377_v50 = vpack.c.bf16 %v6235_v49, %v6234_v48 }
 0xe6a   :  { %7354 = vmatprep.subr.bf16.mxu0 %v7353_v53 }
 0xe6d   :  { %7356 = vmatpush3.bf16.msra.mxu0 %v7353_v53  ;;  %v7381_v53 = vpack.c.bf16 %v6241_v52, %v6240_v51  ;;  %v6284_v51 = vld [vmem:[%s8666_s3 + $0x15] ss:$0 sm:$0xff] }
 0xe6e   :  { %7358 = vmatprep.subr.bf16.mxu0 %v7357_v56 }
 0xe71   :  { %7360 = vmatpush3.bf16.msra.mxu0 %v7357_v56 }
 0xe72   :  { %7362 = vmatprep.subr.bf16.mxu0 %v7361_v59 }
 0xe75   :  { %7364 = vmatpush3.bf16.msra.mxu0 %v7361_v59 }
 0xe76   :  { %7366 = vmatprep.subr.bf16.mxu0 %v7365_v62 }
 0xe79   :  { %7368 = vmatpush3.bf16.msra.mxu0 %v7365_v62 }
 0xf33   :  { %v6912_v1 = vpop.f32.mrb[8].mxu0 }
 0xf34   :  { %v2739_v2 = vadd.f32 %v6912_v1, %v6220_v0  ;;  %v2720_v3 = vpop.f32.mrb[9].mxu0 }
 0xf35   :  { %v2738_v4 = vadd.f32 %v6220_v0, %v2720_v3  ;;  %v2913_v0 = vld [vmem:[%s8672_s9 + $0x78] sm:$0xff] }
 0xf36   :  { %v2741_v5 = vadd.f32 %v2739_v2, %v7766_v16  ;;  %v7369_v1 = vpack.c.bf16 %v2913_v0, %v2912_v63  ;;  %v6224_v2 = vld [vmem:[%s8671_s8] ss:$0 sm:$0xff] }
 0xf37   :  { %v2740_v6 = vadd.f32 %v2738_v4, %v7744_v8  ;;  %v2788_v8 = vld [vmem:[%s8670_s7] sm:$0xff] }
 0xf38   :  { %v2748_v7 = vsel %vm65_vm0, %v2741_v5, 0.0  ;;  %v7333_v21 = vpack.c.bf16 %v2789_v20, %v2788_v8  ;;  %7370 = vmatprep.subr.bf16.mxu0 %v7369_v1 }
 0xf39   :  { %2749 = vadd.xlane.f32.xlu1 %v2748_v7  ;;  %v2745_v9 = vsel %vm65_vm0, %v2740_v6, 0.0  ;;  %7372 = vmatpush3.bf16.msra.mxu0 %v7369_v1  ;;  %v6231_v1 = vld [vmem:[%s8669_s6 + $0x3] ss:$0 sm:$0xff] }
 0xf3a   :  { %2746 = vadd.xlane.f32.xlu0 %v2745_v9  ;;  %7334 = vmatprep.subr.bf16.mxu1 %v7333_v21 }
 0xf3b   :  { %7336 = vmatpush3.bf16.msra.mxu1 %v7333_v21  ;;  %7002 = vmatprep.subr.mxu0 %v7646_v24 }
 0xf3c   :  { %7338 = vmatprep.subr.bf16.mxu1 %v7337_v25 }
 0xf3f   :  { %7340 = vmatpush3.bf16.msra.mxu1 %v7337_v25 }
 0xfc6   :  { %v2750_v10 = vpop.xlane.xlu1 %2749 }
 0xfc7   :  { %v2753_v11 = vmul.f32 0.03125, %v2750_v10  ;;  %v2747_v12 = vpop.xlane.xlu0 %2746 }
 0xfc8   :  { %v2752_v13 = vmul.f32 0.03125, %v2747_v12 }
 0xfc9   :  { %v2755_v14 = vsub.f32 %v2741_v5, %v2753_v11 }
 0xfca   :  { %v2754_v15 = vsub.f32 %v2740_v6, %v2752_v13 }
 0xfcb   :  { %v2757_v17 = vmul.f32 %v2755_v14, %v2755_v14 }
 0xfcc   :  { %v2756_v18 = vmul.f32 %v2754_v15, %v2754_v15 }
 0xfcd   :  { %v2761_v19 = vsel %vm65_vm0, %v2757_v17, 0.0 }
 0xfce   :  { %2762 = vadd.xlane.f32.xlu1 %v2761_v19  ;;  %v2758_v16 = vsel %vm65_vm0, %v2756_v18, 0.0 }
 0xfcf   :  { %2759 = vadd.xlane.f32.xlu0 %v2758_v16 }
0x105b   :  { %v2763_v29 = vpop.xlane.xlu1 %2762 }
0x105c   :  { %v2765_v30 = vmul.f32 0.03125, %v2763_v29  ;;  %v2760_v31 = vpop.xlane.xlu0 %2759 }
0x105d   :  { %v2764_v32 = vmul.f32 0.03125, %v2760_v31 }
0x105e   :  { %v2767_v33 = vadd.f32 1e-12, %v2765_v30 }
0x105f   :  { %v2766_v34 = vadd.f32 1e-12, %v2764_v32 }
0x1060   :  { %7558 = vrsqrt.f32 %v2767_v33 }
0x1061   :  { %7560 = vrsqrt.f32 %v2766_v34 }
0x106a   :  { %v7559_v35 = vpop.eup %7558 }
0x106b   :  { %v7561_v37 = vpop.eup %7560  ;;  %v2771_v38 = vmul.f32 %v7559_v35, %v2755_v14 }
0x106c   :  { %v2770_v39 = vmul.f32 %v7561_v37, %v2754_v15 }
0x106d   :  { %v2779_v41 = vmul.f32 %v6222_v36, %v2771_v38 }
0x106e   :  { %v2778_v42 = vmul.f32 %v6222_v36, %v2770_v39 }
0x106f   :  { %v8119_v44 = vadd.f32 %v6223_v40, %v2779_v41 }
0x1070   :  { %v8117_v43 = vadd.f32 %v6223_v40, %v2778_v42 }
0x1072   :  { %6921 = vmatprep.mubr.msk.f32.mxu1 %vm65_vm0, %v8117_v43 }
0x1073   :  { %6922 = vmatmul.mubr.msk.f32.vlgmr.msra.gmra.mrb[34].mxu1 %vm65_vm0, %v8119_v44 }
0x1146   :  { %v6923_v3 = vpop.f32.mrb[34].mxu1 }
0x1147   :  { %v2877_v4 = vadd.f32 %v6923_v3, %v6224_v2  ;;  %v2871_v5 = vpop.f32.mrb[35].mxu1 }
0x1148   :  { %v2872_v6 = vadd.f32 %v6224_v2, %v2871_v5  ;;  %v6243_v5 = vld [vmem:[%s8665_s2 + $0x218] sm:$0xff] }
0x1149   :  { %v2883_v7 = vmul.f32 0.044715, %v2877_v4  ;;  %v2881_v22 = vmul.f32 0.5, %v2877_v4 }
0x114a   :  { %v2882_v9 = vmul.f32 0.044715, %v2872_v6  ;;  %v2880_v20 = vmul.f32 0.5, %v2872_v6 }
0x114b   :  { %v2885_v10 = vmul.f32 %v2883_v7, %v2877_v4 }
0x114c   :  { %v2884_v11 = vmul.f32 %v2882_v9, %v2872_v6 }
0x114d   :  { %v2887_v12 = vmul.f32 %v2885_v10, %v2877_v4  ;;  %v6248_v10 = vld [vmem:[%s8665_s2 + $0x280] sm:$0xff] }
0x114e   :  { %v2886_v13 = vmul.f32 %v2884_v11, %v2872_v6  ;;  %v6249_v11 = vld [vmem:[%s8665_s2 + $0x288] sm:$0xff] }
0x114f   :  { %v2889_v14 = vadd.f32 %v2887_v12, %v2877_v4  ;;  %v6242_v4 = vld [vmem:[%s8665_s2 + $0x210] sm:$0xff]  ;;  %v7389_v12 = vpack.c.bf16 %v6249_v11, %v6248_v10 }
0x1150   :  { %v2888_v15 = vadd.f32 %v2886_v13, %v2872_v6  ;;  %v7385_v9 = vpack.c.bf16 %v6243_v5, %v6242_v4  ;;  %v6250_v13 = vld [vmem:[%s8665_s2 + $0x290] sm:$0xff]  ;;  %v6272_v4 = vld [vmem:[%s8665_s2 + $0x228] sm:$0xff] }
0x1151   :  { %v2891_v17 = vmul.f32 0.7978846, %v2889_v14  ;;  %v6251_v14 = vld [vmem:[%s8665_s2 + $0x298] sm:$0xff] }
0x1152   :  { %v2890_v18 = vmul.f32 0.7978846, %v2888_v15  ;;  %v7393_v15 = vpack.c.bf16 %v6251_v14, %v6250_v13  ;;  %v6274_v13 = vld [vmem:[%s8665_s2 + $0x238] sm:$0xff] }
0x1153   :  { %7562 = vtanh.f32 %v2891_v17 }
0x1154   :  { %7564 = vtanh.f32 %v2890_v18 }
0x115d   :  { %v7563_v19 = vpop.eup %7562 }
0x115e   :  { %v7565_v16 = vpop.eup %7564  ;;  %v2895_v8 = vadd.f32 1.0, %v7563_v19  ;;  %v6263_v19 = vld [vmem:[%s8665_s2 + $0x1a0] sm:$0xff] }
0x115f   :  { %v2894_v21 = vadd.f32 1.0, %v7565_v16  ;;  %v6264_v16 = vld [vmem:[%s8665_s2 + $0x1a8] sm:$0xff] }
0x1160   :  { %v2897_v25 = vmul.f32 %v2895_v8, %v2881_v22  ;;  %v6245_v8 = vld [vmem:[%s8666_s3 + $0x10] ss:$0 sm:$0xff]  ;;  %v6237_v22 = vld [vmem:[%s8666_s3 + $0xc] ss:$0 sm:$0xff] }
0x1161   :  { %v2896_v23 = vmul.f32 %v2894_v21, %v2880_v20  ;;  %v7397_v21 = vpack.c.bf16 %v6264_v16, %v6263_v19 }
0x1163   :  { %6956 = vmatprep.mubr.f32.mxu0 %v2896_v23 }
0x1164   :  { %6957 = vmatmul.mubr.f32.vlgmr.msra.gmra.mrb[24].mxu0 %v2897_v25 }
0x1165   :  { %7004 = vmatprep.mubr.msk.f32.mxu0 %vm7647_vm1, %v7646_v24 }
0x1237   :  { %v6958_v27 = vpop.f32.mrb[24].mxu0 }
0x1238   :  { %v2993_v28 = vadd.f32 %v6958_v27, %v6227_v26  ;;  %v2987_v29 = vpop.f32.mrb[25].mxu0  ;;  %v6266_v27 = vld [vmem:[%s8665_s2 + $0x1b8] sm:$0xff] }
0x1239   :  { %v2988_v30 = vadd.f32 %v6227_v26, %v2987_v29  ;;  %v6265_v26 = vld [vmem:[%s8665_s2 + $0x1b0] sm:$0xff] }
0x123a   :  { %v2997_v31 = vadd.f32 %v2993_v28, %v8119_v44 }
0x123b   :  { %v2996_v32 = vadd.f32 %v2988_v30, %v8117_v43  ;;  %v6232_v43 = vld [vmem:[%s8665_s2 + $0x180] sm:$0xff]  ;;  %v7401_v30 = vpack.c.bf16 %v6266_v27, %v6265_v26 }
0x123c   :  { %v3005_v33 = vsel %vm65_vm0, %v2997_v31, 0.0  ;;  %v7373_v47 = vpack.c.bf16 %v6233_v46, %v6232_v43 }
0x123d   :  { %3006 = vadd.xlane.f32.xlu1 %v3005_v33  ;;  %v3002_v34 = vsel %vm65_vm0, %v2996_v32, 0.0  ;;  %v6280_v33 = vld [vmem:[%s8665_s2 + $0x2a8] sm:$0xff] }
0x123e   :  { %3003 = vadd.xlane.f32.xlu0 %v3002_v34  ;;  %7374 = vmatprep.subr.bf16.mxu1 %v7373_v47  ;;  %v6253_v34 = vld [vmem:[%s8666_s3 + $0x14] ss:$0 sm:$0xff] }
0x123f   :  { %7376 = vmatpush3.bf16.msra.mxu1 %v7373_v47 }
0x1240   :  { %7378 = vmatprep.subr.bf16.mxu1 %v7377_v50 }
0x1243   :  { %7380 = vmatpush3.bf16.msra.mxu1 %v7377_v50 }
0x1244   :  { %7382 = vmatprep.subr.bf16.mxu1 %v7381_v53 }
0x12ca   :  { %v3007_v35 = vpop.xlane.xlu1 %3006 }
0x12cb   :  { %v3009_v36 = vmul.f32 0.03125, %v3007_v35  ;;  %v3004_v37 = vpop.xlane.xlu0 %3003 }
0x12cc   :  { %v3008_v38 = vmul.f32 0.03125, %v3004_v37 }
0x12cd   :  { %v3011_v39 = vsub.f32 %v2997_v31, %v3009_v36 }
0x12ce   :  { %v3010_v40 = vsub.f32 %v2996_v32, %v3008_v38  ;;  %v6279_v32 = vld [vmem:[%s8665_s2 + $0x2a0] sm:$0xff] }
0x12cf   :  { %v3013_v41 = vmul.f32 %v3011_v39, %v3011_v39  ;;  %v7413_v36 = vpack.c.bf16 %v6280_v33, %v6279_v32 }
0x12d0   :  { %v3012_v42 = vmul.f32 %v3010_v40, %v3010_v40 }
0x12d1   :  { %v3017_v45 = vsel %vm65_vm0, %v3013_v41, 0.0 }
0x12d2   :  { %3018 = vadd.xlane.f32.xlu1 %v3017_v45  ;;  %v3014_v44 = vsel %vm65_vm0, %v3012_v42, 0.0 }
0x12d3   :  { %3015 = vadd.xlane.f32.xlu0 %v3014_v44 }
0x135f   :  { %v3019_v54 = vpop.xlane.xlu1 %3018 }
0x1360   :  { %v3021_v55 = vmul.f32 0.03125, %v3019_v54  ;;  %v3016_v56 = vpop.xlane.xlu0 %3015 }
0x1361   :  { %v3020_v57 = vmul.f32 0.03125, %v3016_v56 }
0x1362   :  { %v3023_v58 = vadd.f32 1e-12, %v3021_v55 }
0x1363   :  { %v3022_v59 = vadd.f32 1e-12, %v3020_v57 }
0x1364   :  { %7566 = vrsqrt.f32 %v3023_v58 }
0x1365   :  { %7568 = vrsqrt.f32 %v3022_v59 }
0x136e   :  { %v7567_v60 = vpop.eup %7566 }
0x136f   :  { %v7569_v62 = vpop.eup %7568  ;;  %v3027_v63 = vmul.f32 %v7567_v60, %v3011_v39  ;;  %v6281_v39 = vld [vmem:[%s8665_s2 + $0x2b0] sm:$0xff] }
0x1370   :  { %v3026_v0 = vmul.f32 %v7569_v62, %v3010_v40  ;;  %v6282_v40 = vld [vmem:[%s8665_s2 + $0x2b8] sm:$0xff] }
0x1371   :  { %v3035_v2 = vmul.f32 %v6230_v61, %v3027_v63  ;;  %v7417_v42 = vpack.c.bf16 %v6282_v40, %v6281_v39 }
0x1372   :  { %v3034_v3 = vmul.f32 %v6230_v61, %v3026_v0 }
0x1373   :  { %v8214_v7 = vadd.f32 %v6231_v1, %v3035_v2 }
0x1374   :  { %v8212_v6 = vadd.f32 %v6231_v1, %v3034_v3  ;;  %v6271_v3 = vld [vmem:[%s8665_s2 + $0x220] sm:$0xff] }
0x1375   :  { %v7405_v10 = vpack.c.bf16 %v6272_v4, %v6271_v3  ;;  %v6307_v3 = vld [vmem:[%s8665_s2 + $0x248] sm:$0xff] }
0x1376   :  { %6967 = vmatprep.mubr.msk.f32.mxu1 %vm65_vm0, %v8212_v6 }
0x1377   :  { %6968 = vmatmul.mubr.msk.f32.vlgmr.msra.gmra.mrb[36].mxu1 %vm65_vm0, %v8214_v7 }
0x1378   :  { %7384 = vmatpush3.bf16.msra.mxu1 %v7381_v53  ;;  %6978 = vmatprep.mubr.msk.f32.mxu1 %vm65_vm0, %v8212_v6 }
0x1379   :  { %7386 = vmatprep.subr.bf16.mxu1 %v7385_v9 }
0x137c   :  { %7388 = vmatpush3.bf16.msra.mxu1 %v7385_v9 }
0x137d   :  { %7390 = vmatprep.subr.bf16.mxu1 %v7389_v12 }
0x137f   :  { %6979 = vmatmul.mubr.msk.f32.vlgmr.msra.gmra.mrb[38].mxu1 %vm65_vm0, %v8214_v7 }
0x1380   :  { %7392 = vmatpush3.bf16.msra.mxu1 %v7389_v12  ;;  %6989 = vmatprep.mubr.msk.f32.mxu1 %vm65_vm0, %v8212_v6  ;;  %v6273_v12 = vld [vmem:[%s8665_s2 + $0x230] sm:$0xff] }
0x1381   :  { %7394 = vmatprep.subr.bf16.mxu1 %v7393_v15 }
0x1384   :  { %7396 = vmatpush3.bf16.msra.mxu1 %v7393_v15  ;;  %v7409_v15 = vpack.c.bf16 %v6274_v13, %v6273_v12  ;;  %v6309_v12 = vld [vmem:[%s8665_s2 + $0x258] sm:$0xff] }
0x1385   :  { %6992 = vmatprep.subr.mxu1 %v7646_v24 }
0x1387   :  { %6990 = vmatmul.mubr.msk.f32.vlgmr.msra.gmra.mrb[40].mxu1 %vm65_vm0, %v8214_v7 }
0x1388   :  { %6994 = vmatprep.mubr.msk.f32.mxu1 %vm7647_vm1, %v7646_v24 }
0x144a   :  { %v6969_v17 = vpop.f32.mrb[36].mxu1 }
0x144b   :  { %v3129_v18 = vpop.f32.mrb[37].mxu1  ;;  %v3135_v29 = vadd.f32 %v6969_v17, %v6237_v22 }
0x144c   :  { %v3130_v31 = vadd.f32 %v6237_v22, %v3129_v18 }
0x1452   :  { %v6980_v20 = vpop.f32.mrb[38].mxu1 }
0x1453   :  { %v3223_v23 = vadd.f32 %v6980_v20, %v6245_v8  ;;  %v3217_v25 = vpop.f32.mrb[39].mxu1 }
0x1454   :  { %v3218_v28 = vadd.f32 %v6245_v8, %v3217_v25  ;;  %v6276_v8 = vld [vmem:[%s8666_s3 + $0x11] ss:$0 sm:$0xff] }
0x1455   :  { %7003 = vmatpush3.xpose.msk.msra.mxu0 %vm323_vm2, %v3223_v23 }
0x1456   :  { %6993 = vmatpush3.xpose.msk.msra.mxu1 %vm323_vm2, %v3218_v28  ;;  %7398 = vmatprep.subr.bf16.mxu0 %v7397_v21 }
0x1457   :  { %6997 = vmatprep.subr.mxu1 %v7646_v24 }
0x1458   :  { %7005 = vmatmul.mubr.msk.f32.vlgmr.msra.gmra.mrb[26].mxu0 %vm323_vm2, %v3135_v29 }
0x1459   :  { %6995 = vmatmul.mubr.msk.f32.vlgmr.msra.gmra.mrb[42].mxu1 %vm323_vm2, %v3130_v31  ;;  %7400 = vmatpush3.bf16.msra.mxu0 %v7397_v21  ;;  %v6268_v21 = vld [vmem:[%s8666_s3 + $0xd] ss:$0 sm:$0xff] }
0x145a   :  { %7020 = vmatprep.mubr.msk.f32.mxu0 %vm65_vm0, %v8212_v6  ;;  %v6991_v35 = vpop.f32.mrb[40].mxu1  ;;  %7402 = vmatprep.subr.bf16.mxu0 %v7401_v30 }
0x145b   :  { %v3311_v37 = vadd.f32 %v6991_v35, %v6253_v34  ;;  %v3305_v38 = vpop.f32.mrb[41].mxu1  ;;  %6999 = vmatprep.mubr.msk.f32.mxu1 %vm7647_vm1, %v7646_v24 }
0x145c   :  { %v3306_v41 = vadd.f32 %v6253_v34, %v3305_v38 }
0x145d   :  { %7404 = vmatpush3.bf16.msra.mxu0 %v7401_v30 }
0x145e   :  { %6998 = vmatpush3.msra.mxu1 %v3306_v41  ;;  %7414 = vmatprep.subr.bf16.mxu0 %v7413_v36 }
0x145f   :  { %7007 = vmatprep.subr.mxu1 %v7646_v24 }
0x1460   :  { %7021 = vmatmul.mubr.msk.f32.vlgmr.msra.gmra.mrb[28].mxu0 %vm65_vm0, %v8214_v7 }
0x1461   :  { %7416 = vmatpush3.bf16.msra.mxu0 %v7413_v36  ;;  %7042 = vmatprep.mubr.msk.f32.mxu0 %vm65_vm0, %v8212_v6 }
0x1462   :  { %7418 = vmatprep.subr.bf16.mxu0 %v7417_v42 }
0x1465   :  { %7420 = vmatpush3.bf16.msra.mxu0 %v7417_v42 }
0x1466   :  { %7055 = vmatprep.subr.mxu0 %v7646_v24 }
0x1468   :  { %7043 = vmatmul.mubr.msk.f32.vlgmr.msra.gmra.mrb[30].mxu0 %vm65_vm0, %v8214_v7 }
0x1469   :  { %7057 = vmatprep.mubr.msk.f32.mxu0 %vm7647_vm1, %v7646_v24 }
0x152b   :  { %v3546_v45 = vpop.f32.mrb[26].mxu0 }
0x152c   :  { %v3386_v44 = vpop.f32.mrb[42].mxu1  ;;  %v7006_v43 = vpop.f32.mrb[27].mxu0  ;;  %v3550_v46 = vsel %vm323_vm2, %v3546_v45, -inf }
0x152d   :  { %3551 = vmax.xlane.f32.xlu1 %v3550_v46  ;;  %v6996_v47 = vpop.f32.mrb[43].mxu1  ;;  %v3390_v48 = vsel %vm323_vm2, %v3386_v44, -inf }
0x152e   :  { %3391 = vmax.xlane.f32.xlu0 %v3390_v48  ;;  %v6298_v47 = vld [vmem:[%s8665_s2 + $0x1c0] sm:$0xff]  ;;  %v6299_v48 = vld [vmem:[%s8665_s2 + $0x1c8] sm:$0xff] }
0x1533   :  { %v7022_v49 = vpop.f32.mrb[28].mxu0 }
0x1534   :  { %v3715_v50 = vpop.f32.mrb[29].mxu0  ;;  %v3721_v26 = vadd.f32 %v7022_v49, %v6268_v21 }
0x1535   :  { %v3716_v27 = vadd.f32 %v6268_v21, %v3715_v50 }
0x153b   :  { %v7044_v52 = vpop.f32.mrb[30].mxu0 }
0x153c   :  { %v8300_v53 = vadd.f32 %v7044_v52, %v6284_v51  ;;  %v3891_v54 = vpop.f32.mrb[31].mxu0 }
0x153d   :  { %v3892_v28 = vadd.f32 %v6284_v51, %v3891_v54  ;;  %v7421_v51 = vpack.c.bf16 %v6299_v48, %v6298_v47  ;;  %v6300_v54 = vld [vmem:[%s8665_s2 + $0x1d0] sm:$0xff]  ;;  %v6331_v47 = vld [vmem:[%s8665_s2 + $0x1e0] sm:$0xff]  ;;  %v6332_v48 = vld [vmem:[%s8665_s2 + $0x1e8] sm:$0xff] }
0x15ba   :  { %v3552_v55 = vpop.xlane.xlu1 %3551 }
0x15bb   :  { %v3553_v56 = vsub.f32 %v3546_v45, %v3552_v55  ;;  %v3392_v57 = vpop.xlane.xlu0 %3391  ;;  %v6301_v55 = vld [vmem:[%s8665_s2 + $0x1d8] sm:$0xff] }
0x15bc   :  { %v3393_v58 = vsub.f32 %v3386_v44, %v3392_v57  ;;  %v7425_v57 = vpack.c.bf16 %v6301_v55, %v6300_v54  ;;  %v6334_v54 = vld [vmem:[%s8665_s2 + $0x1f8] sm:$0xff] }
0x15bd   :  { %v3554_v59 = vmul.f32 1.442695, %v3553_v56 }
0x15be   :  { %v3394_v60 = vmul.f32 1.442695, %v3393_v58  ;;  %v6314_v58 = vld [vmem:[%s8665_s2 + $0x2c0] sm:$0xff] }
0x15bf   :  { %7570 = vpow2.f32 %v3554_v59  ;;  %v6315_v59 = vld [vmem:[%s8665_s2 + $0x2c8] sm:$0xff] }
0x15c0   :  { %7572 = vpow2.f32 %v3394_v60  ;;  %v6316_v60 = vld [vmem:[%s8665_s2 + $0x2d0] sm:$0xff] }
0x15c9   :  { %v7571_v61 = vpop.eup %7570 }
0x15ca   :  { %v7573_v62 = vpop.eup %7572  ;;  %v3556_v63 = vsel %vm323_vm2, %v7571_v61, 0.0 }
0x15cb   :  { %3557 = vadd.xlane.f32.xlu1 %v3556_v63  ;;  %v3396_v0 = vsel %vm323_vm2, %v7573_v62, 0.0  ;;  %v6293_v63 = vld [vmem:[%s8667_s4 + $0x28] sm:$0xff] }
0x15cc   :  { %3397 = vadd.xlane.f32.xlu0 %v3396_v0  ;;  %v6262_v0 = vld [vmem:[%s8667_s4 + $0x20] sm:$0xff] }
0x1658   :  { %v3558_v1 = vpop.xlane.xlu1 %3557 }
0x1659   :  { %v3398_v2 = vpop.xlane.xlu0 %3397 }
0x165a   :  { %7574 = vrcp.f32 %v3398_v2  ;;  %v6306_v2 = vld [vmem:[%s8665_s2 + $0x240] sm:$0xff] }
0x165b   :  { %7576 = vrcp.f32 %v3558_v1 }
0x1664   :  { %v7575_v5 = vpop.eup %7574 }
0x1665   :  { %v3400_v9 = vmul.f32 %v7575_v5, %v7573_v62  ;;  %v7577_v11 = vpop.eup %7576  ;;  %v7429_v5 = vpack.c.bf16 %v6307_v3, %v6306_v2 }
0x1666   :  { %v3560_v14 = vmul.f32 %v7577_v11, %v7571_v61  ;;  %v6317_v61 = vld [vmem:[%s8665_s2 + $0x2d8] sm:$0xff]  ;;  %v6308_v11 = vld [vmem:[%s8665_s2 + $0x250] sm:$0xff] }
0x1667   :  { %7000 = vmatmul.mubr.msk.f32.vlgmr.msra.gmra.mrb[44].mxu1 %vm323_vm2, %v3400_v9  ;;  %v7441_v62 = vpack.c.bf16 %v6317_v61, %v6316_v60  ;;  %v7433_v13 = vpack.c.bf16 %v6309_v12, %v6308_v11  ;;  %v6349_v60 = vld [vmem:[%s8665_s2 + $0x2f0] sm:$0xff]  ;;  %v6350_v61 = vld [vmem:[%s8665_s2 + $0x2f8] sm:$0xff] }
0x1668   :  { %7008 = vmatpush3.msra.mxu1 %v3311_v37  ;;  %7009 = vmatprep.mubr.msk.f32.mxu1 %vm7647_vm1, %v7646_v24 }
0x1669   :  { %7406 = vmatprep.subr.bf16.mxu1 %v7405_v10 }
0x166b   :  { %7010 = vmatmul.mubr.msk.f32.vlgmr.msra.gmra.mrb[46].mxu1 %vm323_vm2, %v3560_v14 }
0x166c   :  { %7408 = vmatpush3.bf16.msra.mxu1 %v7405_v10  ;;  %7031 = vmatprep.mubr.msk.f32.mxu1 %vm65_vm0, %v8212_v6 }
0x166d   :  { %7410 = vmatprep.subr.bf16.mxu1 %v7409_v15 }
0x1670   :  { %7412 = vmatpush3.bf16.msra.mxu1 %v7409_v15 }
0x1671   :  { %7045 = vmatprep.subr.mxu1 %v7646_v24 }
0x1673   :  { %7032 = vmatmul.mubr.msk.f32.vlgmr.msra.gmra.mrb[48].mxu1 %vm65_vm0, %v8214_v7 }
0x1674   :  { %7047 = vmatprep.mubr.msk.f32.mxu1 %vm7647_vm1, %v7646_v24 }
0x173a   :  { %v8327_v17 = vpop.f32.mrb[44].mxu1 }
0x173b   :  { %v7001_v18 = vpop.f32.mrb[45].mxu1 }
0x173e   :  { %v8329_v19 = vpop.f32.mrb[46].mxu1 }
0x173f   :  { %v7011_v16 = vpop.f32.mrb[47].mxu1 }
0x1746   :  { %v7033_v20 = vpop.f32.mrb[48].mxu1 }
0x1747   :  { %v3809_v22 = vadd.f32 %v7033_v20, %v6276_v8  ;;  %v3803_v23 = vpop.f32.mrb[49].mxu1 }
0x1748   :  { %v3804_v25 = vadd.f32 %v6276_v8, %v3803_v23  ;;  %v6303_v23 = vld [vmem:[%s8666_s3 + $0xe] ss:$0 sm:$0xff] }
0x1749   :  { %7056 = vmatpush3.xpose.msk.msra.mxu0 %vm323_vm2, %v3809_v22 }
0x174a   :  { %7046 = vmatpush3.xpose.msk.msra.mxu1 %vm323_vm2, %v3804_v25  ;;  %7065 = vmatprep.subr.mxu0 %v6293_v63 }
0x174b   :  { %7050 = vmatprep.subr.mxu1 %v7646_v24 }
0x174c   :  { %7058 = vmatmul.mubr.msk.f32.vlgmr.msra.gmra.mrb[32].mxu0 %vm323_vm2, %v3721_v26 }
0x174d   :  { %7048 = vmatmul.mubr.msk.f32.vlgmr.msra.gmra.mrb[50].mxu1 %vm323_vm2, %v3716_v27  ;;  %7066 = vmatpush3.msra.mxu0 %v6293_v63  ;;  %v6328_v63 = vld [vmem:[%s8667_s4 + $0x30] sm:$0xff] }
0x174e   :  { %7051 = vmatpush3.msra.mxu1 %v3892_v28  ;;  %7052 = vmatprep.mubr.msk.f32.mxu1 %vm7647_vm1, %v7646_v24 }
0x174f   :  { %7060 = vmatprep.subr.mxu1 %v7646_v24  ;;  %7070 = vmatprep.subr.mxu0 %v6262_v0 }
0x181f   :  { %v4132_v29 = vpop.f32.mrb[32].mxu0 }
0x1820   :  { %v3972_v30 = vpop.f32.mrb[50].mxu1  ;;  %v7059_v31 = vpop.f32.mrb[33].mxu0  ;;  %v4136_v32 = vsel %vm323_vm2, %v4132_v29, -inf }
0x1821   :  { %4137 = vmax.xlane.f32.xlu1 %v4136_v32  ;;  %v7049_v33 = vpop.f32.mrb[51].mxu1  ;;  %v3976_v34 = vsel %vm323_vm2, %v3972_v30, -inf }
0x1822   :  { %3977 = vmax.xlane.f32.xlu0 %v3976_v34 }
0x18ae   :  { %v4138_v35 = vpop.xlane.xlu1 %4137 }
0x18af   :  { %v4139_v36 = vsub.f32 %v4132_v29, %v4138_v35  ;;  %v3978_v37 = vpop.xlane.xlu0 %3977 }
0x18b0   :  { %v3979_v38 = vsub.f32 %v3972_v30, %v3978_v37 }
0x18b1   :  { %v4140_v39 = vmul.f32 1.442695, %v4139_v36 }
0x18b2   :  { %v3980_v40 = vmul.f32 1.442695, %v3979_v38 }
0x18b3   :  { %7578 = vpow2.f32 %v4140_v39 }
0x18b4   :  { %7580 = vpow2.f32 %v3980_v40 }
0x18bd   :  { %v7579_v41 = vpop.eup %7578 }
0x18be   :  { %v7581_v42 = vpop.eup %7580  ;;  %v4142_v45 = vsel %vm323_vm2, %v7579_v41, 0.0 }
0x18bf   :  { %4143 = vadd.xlane.f32.xlu1 %v4142_v45  ;;  %v3982_v44 = vsel %vm323_vm2, %v7581_v42, 0.0 }
0x18c0   :  { %3983 = vadd.xlane.f32.xlu0 %v3982_v44 }
0x194c   :  { %v4144_v43 = vpop.xlane.xlu1 %4143 }
0x194d   :  { %v3984_v46 = vpop.xlane.xlu0 %3983 }
0x194e   :  { %7582 = vrcp.f32 %v3984_v46 }
0x194f   :  { %7584 = vrcp.f32 %v4144_v43 }
0x1958   :  { %v7583_v49 = vpop.eup %7582 }
0x1959   :  { %v3986_v50 = vmul.f32 %v7583_v49, %v7581_v42  ;;  %v7585_v52 = vpop.eup %7584 }
0x195a   :  { %v4146_v56 = vmul.f32 %v7585_v52, %v7579_v41  ;;  %v6333_v52 = vld [vmem:[%s8665_s2 + $0x1f0] sm:$0xff] }
0x195b   :  { %7053 = vmatmul.mubr.msk.f32.vlgmr.msra.gmra.mrb[52].mxu1 %vm323_vm2, %v3986_v50 }
0x195c   :  { %7061 = vmatpush3.msra.mxu1 %v8300_v53  ;;  %7062 = vmatprep.mubr.msk.f32.mxu1 %vm7647_vm1, %v7646_v24  ;;  %v7437_v53 = vpack.c.bf16 %v6315_v59, %v6314_v58  ;;  %v6347_v58 = vld [vmem:[%s8665_s2 + $0x2e0] sm:$0xff]  ;;  %v6348_v59 = vld [vmem:[%s8665_s2 + $0x2e8] sm:$0xff] }
0x195d   :  { %7422 = vmatprep.subr.bf16.mxu1 %v7421_v51 }
0x195f   :  { %7063 = vmatmul.mubr.msk.f32.vlgmr.msra.gmra.mrb[54].mxu1 %vm323_vm2, %v4146_v56 }
0x1960   :  { %7424 = vmatpush3.bf16.msra.mxu1 %v7421_v51  ;;  %7083 = vmatprep.mubr.msk.f32.mxu1 %vm65_vm0, %v8212_v6  ;;  %v7445_v51 = vpack.c.bf16 %v6332_v48, %v6331_v47 }
0x1961   :  { %7426 = vmatprep.subr.bf16.mxu1 %v7425_v57 }
0x1964   :  { %7428 = vmatpush3.bf16.msra.mxu1 %v7425_v57  ;;  %v7449_v57 = vpack.c.bf16 %v6334_v54, %v6333_v52 }
0x1965   :  { %7438 = vmatprep.subr.bf16.mxu1 %v7437_v53 }
0x1967   :  { %7084 = vmatmul.mubr.msk.f32.vlgmr.msra.gmra.mrb[56].mxu1 %vm65_vm0, %v8214_v7 }
0x1968   :  { %7440 = vmatpush3.bf16.msra.mxu1 %v7437_v53  ;;  %7105 = vmatprep.mubr.msk.f32.mxu1 %vm65_vm0, %v8212_v6  ;;  %v7461_v53 = vpack.c.bf16 %v6348_v59, %v6347_v58 }
0x1969   :  { %7442 = vmatprep.subr.bf16.mxu1 %v7441_v62 }
0x196c   :  { %7444 = vmatpush3.bf16.msra.mxu1 %v7441_v62  ;;  %v7465_v62 = vpack.c.bf16 %v6350_v61, %v6349_v60 }
0x196d   :  { %7113 = vmatprep.subr.mxu1 %v7646_v24 }
0x196f   :  { %7106 = vmatmul.mubr.msk.f32.vlgmr.msra.gmra.mrb[58].mxu1 %vm65_vm0, %v8214_v7 }
0x1970   :  { %7115 = vmatprep.mubr.msk.f32.mxu1 %vm7647_vm1, %v7646_v24 }
0x1a2e   :  { %v4056_v1 = vpop.f32.mrb[52].mxu1 }
0x1a2f   :  { %v7054_v4 = vpop.f32.mrb[53].mxu1  ;;  %7067 = vmatprep.mubr.msk.f32.mxu0 %vm323_vm2, %v4056_v1  ;;  %v6340_v1 = vld [vmem:[%s8665_s2 + $0x268] sm:$0xff] }
0x1a30   :  { %v6341_v4 = vld [vmem:[%s8665_s2 + $0x270] sm:$0xff] }
0x1a32   :  { %v4216_v9 = vpop.f32.mrb[54].mxu1 }
0x1a33   :  { %v7064_v10 = vpop.f32.mrb[55].mxu1  ;;  %7068 = vmatmul.mubr.msk.f32.vlgmr.msra.gmra.mrb[34].mxu0 %vm323_vm2, %v4216_v9 }
0x1a34   :  { %7071 = vmatpush3.msra.mxu0 %v6262_v0  ;;  %7072 = vmatprep.mubr.msk.f32.mxu0 %vm323_vm2, %v8327_v17  ;;  %v6319_v17 = vld [vmem:[%s8666_s3 + $0x16] ss:$0 sm:$0xff]  ;;  %v6339_v0 = vld [vmem:[%s8665_s2 + $0x260] sm:$0xff] }
0x1a35   :  { %7430 = vmatprep.subr.bf16.mxu0 %v7429_v5  ;;  %v7453_v2 = vpack.c.bf16 %v6340_v1, %v6339_v0 }
0x1a3a   :  { %v7085_v14 = vpop.f32.mrb[56].mxu1 }
0x1a3b   :  { %v4463_v15 = vpop.f32.mrb[57].mxu1  ;;  %7073 = vmatmul.mubr.msk.f32.vlgmr.msra.gmra.mrb[34].mxu0 %vm323_vm2, %v8329_v19  ;;  %v6311_v19 = vld [vmem:[%s8666_s3 + $0x12] ss:$0 sm:$0xff]  ;;  %v4469_v28 = vadd.f32 %v7085_v14, %v6303_v23 }
0x1a3c   :  { %7432 = vmatpush3.bf16.msra.mxu0 %v7429_v5  ;;  %7094 = vmatprep.mubr.msk.f32.mxu0 %vm65_vm0, %v8212_v6  ;;  %v4464_v26 = vadd.f32 %v6303_v23, %v4463_v15  ;;  %v6342_v5 = vld [vmem:[%s8665_s2 + $0x278] sm:$0xff]  ;;  %v6352_v15 = vld [vmem:[%s8666_s3 + $0x17] ss:$0 sm:$0xff] }
0x1a3d   :  { %7434 = vmatprep.subr.bf16.mxu0 %v7433_v13  ;;  %v7457_v10 = vpack.c.bf16 %v6342_v5, %v6341_v4 }
0x1a40   :  { %7436 = vmatpush3.bf16.msra.mxu0 %v7433_v13 }
0x1a41   :  { %7108 = vmatprep.subr.mxu0 %v7646_v24 }
0x1a42   :  { %v7107_v18 = vpop.f32.mrb[58].mxu1 }
0x1a43   :  { %v4645_v16 = vadd.f32 %v7107_v18, %v6319_v17  ;;  %7095 = vmatmul.mubr.msk.f32.vlgmr.msra.gmra.mrb[36].mxu0 %vm65_vm0, %v8214_v7  ;;  %v4639_v8 = vpop.f32.mrb[59].mxu1 }
0x1a44   :  { %v4640_v20 = vadd.f32 %v6319_v17, %v4639_v8  ;;  %7110 = vmatprep.mubr.msk.f32.mxu0 %vm7647_vm1, %v7646_v24  ;;  %v6344_v8 = vld [vmem:[%s8666_s3 + $0x13] ss:$0 sm:$0xff] }
0x1a46   :  { %7114 = vmatpush3.msra.mxu1 %v4640_v20 }
0x1a47   :  { %7123 = vmatprep.subr.mxu1 %v7646_v24 }
0x1b16   :  { %v7096_v21 = vpop.f32.mrb[36].mxu0 }
0x1b17   :  { %v4551_v22 = vpop.f32.mrb[37].mxu0  ;;  %v4557_v27 = vadd.f32 %v7096_v21, %v6311_v19 }
0x1b18   :  { %v4552_v25 = vadd.f32 %v6311_v19, %v4551_v22  ;;  %v6336_v19 = vld [vmem:[%s8666_s3 + $0xf] ss:$0 sm:$0xff] }
0x1b1a   :  { %7109 = vmatpush3.xpose.msk.msra.mxu0 %vm323_vm2, %v4552_v25 }
0x1b1b   :  { %7118 = vmatprep.subr.mxu0 %v7646_v24 }
0x1b1d   :  { %7111 = vmatmul.mubr.msk.f32.vlgmr.msra.gmra.mrb[38].mxu0 %vm323_vm2, %v4464_v26 }
0x1b1e   :  { %7119 = vmatpush3.xpose.msk.msra.mxu0 %vm323_vm2, %v4557_v27  ;;  %7120 = vmatprep.mubr.msk.f32.mxu0 %vm7647_vm1, %v7646_v24 }
0x1b1f   :  { %7128 = vmatprep.subr.mxu0 %v6328_v63 }
0x1b21   :  { %7121 = vmatmul.mubr.msk.f32.vlgmr.msra.gmra.mrb[40].mxu0 %vm323_vm2, %v4469_v28 }
0x1b22   :  { %7129 = vmatpush3.msra.mxu0 %v6328_v63 }
0x1b23   :  { %7454 = vmatprep.subr.bf16.mxu0 %v7453_v2 }
0x1bf0   :  { %v4720_v29 = vpop.f32.mrb[38].mxu0 }
0x1bf1   :  { %v7112_v30 = vpop.f32.mrb[39].mxu0  ;;  %v4724_v31 = vsel %vm323_vm2, %v4720_v29, -inf }
0x1bf2   :  { %4725 = vmax.xlane.f32.xlu0 %v4724_v31 }
0x1bf4   :  { %v4880_v32 = vpop.f32.mrb[40].mxu0 }
0x1bf5   :  { %v7122_v33 = vpop.f32.mrb[41].mxu0  ;;  %v4884_v34 = vsel %vm323_vm2, %v4880_v32, -inf }
0x1bf6   :  { %4885 = vmax.xlane.f32.xlu1 %v4884_v34 }
0x1c7f   :  { %v4726_v35 = vpop.xlane.xlu0 %4725 }
0x1c80   :  { %v4727_v36 = vsub.f32 %v4720_v29, %v4726_v35 }
0x1c82   :  { %v4728_v37 = vmul.f32 1.442695, %v4727_v36 }
0x1c83   :  { %v4886_v38 = vpop.xlane.xlu1 %4885 }
0x1c84   :  { %7586 = vpow2.f32 %v4728_v37  ;;  %v4887_v39 = vsub.f32 %v4880_v32, %v4886_v38 }
0x1c86   :  { %v4888_v40 = vmul.f32 1.442695, %v4887_v39 }
0x1c88   :  { %7588 = vpow2.f32 %v4888_v40 }
0x1c8e   :  { %v7587_v41 = vpop.eup %7586 }
0x1c8f   :  { %v4730_v42 = vsel %vm323_vm2, %v7587_v41, 0.0 }
0x1c90   :  { %4731 = vadd.xlane.f32.xlu0 %v4730_v42 }
0x1c92   :  { %v7589_v45 = vpop.eup %7588 }
0x1c93   :  { %v4890_v44 = vsel %vm323_vm2, %v7589_v45, 0.0 }
0x1c94   :  { %4891 = vadd.xlane.f32.xlu1 %v4890_v44 }
0x1d1d   :  { %v4732_v43 = vpop.xlane.xlu0 %4731 }
0x1d1e   :  { %7590 = vrcp.f32 %v4732_v43 }
0x1d21   :  { %v4892_v46 = vpop.xlane.xlu1 %4891 }
0x1d22   :  { %7592 = vrcp.f32 %v4892_v46 }
0x1d28   :  { %v7591_v49 = vpop.eup %7590 }
0x1d29   :  { %v4734_v50 = vmul.f32 %v7591_v49, %v7587_v41 }
0x1d2b   :  { %7116 = vmatmul.mubr.msk.f32.vlgmr.msra.gmra.mrb[60].mxu1 %vm323_vm2, %v4734_v50  ;;  %v6361_v50 = vld [vmem:[%s8667_s4 + $0x38] sm:$0xff] }
0x1d2c   :  { %v7593_v55 = vpop.eup %7592  ;;  %7124 = vmatpush3.msra.mxu1 %v4645_v16  ;;  %7125 = vmatprep.mubr.msk.f32.mxu1 %vm7647_vm1, %v7646_v24 }
0x1d2d   :  { %v4894_v56 = vmul.f32 %v7593_v55, %v7589_v45  ;;  %7446 = vmatprep.subr.bf16.mxu1 %v7445_v51 }
0x1d2f   :  { %7126 = vmatmul.mubr.msk.f32.vlgmr.msra.gmra.mrb[62].mxu1 %vm323_vm2, %v4894_v56 }
0x1d30   :  { %7448 = vmatpush3.bf16.msra.mxu1 %v7445_v51  ;;  %7141 = vmatprep.mubr.msk.f32.mxu1 %vm65_vm0, %v8212_v6 }
0x1d31   :  { %7450 = vmatprep.subr.bf16.mxu1 %v7449_v57 }
0x1d34   :  { %7452 = vmatpush3.bf16.msra.mxu1 %v7449_v57 }
0x1d35   :  { %7462 = vmatprep.subr.bf16.mxu1 %v7461_v53 }
0x1d37   :  { %7142 = vmatmul.mubr.msk.f32.vlgmr.msra.gmra.mrb[64].mxu1 %vm65_vm0, %v8214_v7 }
0x1d38   :  { %7464 = vmatpush3.bf16.msra.mxu1 %v7461_v53  ;;  %7163 = vmatprep.mubr.msk.f32.mxu1 %vm65_vm0, %v8212_v6 }
0x1d39   :  { %7466 = vmatprep.subr.bf16.mxu1 %v7465_v62 }
0x1d3c   :  { %7468 = vmatpush3.bf16.msra.mxu1 %v7465_v62 }
0x1d3d   :  { %7176 = vmatprep.subr.mxu1 %v7646_v24 }
0x1d3f   :  { %7164 = vmatmul.mubr.msk.f32.vlgmr.msra.gmra.mrb[66].mxu1 %vm65_vm0, %v8214_v7 }
0x1d40   :  { %7178 = vmatprep.mubr.msk.f32.mxu1 %vm7647_vm1, %v7646_v24 }
0x1dfe   :  { %v4804_v3 = vpop.f32.mrb[60].mxu1 }
0x1dff   :  { %v7117_v9 = vpop.f32.mrb[61].mxu1  ;;  %7130 = vmatprep.mubr.msk.f32.mxu0 %vm323_vm2, %v4804_v3 }
0x1e02   :  { %v4964_v11 = vpop.f32.mrb[62].mxu1 }
0x1e03   :  { %v7127_v12 = vpop.f32.mrb[63].mxu1  ;;  %7131 = vmatmul.mubr.msk.f32.vlgmr.msra.gmra.mrb[34].mxu0 %vm323_vm2, %v4964_v11  ;;  %v6371_v11 = vld [vmem:[%s8670_s7 + $0x28] sm:$0xff] }
0x1e04   :  { %7456 = vmatpush3.bf16.msra.mxu0 %v7453_v2  ;;  %7152 = vmatprep.mubr.msk.f32.mxu0 %vm65_vm0, %v8212_v6 }
0x1e05   :  { %7458 = vmatprep.subr.bf16.mxu0 %v7457_v10 }
0x1e08   :  { %7460 = vmatpush3.bf16.msra.mxu0 %v7457_v10 }
0x1e09   :  { %7166 = vmatprep.subr.mxu0 %v7646_v24 }
0x1e0a   :  { %v7143_v13 = vpop.f32.mrb[64].mxu1 }
0x1e0b   :  { %v5132_v14 = vpop.f32.mrb[65].mxu1  ;;  %7153 = vmatmul.mubr.msk.f32.vlgmr.msra.gmra.mrb[42].mxu0 %vm65_vm0, %v8214_v7  ;;  %v5138_v25 = vadd.f32 %v7143_v13, %v6336_v19  ;;  %v6372_v13 = vld [vmem:[%s8670_s7 + $0x30] sm:$0xff] }
0x1e0c   :  { %7168 = vmatprep.mubr.msk.f32.mxu0 %vm7647_vm1, %v7646_v24  ;;  %v5133_v26 = vadd.f32 %v6336_v19, %v5132_v14  ;;  %v6373_v14 = vld [vmem:[%s8670_s7 + $0x38] sm:$0xff] }
0x1e12   :  { %v7165_v17 = vpop.f32.mrb[66].mxu1 }
0x1e13   :  { %v5314_v18 = vadd.f32 %v7165_v17, %v6352_v15  ;;  %v5308_v16 = vpop.f32.mrb[67].mxu1  ;;  %v6378_v17 = vld [vmem:[%s8672_s9 + $0x80] sm:$0xff] }
0x1e14   :  { %v5309_v27 = vadd.f32 %v6352_v15, %v5308_v16  ;;  %v7473_v15 = vpack.c.bf16 %v6373_v14, %v6372_v13 }
0x1ede   :  { %v7154_v20 = vpop.f32.mrb[42].mxu0 }
0x1edf   :  { %v5226_v21 = vadd.f32 %v7154_v20, %v6344_v8  ;;  %v5220_v22 = vpop.f32.mrb[43].mxu0 }
0x1ee0   :  { %v5221_v23 = vadd.f32 %v6344_v8, %v5220_v22 }
0x1ee1   :  { %7177 = vmatpush3.xpose.msk.msra.mxu1 %vm323_vm2, %v5226_v21 }
0x1ee2   :  { %7167 = vmatpush3.xpose.msk.msra.mxu0 %vm323_vm2, %v5221_v23 }
0x1ee3   :  { %7171 = vmatprep.subr.mxu0 %v7646_v24 }
0x1ee4   :  { %7179 = vmatmul.mubr.msk.f32.vlgmr.msra.gmra.mrb[68].mxu1 %vm323_vm2, %v5138_v25 }
0x1ee5   :  { %7169 = vmatmul.mubr.msk.f32.vlgmr.msra.gmra.mrb[44].mxu0 %vm323_vm2, %v5133_v26  ;;  %v6368_v26 = vld [vmem:[%s8669_s6 + $0x4] ss:$0 sm:$0xff] }
0x1ee6   :  { %7172 = vmatpush3.msra.mxu0 %v5309_v27  ;;  %7173 = vmatprep.mubr.msk.f32.mxu0 %vm7647_vm1, %v7646_v24 }
0x1ee7   :  { %7181 = vmatprep.subr.mxu0 %v7646_v24 }
0x1fb7   :  { %v5549_v28 = vpop.f32.mrb[68].mxu1 }
0x1fb8   :  { %v5389_v29 = vpop.f32.mrb[44].mxu0  ;;  %v7180_v30 = vpop.f32.mrb[69].mxu1  ;;  %v5553_v31 = vsel %vm323_vm2, %v5549_v28, -inf }
0x1fb9   :  { %5554 = vmax.xlane.f32.xlu1 %v5553_v31  ;;  %v7170_v32 = vpop.f32.mrb[45].mxu0  ;;  %v5393_v33 = vsel %vm323_vm2, %v5389_v29, -inf  ;;  %v6369_v30 = vld [vmem:[%s8669_s6 + $0x5] ss:$0 sm:$0xff] }
0x1fba   :  { %5394 = vmax.xlane.f32.xlu0 %v5393_v33 }
0x2046   :  { %v5555_v34 = vpop.xlane.xlu1 %5554 }
0x2047   :  { %v5556_v35 = vsub.f32 %v5549_v28, %v5555_v34  ;;  %v5395_v36 = vpop.xlane.xlu0 %5394 }
0x2048   :  { %v5396_v37 = vsub.f32 %v5389_v29, %v5395_v36  ;;  %v6381_v36 = vld [vmem:[%s8672_s9 + $0x98] sm:$0xff] }
0x2049   :  { %v5557_v38 = vmul.f32 1.442695, %v5556_v35  ;;  %v6380_v35 = vld [vmem:[%s8672_s9 + $0x90] sm:$0xff] }
0x204a   :  { %v5397_v39 = vmul.f32 1.442695, %v5396_v37  ;;  %v7481_v37 = vpack.c.bf16 %v6381_v36, %v6380_v35 }
0x204b   :  { %7594 = vpow2.f32 %v5557_v38  ;;  %v6382_v38 = vld [vmem:[%s8672_s9 + $0xa0] sm:$0xff] }
0x204c   :  { %7596 = vpow2.f32 %v5397_v39  ;;  %v6383_v39 = vld [vmem:[%s8672_s9 + $0xa8] sm:$0xff] }
0x2055   :  { %v7595_v40 = vpop.eup %7594 }
0x2056   :  { %v7597_v41 = vpop.eup %7596  ;;  %v5559_v42 = vsel %vm323_vm2, %v7595_v40, 0.0 }
0x2057   :  { %5560 = vadd.xlane.f32.xlu1 %v5559_v42  ;;  %v5399_v45 = vsel %vm323_vm2, %v7597_v41, 0.0  ;;  %v6385_v42 = vld [vmem:[%s8672_s9 + $0xb8] sm:$0xff] }
0x2058   :  { %5400 = vadd.xlane.f32.xlu0 %v5399_v45 }
0x20e4   :  { %v5561_v44 = vpop.xlane.xlu1 %5560 }
0x20e5   :  { %v5401_v43 = vpop.xlane.xlu0 %5400 }
0x20e6   :  { %7598 = vrcp.f32 %v5401_v43  ;;  %v6387_v43 = vld [vmem:[%s8672_s9 + $0xc8] sm:$0xff] }
0x20e7   :  { %7600 = vrcp.f32 %v5561_v44  ;;  %v6386_v44 = vld [vmem:[%s8672_s9 + $0xc0] sm:$0xff] }
0x20f0   :  { %v7599_v46 = vpop.eup %7598 }
0x20f1   :  { %v5403_v47 = vmul.f32 %v7599_v46, %v7597_v41  ;;  %v7601_v48 = vpop.eup %7600  ;;  %v6384_v41 = vld [vmem:[%s8672_s9 + $0xb0] sm:$0xff]  ;;  %v7493_v46 = vpack.c.bf16 %v6387_v43, %v6386_v44  ;;  %v6399_v44 = vld [vmem:[%s8669_s6 + $0x7] ss:$0 sm:$0xff] }
0x20f2   :  { %v5563_v49 = vmul.f32 %v7601_v48, %v7595_v40  ;;  %v7485_v40 = vpack.c.bf16 %v6383_v39, %v6382_v38  ;;  %v7489_v45 = vpack.c.bf16 %v6385_v42, %v6384_v41  ;;  %v6389_v48 = vld [vmem:[%s8672_s9 + $0xd8] sm:$0xff]  ;;  %v6398_v41 = vld [vmem:[%s8669_s6 + $0x6] ss:$0 sm:$0xff]  ;;  %s7648_s6 = smov [#allocation3]  }
0x20f3   :  { %7174 = vmatmul.mubr.msk.f32.vlgmr.msra.gmra.mrb[46].mxu0 %vm323_vm2, %v5403_v47  ;;  %v6388_v47 = vld [vmem:[%s8672_s9 + $0xd0] sm:$0xff]  ;;  %s6079_s28 = sshll.u32 %s7648_s6, 4  ;;  %s6080_s28 = int_to_ptr.vmem [resolvable:$true] %s6079_s28 }
0x20f4   :  { %7182 = vmatpush3.msra.mxu0 %v5314_v18  ;;  %7183 = vmatprep.mubr.msk.f32.mxu0 %vm7647_vm1, %v7646_v24  ;;  %v6365_v24 = vld [vmem:[%s8668_s5 + $0x1] ss:$0 sm:$0xff]  ;;  %v6379_v18 = vld [vmem:[%s8672_s9 + $0x88] sm:$0xff]  ;;  %s7622_s29 = scalar_lea.vmem %s6080_s28, 256  ;;  %p7627_p1 = scmp.lt.s32.totalorder %s6080_s28, %s6080_s28 }
0x20f5   :  { %7186 = vmatprep.subr.mxu0 %v6361_v50  ;;  %v7477_v16 = vpack.c.bf16 %v6379_v18, %v6378_v17  ;;  %p7623_p0 = scmp.ne.s32.totalorder %s6080_s28, %s7622_s29  ;;  %p7628_p2 = scmp.lt.s32.totalorder %s7622_s29, %s7622_s29 }
0x20f7   :  { %7184 = vmatmul.mubr.msk.f32.vlgmr.msra.gmra.mrb[48].mxu0 %vm323_vm2, %v5563_v49  ;;  %v7497_v49 = vpack.c.bf16 %v6389_v48, %v6388_v47  ;;  %v6400_v47 = vld [vmem:[%s8674_s11] ss:$0 sm:$0xff]  ;;  %p7629_p3 = por %p7628_p2, %p7627_p1 }
0x20f8   :  { %7187 = vmatpush3.msra.mxu0 %v6361_v50  ;;  %v6390_v50 = vld [vmem:[%s8672_s9 + $0xe0] sm:$0xff] }
0x20f9   :  { %7478 = vmatprep.subr.bf16.mxu0 %v7477_v16  ;;  %p7630_p4 = pnand %p7629_p3, %p7623_p0 }
0x21c6   :  { %v5473_v51 = vpop.f32.mrb[46].mxu0 }
0x21c7   :  { %v7175_v52 = vpop.f32.mrb[47].mxu0  ;;  %7188 = vmatprep.mubr.msk.f32.mxu0 %vm323_vm2, %v5473_v51  ;;  %v6391_v51 = vld [vmem:[%s8672_s9 + $0xe8] sm:$0xff] }
0x21c8   :  { %v7501_v52 = vpack.c.bf16 %v6391_v51, %v6390_v50 }
0x21ca   :  { %v5633_v54 = vpop.f32.mrb[48].mxu0 }
0x21cb   :  { %v7185_v55 = vpop.f32.mrb[49].mxu0  ;;  %7189 = vmatmul.mubr.msk.f32.vlgmr.msra.gmra.mrb[34].mxu0 %vm323_vm2, %v5633_v54  ;;  %v6392_v54 = vld [vmem:[%s8672_s9 + $0xf0] sm:$0xff] }
0x21cc   :  { %7480 = vmatpush3.bf16.msra.mxu0 %v7477_v16  ;;  %v6393_v55 = vld [vmem:[%s8672_s9 + $0xf8] sm:$0xff] }
0x21cd   :  { %7482 = vmatprep.subr.bf16.mxu0 %v7481_v37 }
0x21d0   :  { %7484 = vmatpush3.bf16.msra.mxu0 %v7481_v37 }
0x21d1   :  { %7486 = vmatprep.subr.bf16.mxu0 %v7485_v40 }
0x21d4   :  { %7488 = vmatpush3.bf16.msra.mxu0 %v7485_v40 }
0x21d5   :  { %7490 = vmatprep.subr.bf16.mxu0 %v7489_v45 }
0x21d8   :  { %7492 = vmatpush3.bf16.msra.mxu0 %v7489_v45 }
0x21d9   :  { %7494 = vmatprep.subr.bf16.mxu0 %v7493_v46 }
0x21dc   :  { %7496 = vmatpush3.bf16.msra.mxu0 %v7493_v46 }
0x21dd   :  { %7498 = vmatprep.subr.bf16.mxu0 %v7497_v49 }
0x21e0   :  { %7500 = vmatpush3.bf16.msra.mxu0 %v7497_v49 }
0x21e1   :  { %7502 = vmatprep.subr.bf16.mxu0 %v7501_v52 }
0x21e4   :  { %7504 = vmatpush3.bf16.msra.mxu0 %v7501_v52 }
0x229e   :  { %v7190_v56 = vpop.f32.mrb[34].mxu0 }
0x229f   :  { %v5731_v57 = vadd.f32 %v7190_v56, %v6365_v24  ;;  %v5711_v58 = vpop.f32.mrb[35].mxu0  ;;  %v6375_v56 = vld [vmem:[%s8671_s8 + $0x1] ss:$0 sm:$0xff] }
0x22a0   :  { %v5730_v59 = vadd.f32 %v6365_v24, %v5711_v58  ;;  %v7505_v24 = vpack.c.bf16 %v6393_v55, %v6392_v54 }
0x22a1   :  { %v5733_v53 = vadd.f32 %v5731_v57, %v8214_v7 }
0x22a2   :  { %v5732_v60 = vadd.f32 %v5730_v59, %v8212_v6  ;;  %v6370_v6 = vld [vmem:[%s8670_s7 + $0x20] sm:$0xff]  ;;  %7506 = vmatprep.subr.bf16.mxu0 %v7505_v24 }
0x22a3   :  { %v5741_v61 = vsel %vm65_vm0, %v5733_v53, 0.0  ;;  %v7469_v12 = vpack.c.bf16 %v6371_v11, %v6370_v6  ;;  %7508 = vmatpush3.bf16.msra.mxu0 %v7505_v24 }
0x22a4   :  { %5742 = vadd.xlane.f32.xlu1 %v5741_v61  ;;  %v5738_v62 = vsel %vm65_vm0, %v5732_v60, 0.0 }
0x22a5   :  { %5739 = vadd.xlane.f32.xlu0 %v5738_v62  ;;  %7470 = vmatprep.subr.bf16.mxu1 %v7469_v12 }
0x22a6   :  { %7472 = vmatpush3.bf16.msra.mxu1 %v7469_v12 }
0x22a7   :  { %7474 = vmatprep.subr.bf16.mxu1 %v7473_v15 }
0x22aa   :  { %7476 = vmatpush3.bf16.msra.mxu1 %v7473_v15  ;;  %v6395_v15 = vld [vmem:[%s8673_s10 + $0x1] ss:$0 sm:$0xff] }
0x2331   :  { %v5743_v63 = vpop.xlane.xlu1 %5742 }
0x2332   :  { %v5745_v0 = vmul.f32 0.03125, %v5743_v63  ;;  %v5740_v1 = vpop.xlane.xlu0 %5739 }
0x2333   :  { %v5744_v2 = vmul.f32 0.03125, %v5740_v1 }
0x2334   :  { %v5747_v3 = vsub.f32 %v5733_v53, %v5745_v0 }
0x2335   :  { %v5746_v4 = vsub.f32 %v5732_v60, %v5744_v2 }
0x2336   :  { %v5749_v5 = vmul.f32 %v5747_v3, %v5747_v3 }
0x2337   :  { %v5748_v9 = vmul.f32 %v5746_v4, %v5746_v4 }
0x2338   :  { %v5753_v10 = vsel %vm65_vm0, %v5749_v5, 0.0 }
0x2339   :  { %5754 = vadd.xlane.f32.xlu1 %v5753_v10  ;;  %v5750_v7 = vsel %vm65_vm0, %v5748_v9, 0.0 }
0x233a   :  { %5751 = vadd.xlane.f32.xlu0 %v5750_v7 }
0x23c6   :  { %v5755_v8 = vpop.xlane.xlu1 %5754 }
0x23c7   :  { %v5757_v20 = vmul.f32 0.03125, %v5755_v8  ;;  %v5752_v19 = vpop.xlane.xlu0 %5751 }
0x23c8   :  { %v5756_v21 = vmul.f32 0.03125, %v5752_v19 }
0x23c9   :  { %v5759_v22 = vadd.f32 1e-12, %v5757_v20 }
0x23ca   :  { %v5758_v23 = vadd.f32 1e-12, %v5756_v21 }
0x23cb   :  { %7602 = vrsqrt.f32 %v5759_v22 }
0x23cc   :  { %7604 = vrsqrt.f32 %v5758_v23 }
0x23d5   :  { %v7603_v25 = vpop.eup %7602 }
0x23d6   :  { %v7605_v27 = vpop.eup %7604  ;;  %v5763_v28 = vmul.f32 %v7603_v25, %v5747_v3 }
0x23d7   :  { %v5762_v29 = vmul.f32 %v7605_v27, %v5746_v4 }
0x23d8   :  { %v5771_v31 = vmul.f32 %v6368_v26, %v5763_v28 }
0x23d9   :  { %v5770_v32 = vmul.f32 %v6368_v26, %v5762_v29 }
0x23da   :  { %v8569_v34 = vadd.f32 %v6369_v30, %v5771_v31 }
0x23db   :  { %v8567_v33 = vadd.f32 %v6369_v30, %v5770_v32 }
0x23dd   :  { %7199 = vmatprep.mubr.msk.f32.mxu1 %vm65_vm0, %v8567_v33 }
0x23de   :  { %7200 = vmatmul.mubr.msk.f32.vlgmr.msra.gmra.mrb[70].mxu1 %vm65_vm0, %v8569_v34 }
0x24b1   :  { %v7201_v57 = vpop.f32.mrb[70].mxu1 }
0x24b2   :  { %v5871_v58 = vadd.f32 %v7201_v57, %v6375_v56  ;;  %v5865_v59 = vpop.f32.mrb[71].mxu1 }
0x24b3   :  { %v5866_v53 = vadd.f32 %v6375_v56, %v5865_v59 }
0x24b4   :  { %v5877_v60 = vmul.f32 0.044715, %v5871_v58  ;;  %v5875_v12 = vmul.f32 0.5, %v5871_v58 }
0x24b5   :  { %v5876_v61 = vmul.f32 0.044715, %v5866_v53  ;;  %v5874_v6 = vmul.f32 0.5, %v5866_v53 }
0x24b6   :  { %v5879_v62 = vmul.f32 %v5877_v60, %v5871_v58 }
0x24b7   :  { %v5878_v63 = vmul.f32 %v5876_v61, %v5866_v53 }
0x24b8   :  { %v5881_v0 = vmul.f32 %v5879_v62, %v5871_v58 }
0x24b9   :  { %v5880_v1 = vmul.f32 %v5878_v63, %v5866_v53 }
0x24ba   :  { %v5883_v2 = vadd.f32 %v5881_v0, %v5871_v58 }
0x24bb   :  { %v5882_v3 = vadd.f32 %v5880_v1, %v5866_v53 }
0x24bc   :  { %v5885_v4 = vmul.f32 0.7978846, %v5883_v2 }
0x24bd   :  { %v5884_v5 = vmul.f32 0.7978846, %v5882_v3 }
0x24be   :  { %7606 = vtanh.f32 %v5885_v4 }
0x24bf   :  { %7608 = vtanh.f32 %v5884_v5 }
0x24c8   :  { %v7607_v9 = vpop.eup %7606 }
0x24c9   :  { %v7609_v10 = vpop.eup %7608  ;;  %v5889_v7 = vadd.f32 1.0, %v7607_v9 }
0x24ca   :  { %v5888_v11 = vadd.f32 1.0, %v7609_v10 }
0x24cb   :  { %v5891_v14 = vmul.f32 %v5889_v7, %v5875_v12 }
0x24cc   :  { %v5890_v13 = vmul.f32 %v5888_v11, %v5874_v6 }
0x24ce   :  { %7234 = vmatprep.mubr.f32.mxu0 %v5890_v13 }
0x24cf   :  { %7235 = vmatmul.mubr.f32.vlgmr.msra.gmra.mrb[50].mxu0 %v5891_v14 }
0x25a2   :  { %v7236_v17 = vpop.f32.mrb[50].mxu0 }
0x25a3   :  { %v5989_v18 = vadd.f32 %v7236_v17, %v6395_v15  ;;  %v5983_v16 = vpop.f32.mrb[51].mxu0 }
0x25a4   :  { %v5984_v8 = vadd.f32 %v6395_v15, %v5983_v16 }
0x25a5   :  { %v5993_v20 = vadd.f32 %v5989_v18, %v8569_v34 }
0x25a6   :  { %v5992_v19 = vadd.f32 %v5984_v8, %v8567_v33 }
0x25a7   :  { %v6001_v21 = vsel %vm65_vm0, %v5993_v20, 0.0 }
0x25a8   :  { %6002 = vadd.xlane.f32.xlu1 %v6001_v21  ;;  %v5998_v22 = vsel %vm65_vm0, %v5992_v19, 0.0 }
0x25a9   :  { %5999 = vadd.xlane.f32.xlu0 %v5998_v22 }
0x2635   :  { %v6003_v23 = vpop.xlane.xlu1 %6002 }
0x2636   :  { %v6005_v25 = vmul.f32 0.03125, %v6003_v23  ;;  %v6000_v26 = vpop.xlane.xlu0 %5999 }
0x2637   :  { %v6004_v27 = vmul.f32 0.03125, %v6000_v26 }
0x2638   :  { %v6007_v28 = vsub.f32 %v5993_v20, %v6005_v25 }
0x2639   :  { %v6006_v29 = vsub.f32 %v5992_v19, %v6004_v27 }
0x263a   :  { %v6009_v30 = vmul.f32 %v6007_v28, %v6007_v28 }
0x263b   :  { %v6008_v31 = vmul.f32 %v6006_v29, %v6006_v29 }
0x263c   :  { %v6013_v32 = vsel %vm65_vm0, %v6009_v30, 0.0 }
0x263d   :  { %6014 = vadd.xlane.f32.xlu1 %v6013_v32  ;;  %v6010_v34 = vsel %vm65_vm0, %v6008_v31, 0.0 }
0x263e   :  { %6011 = vadd.xlane.f32.xlu0 %v6010_v34 }
0x26ca   :  { %v6015_v33 = vpop.xlane.xlu1 %6014 }
0x26cb   :  { %v6017_v35 = vmul.f32 0.03125, %v6015_v33  ;;  %v6012_v36 = vpop.xlane.xlu0 %6011 }
0x26cc   :  { %v6016_v37 = vmul.f32 0.03125, %v6012_v36 }
0x26cd   :  { %v6019_v38 = vadd.f32 1e-12, %v6017_v35 }
0x26ce   :  { %v6018_v39 = vadd.f32 1e-12, %v6016_v37 }
0x26cf   :  { %7610 = vrsqrt.f32 %v6019_v38 }
0x26d0   :  { %7612 = vrsqrt.f32 %v6018_v39 }
0x26d9   :  { %v7611_v40 = vpop.eup %7610 }
0x26da   :  { %v7613_v42 = vpop.eup %7612  ;;  %v6023_v45 = vmul.f32 %v7611_v40, %v6007_v28 }
0x26db   :  { %v6022_v43 = vmul.f32 %v7613_v42, %v6006_v29 }
0x26dc   :  { %v6031_v46 = vmul.f32 %v6398_v41, %v6023_v45 }
0x26dd   :  { %v6030_v48 = vmul.f32 %v6398_v41, %v6022_v43 }
0x26de   :  { %v6039_v49 = vadd.f32 %v6399_v44, %v6031_v46 }
0x26df   :  { %v6038_v50 = vadd.f32 %v6399_v44, %v6030_v48 }
0x26e0   :  { %v6050_v51 = vmul.f32 %v6400_v47, %v6039_v49  ;;  %6041 = vst.msk [vmem:[#allocation3 + $0x8] sm:$0xff] %vm65_vm0, %v6039_v49 }
0x26e1   :  { %v6049_v52 = vmul.f32 %v6400_v47, %v6038_v50  ;;  %6040 = vst.msk [vmem:[#allocation3] sm:$0xff] %vm65_vm0, %v6038_v50 }
0x26e2   :  { %v6054_v54 = vsel %vm65_vm0, %v6050_v51, 0.0 }
0x26e3   :  { %6055 = vadd.xlane.f32.xlu1 %v6054_v54  ;;  %v6051_v55 = vsel %vm65_vm0, %v6049_v52, 0.0 }
0x26e4   :  { %6052 = vadd.xlane.f32.xlu0 %v6051_v55 }
0x26e5   :  { %7633 = shalt.err (!%p7630_p4)
}
0x26e6   :  { %s7634_s15 = scalar_lea.hbm %s8676_s13, 256 }
0x26e7   :  { %p7635_p5 = scmp.ne.s32.totalorder %s8676_s13, %s7634_s15  ;;  %p7638_p6 = scmp.lt.u32.totalorder %s7634_s15, %s8676_s13 }
0x26e9   :  { %p7640_p7 = pnand %p7638_p6, %p7635_p5 }
0x26eb   :  { %7643 = shalt.err (!%p7640_p7)
}
0x26ec   :  { %s7649_s2 = smov 128   ;;  %s7650_s19 = smov 8   ;;  %v6058_v24 = vstv %s8675_s12  ;;  %vm6071_vm3 = vcmask 7168  }
0x26ed   :  { %6085 = dma.vmem_to_hbm [thread:$0]  %s6080_s28, 256, %s8676_s13, [#allocation4], %s7649_s2, %s7649_s2, %s7650_s19  }
0x2770   :  { %v6056_v56 = vpop.xlane.xlu1 %6055 }
0x2771   :  { %v6060_v57 = vadd.f32 %v6058_v24, %v6056_v56  ;;  %v6053_v58 = vpop.xlane.xlu0 %6052 }
0x2772   :  { %v6059_v59 = vadd.f32 %v6058_v24, %v6053_v58 }
0x2773   :  { %v6062_v53 = vsub.f32 0.0, %v6060_v57 }
0x2774   :  { %v6061_v60 = vsub.f32 0.0, %v6059_v59 }
0x2775   :  { %v6065_v61 = vmul.f32 1.442695, %v6062_v53 }
0x2776   :  { %v6063_v62 = vmul.f32 1.442695, %v6061_v60 }
0x2777   :  { %7614 = vpow2.f32 %v6065_v61 }
0x2778   :  { %7616 = vpow2.f32 %v6063_v62 }
0x2781   :  { %v7615_v63 = vpop.eup %7614 }
0x2782   :  { %v7617_v0 = vpop.eup %7616  ;;  %v6068_v1 = vadd.f32 1.0, %v7615_v63 }
0x2783   :  { %v6067_v2 = vadd.f32 1.0, %v7617_v0 }
0x2784   :  { %7618 = vrcp.f32 %v6068_v1 }
0x2785   :  { %7620 = vrcp.f32 %v6067_v2 }
0x278e   :  { %v7619_v3 = vpop.eup %7618 }
0x278f   :  { %v7621_v4 = vpop.eup %7620  ;;  %6073 = vst.msk [vmem:[%s8677_s14 + $0x8] sm:$0xff] %vm6071_vm3, %v7619_v3 }
0x2790   :  { %6072 = vst.msk [vmem:[%s8677_s14] sm:$0xff] %vm6071_vm3, %v7621_v4 }
0x2791   :  { %7644 = dma.done.wait [#allocation4], 256  }
0x2792   :  { %7645 = vsyncadd [#allocation4], 4294967040 }
0x2793   :  { %6093 = vsyncpa [#allocation4], 1 }

</bundles_post_ra>
